<compile_context>
chip_gen: v6e
topology: v6e:2x2x1
jax: 0.10.0
libtpu: 0.0.40
codegen_flags: <defaults>
</compile_context>

<pallas_src>
import jax
import jax.numpy as jnp
from jax.experimental import pallas as pl
from jax.experimental.pallas import tpu as pltpu

D_MODEL = 32
D_FF = 64
HEADS = 4
KERNEL_SIZE = 3        # padding_l = 1 (odd kernel)
EPS = 1e-6             # Norm eps
NEG_INF = -1e9
_LANES = 128


# ----------------------------------------------------------------------------- helpers
def _pick_bt(B):
    """Largest batch tile <= 8 that divides B while keeping >= 2 grid steps (v7x megacore)."""
    target = min(8, max(1, B // 2))
    for cand in range(target, 0, -1):
        if B % cand == 0:
            return cand
    return 1


def _pack_params(params, heads):
    """Pack every parameter into one lane-dense (rows, 128) f32 slab.

    One-time wrapper-side preprocessing:
      * softmax over the conv kernel taps (grid-invariant -> hoisted out of the kernel)
      * fuse the K and V projections into a single (D, 2D) weight / (1, 2D) bias
      * fold the 1/sqrt(d_k) attention scale into the Q projection
    Returns (slab, {name: (row_offset, rows, cols)}) — offsets are static Python ints.
    """
    d_model = params['qw'].shape[0]
    scale = 1.0 / float(d_model // heads) ** 0.5
    entries = [
        ('n1a', params['n1a']), ('n1b', params['n1b']),
        ('n2a', params['n2a']), ('n2b', params['n2b']),
        ('n3a', params['n3a']), ('n3b', params['n3b']),
        ('cl1w', params['cl1w']), ('cl1b', params['cl1b']),
        ('convw', jax.nn.softmax(params['convw'], axis=0)),
        ('cl2w', params['cl2w']), ('cl2b', params['cl2b']),
        ('qw', params['qw'] * scale), ('qb', params['qb'] * scale),
        ('kvw', jnp.concatenate([params['kw'], params['vw']], axis=1)),
        ('kvb', jnp.concatenate([params['kb'], params['vb']], axis=1)),
        ('ow', params['ow']), ('ob', params['ob']),
        ('f1w', params['f1w']), ('f1b', params['f1b']),
        ('f2w', params['f2w']), ('f2b', params['f2b']),
    ]
    offsets = {}
    blocks = []
    off = 0
    for name, p in entries:
        r, c = p.shape
        r_pad = -(-r // 8) * 8            # sublane-align every entry
        offsets[name] = (off, r, c)
        blk = jnp.zeros((r_pad, _LANES), jnp.float32).at[:r, :c].set(p.astype(jnp.float32))
        blocks.append(blk)
        off += r_pad
    return jnp.concatenate(blocks, axis=0), offsets


# ----------------------------------------------------------------------------- wrapper + kernel
def decoder_layer(x, e_outputs, src_mask, trg_mask, params, heads=HEADS):
    B, T, D = x.shape
    S = e_outputs.shape[1]
    dk = D // heads
    bt = _pick_bt(B)

    # glue: mask[:, -1, :].unsqueeze(-1)
    conv_mask = trg_mask[:, -1, :][..., None].astype(jnp.float32)      # (B, T, 1)
    slab, offs = _pack_params(params, heads)
    R = slab.shape[0]

    def kernel(x_ref, e_ref, srcm_ref, convm_ref, p_ref, o_ref):
        f32 = jnp.float32

        def P(name):                       # static slice view of the param slab (free)
            off, r, c = offs[name]
            return p_ref[off:off + r, :c]

        def layer_norm(v, a, b):
            # torch Norm: alpha * (x - mean) / (x.std(unbiased) + eps) + bias
            mean = jnp.mean(v, axis=-1, keepdims=True)
            c = v - mean
            std = jnp.sqrt(jnp.sum(c * c, axis=-1, keepdims=True) * (1.0 / (D - 1)))
            return a * c * pl.reciprocal(std + EPS, approx=True) + b

        def linear(v, wname, bname):
            return jnp.dot(v, P(wname), preferred_element_type=f32) + P(bname)

        x3 = x_ref[...].astype(f32)                        # (bt, T, D)
        e3 = e_ref[...].astype(f32)                        # (bt, S, D)
        xf = x3.reshape(bt * T, D)                         # token-major for the linears
        ef = e3.reshape(bt * S, D)
        # hoisted: computed once per step (not per head) — additive -inf mask bias
        score_bias = jnp.where(srcm_ref[...] == 0.0, NEG_INF, 0.0)    # (bt, 1, S)
        conv_mask_blk = convm_ref[...]                                 # (bt, T, 1)

        # -------- sublayer 1: LightweightConvLayer(norm_1(x), trg_mask) --------
        res = xf
        h = layer_norm(xf, P('n1a'), P('n1b'))
        h = linear(h, 'cl1w', 'cl1b')                      # (bt*T, 2D)
        h = h[:, :D] * jax.nn.sigmoid(h[:, D:])            # GLU
        h3 = h.reshape(bt, T, D)
        h3 = jnp.where(conv_mask_blk == 0.0, 0.0, h3)      # masked_fill(conv_mask==0, 0)
        # LightweightConv1dTBC, kernel_size=3, padding_l=1; weights pre-softmaxed in wrapper.
        # Time shifts are sublane-axis concats with an exact zero boundary row
        # (kept instead of pltpu.roll for exact edge semantics across TPU generations).
        w = P('convw')                                     # (3, D)
        zrow = jnp.zeros((bt, 1, D), f32)
        h_prev = jnp.concatenate([zrow, h3[:, :-1, :]], axis=1)
        h_next = jnp.concatenate([h3[:, 1:, :], zrow], axis=1)
        h3 = w[0:1, :] * h_prev + w[1:2, :] * h3 + w[2:3, :] * h_next
        h = linear(h3.reshape(bt * T, D), 'cl2w', 'cl2b')
        xf2 = res + h

        # -------- sublayer 2: MultiHeadAttention(norm_2(x), e, e, src_mask) --------
        res = xf2
        h = layer_norm(xf2, P('n2a'), P('n2b'))
        q = linear(h, 'qw', 'qb').reshape(bt, T, D)        # 1/sqrt(dk) folded into qw/qb
        kv = linear(ef, 'kvw', 'kvb')                      # fused K|V projection (bt*S, 2D)
        k = kv[:, :D].reshape(bt, S, D)
        v = kv[:, D:].reshape(bt, S, D)
        head_outs = []
        for hh in range(heads):                            # static unrolled loop, dk-wide lane slices
            sl = slice(hh * dk, (hh + 1) * dk)
            sc = jnp.einsum('btd,bsd->bts', q[:, :, sl], k[:, :, sl],
                            preferred_element_type=f32) + score_bias
            m = jnp.max(sc, axis=-1, keepdims=True)
            p = jnp.exp(sc - m)
            attn = p * pl.reciprocal(jnp.sum(p, axis=-1, keepdims=True), approx=True)
            head_outs.append(jnp.einsum('bts,bsd->btd', attn, v[:, :, sl],
                                        preferred_element_type=f32))
        h = jnp.concatenate(head_outs, axis=-1).reshape(bt * T, D)
        h = linear(h, 'ow', 'ob')
        xf3 = res + h

        # -------- sublayer 3: FeedForward(norm_3(x)) --------
        res = xf3
        h = layer_norm(xf3, P('n3a'), P('n3b'))
        h = jnp.maximum(linear(h, 'f1w', 'f1b'), 0.0)
        h = linear(h, 'f2w', 'f2b')
        xf4 = res + h

        o_ref[...] = xf4.reshape(bt, T, D).astype(o_ref.dtype)

    in_specs = [
        pl.BlockSpec((bt, T, D), lambda b: (b, 0, 0)),
        pl.BlockSpec((bt, S, D), lambda b: (b, 0, 0)),
        pl.BlockSpec((bt, 1, S), lambda b: (b, 0, 0)),
        pl.BlockSpec((bt, T, 1), lambda b: (b, 0, 0)),
        pl.BlockSpec((R, _LANES), lambda b: (0, 0)),       # param slab: constant block -> DMA'd once
    ]
    return pl.pallas_call(
        kernel,
        out_shape=jax.ShapeDtypeStruct((B, T, D), x.dtype),
        grid_spec=pltpu.PrefetchScalarGridSpec(
            num_scalar_prefetch=0,
            grid=(B // bt,),
            in_specs=in_specs,
            out_specs=pl.BlockSpec((bt, T, D), lambda b: (b, 0, 0)),
        ),
        compiler_params=pltpu.CompilerParams(dimension_semantics=("parallel",)),
    )(x, e_outputs, src_mask.astype(jnp.float32), conv_mask, slab)


# ----------------------------------------------------------------------------- params
def init_params(key, d_model=D_MODEL, d_ff=D_FF, heads=HEADS, ksize=KERNEL_SIZE):
    ks = iter(jax.random.split(key, 32))

    def w(shape, scale=0.1):
        return jax.random.normal(next(ks), shape, jnp.float32) * scale

    ones = lambda n: jnp.ones((1, n), jnp.float32)
    zeros = lambda n: jnp.zeros((1, n), jnp.float32)

    conv_hk = w((heads, ksize), 0.3)                                  # (H, K) as in PyTorch
    conv_kc = jnp.repeat(conv_hk, d_model // heads, axis=0).T         # head-expanded raw (K, C)

    return dict(
        n1a=ones(d_model), n1b=zeros(d_model),
        n2a=ones(d_model), n2b=zeros(d_model),
        n3a=ones(d_model), n3b=zeros(d_model),
        cl1w=w((d_model, 2 * d_model)), cl1b=w((1, 2 * d_model)),
        convw=conv_kc,
        cl2w=w((d_model, d_model)), cl2b=w((1, d_model)),
        qw=w((d_model, d_model)), qb=w((1, d_model)),
        kw=w((d_model, d_model)), kb=w((1, d_model)),
        vw=w((d_model, d_model)), vb=w((1, d_model)),
        ow=w((d_model, d_model)), ob=w((1, d_model)),
        f1w=w((d_model, d_ff)), f1b=w((1, d_ff)),
        f2w=w((d_ff, d_model)), f2b=w((1, d_model)),
    )


# ----------------------------------------------------------------------------- pure-JAX reference
def reference_forward(x, e, src_mask, trg_mask, P):
    B, T, D = x.shape
    S = e.shape[1]
    dk = D // HEADS

    def norm(v, a, b):
        mu = v.mean(-1, keepdims=True)
        c = v - mu
        std = jnp.sqrt((c * c).sum(-1, keepdims=True) / (D - 1))
        return a[0] * c / (std + EPS) + b[0]

    def lin(v, w, bvec):
        return v @ w + bvec[0]

    # conv sublayer
    res = x
    h = norm(x, P['n1a'], P['n1b'])
    h = lin(h, P['cl1w'], P['cl1b'])
    h = h[..., :D] * jax.nn.sigmoid(h[..., D:])
    cm = trg_mask[:, -1, :][..., None]
    h = jnp.where(cm == 0, 0.0, h)
    w_kc = jax.nn.softmax(P['convw'], axis=0)
    hp = jnp.pad(h, ((0, 0), (1, 1), (0, 0)))
    h = sum(w_kc[k][None, None, :] * hp[:, k:k + T, :] for k in range(KERNEL_SIZE))
    x1 = res + lin(h, P['cl2w'], P['cl2b'])

    # attention sublayer
    res = x1
    h = norm(x1, P['n2a'], P['n2b'])
    q = lin(h, P['qw'], P['qb']).reshape(B, T, HEADS, dk).transpose(0, 2, 1, 3)
    k = lin(e, P['kw'], P['kb']).reshape(B, S, HEADS, dk).transpose(0, 2, 1, 3)
    v = lin(e, P['vw'], P['vb']).reshape(B, S, HEADS, dk).transpose(0, 2, 1, 3)
    sc = jnp.einsum('bhtd,bhsd->bhts', q, k) * (1.0 / jnp.sqrt(jnp.float32(dk)))
    sc = jnp.where(src_mask[:, None, :, :] == 0, NEG_INF, sc)
    at = jax.nn.softmax(sc, axis=-1)
    o = jnp.einsum('bhts,bhsd->bhtd', at, v).transpose(0, 2, 1, 3).reshape(B, T, D)
    x2 = res + lin(o, P['ow'], P['ob'])

    # feed-forward sublayer
    res = x2
    h = norm(x2, P['n3a'], P['n3b'])
    h = jnp.maximum(lin(h, P['f1w'], P['f1b']), 0.0)
    return res + lin(h, P['f2w'], P['f2b'])


# ----------------------------------------------------------------------------- main
if __name__ == "__main__":
    B, T, S = 16, 8, 8          # B=16 -> batch tile bt=8, grid=(2,) "parallel" steps
    key = jax.random.PRNGKey(0)
    kx, ke, kp = jax.random.split(key, 3)

    x = jax.random.normal(kx, (B, T, D_MODEL), jnp.float32)
    e_outputs = jax.random.normal(ke, (B, S, D_MODEL), jnp.float32)

    # causal target mask with variable padding per batch row
    lengths = jnp.maximum(T - (jnp.arange(B) % 3), 1)
    causal = jnp.tril(jnp.ones((T, T), jnp.float32))
    pad = (jnp.arange(T)[None, :] < lengths[:, None]).astype(jnp.float32)    # (B, T)
    trg_mask = causal[None] * pad[:, None, :]                                # (B, T, T)
    src_mask = jnp.ones((B, 1, S), jnp.float32).at[1::2, :, S - 1].set(0.0)  # (B, 1, S)

    params = init_params(kp)

    out = decoder_layer(x, e_outputs, src_mask, trg_mask, params)
    out = jax.block_until_ready(out)

    ref = reference_forward(x, e_outputs, src_mask, trg_mask, params)
    assert out.shape == (B, T, D_MODEL)
    err = float(jnp.max(jnp.abs(out - ref)))
    assert jnp.allclose(out, ref, rtol=5e-3, atol=5e-3), f"max abs err = {err}"
    print("KERNEL_OK")
</pallas_src>

<mosaic_0001>
module attributes {stable_mosaic.version = 11 : i64} {
  func.func @kernel(%arg0: i32, %arg1: memref<8x8x32xf32, #tpu.memory_space<vmem>>, %arg2: memref<8x8x32xf32, #tpu.memory_space<vmem>>, %arg3: memref<8x1x8xf32, #tpu.memory_space<vmem>>, %arg4: memref<8x8x1xf32, #tpu.memory_space<vmem>>, %arg5: memref<368x128xf32, #tpu.memory_space<vmem>>, %arg6: memref<8x8x32xf32, #tpu.memory_space<vmem>>) attributes {dimension_semantics = [#tpu.dimension_semantics<parallel>], iteration_bounds = array<i64: 2>, scalar_prefetch = 0 : i64, scratch_operands = 0 : i64, tpu.core_type = #tpu.core_type<tc>, window_params = [{transform_indices = @transform_0, window_bounds = array<i64: 8, 8, 32>}, {transform_indices = @transform_1, window_bounds = array<i64: 8, 8, 32>}, {transform_indices = @transform_2, window_bounds = array<i64: 8, 1, 8>}, {transform_indices = @transform_3, window_bounds = array<i64: 8, 8, 1>}, {pipeline_mode = #tpu.pipeline_mode<synchronous>, transform_indices = @transform_4, window_bounds = array<i64: 368, 128>}, {transform_indices = @transform_5, window_bounds = array<i64: 8, 8, 32>}]} {
    %c0 = arith.constant 0 : index
    %c0_0 = arith.constant 0 : index
    %c0_1 = arith.constant 0 : index
    %0 = vector.load %arg1[%c0, %c0_0, %c0_1] : memref<8x8x32xf32, #tpu.memory_space<vmem>>, vector<8x8x32xf32>
    %c0_2 = arith.constant 0 : index
    %c0_3 = arith.constant 0 : index
    %c0_4 = arith.constant 0 : index
    %1 = vector.load %arg2[%c0_2, %c0_3, %c0_4] : memref<8x8x32xf32, #tpu.memory_space<vmem>>, vector<8x8x32xf32>
    %2 = vector.shape_cast %0 : vector<8x8x32xf32> to vector<64x32xf32>
    %3 = vector.shape_cast %1 : vector<8x8x32xf32> to vector<64x32xf32>
    %c0_5 = arith.constant 0 : index
    %c0_6 = arith.constant 0 : index
    %c0_7 = arith.constant 0 : index
    %4 = vector.load %arg3[%c0_5, %c0_6, %c0_7] : memref<8x1x8xf32, #tpu.memory_space<vmem>>, vector<8x1x8xf32>
    %cst = arith.constant 0.000000e+00 : f32
    %5 = vector.broadcast %cst : f32 to vector<8x1x8xf32>
    %6 = arith.cmpf oeq, %4, %5 : vector<8x1x8xf32>
    %cst_8 = arith.constant -1.000000e+09 : f32
    %cst_9 = arith.constant 0.000000e+00 : f32
    %7 = vector.broadcast %cst_8 : f32 to vector<8x1x8xf32>
    %8 = vector.broadcast %cst_9 : f32 to vector<8x1x8xf32>
    %9 = arith.select %6, %7, %8 : vector<8x1x8xi1>, vector<8x1x8xf32>
    %c0_10 = arith.constant 0 : index
    %c0_11 = arith.constant 0 : index
    %c0_12 = arith.constant 0 : index
    %10 = vector.load %arg4[%c0_10, %c0_11, %c0_12] : memref<8x8x1xf32, #tpu.memory_space<vmem>>, vector<8x8x1xf32>
    %c0_13 = arith.constant 0 : index
    %c0_14 = arith.constant 0 : index
    %11 = vector.load %arg5[%c0_13, %c0_14] : memref<368x128xf32, #tpu.memory_space<vmem>>, vector<1x32xf32>
    %c8 = arith.constant 8 : index
    %c0_15 = arith.constant 0 : index
    %12 = vector.load %arg5[%c8, %c0_15] : memref<368x128xf32, #tpu.memory_space<vmem>>, vector<1x32xf32>
    %cst_16 = arith.constant dense<0.000000e+00> : vector<64xf32>
    %13 = vector.multi_reduction <add>, %2, %cst_16 [1] : vector<64x32xf32> to vector<64xf32>
    %14 = vector.shape_cast %13 : vector<64xf32> to vector<64x1xf32>
    %cst_17 = arith.constant 3.200000e+01 : f32
    %15 = vector.broadcast %cst_17 : f32 to vector<64x1xf32>
    %16 = arith.divf %14, %15 : vector<64x1xf32>
    %17 = vector.broadcast %16 : vector<64x1xf32> to vector<64x32xf32>
    %18 = arith.subf %2, %17 : vector<64x32xf32>
    %19 = arith.mulf %18, %18 : vector<64x32xf32>
    %cst_18 = arith.constant dense<0.000000e+00> : vector<64xf32>
    %20 = vector.multi_reduction <add>, %19, %cst_18 [1] : vector<64x32xf32> to vector<64xf32>
    %21 = vector.shape_cast %20 : vector<64xf32> to vector<64x1xf32>
    %cst_19 = arith.constant 0.0322580636 : f32
    %22 = vector.broadcast %cst_19 : f32 to vector<64x1xf32>
    %23 = arith.mulf %21, %22 : vector<64x1xf32>
    %24 = math.sqrt %23 : vector<64x1xf32>
    %25 = vector.broadcast %11 : vector<1x32xf32> to vector<64x32xf32>
    %26 = arith.mulf %25, %18 : vector<64x32xf32>
    %cst_20 = arith.constant 9.99999997E-7 : f32
    %27 = vector.broadcast %cst_20 : f32 to vector<64x1xf32>
    %28 = arith.addf %24, %27 : vector<64x1xf32>
    %29 = tpu.reciprocal %28 {approx = true} : vector<64x1xf32> -> vector<64x1xf32>
    %30 = vector.broadcast %29 : vector<64x1xf32> to vector<64x32xf32>
    %31 = arith.mulf %26, %30 : vector<64x32xf32>
    %32 = vector.broadcast %12 : vector<1x32xf32> to vector<64x32xf32>
    %33 = arith.addf %31, %32 : vector<64x32xf32>
    %c48 = arith.constant 48 : index
    %c0_21 = arith.constant 0 : index
    %34 = vector.load %arg5[%c48, %c0_21] : memref<368x128xf32, #tpu.memory_space<vmem>>, vector<32x64xf32>
    %cst_22 = arith.constant dense<0.000000e+00> : vector<64x64xf32>
    %35 = tpu.matmul %33, %34, %cst_22 {dimension_numbers = #tpu.dot_dimension_numbers<[1], [0], [0], [1], [0, 0, 1, 1], [], []>} : vector<64x32xf32>, vector<32x64xf32>, vector<64x64xf32> -> vector<64x64xf32>
    %c80 = arith.constant 80 : index
    %c0_23 = arith.constant 0 : index
    %36 = vector.load %arg5[%c80, %c0_23] : memref<368x128xf32, #tpu.memory_space<vmem>>, vector<1x64xf32>
    %37 = vector.broadcast %36 : vector<1x64xf32> to vector<64x64xf32>
    %38 = arith.addf %35, %37 : vector<64x64xf32>
    %39 = vector.extract_strided_slice %38 {offsets = [0, 0], sizes = [64, 32], strides = [1, 1]} : vector<64x64xf32> to vector<64x32xf32>
    %40 = vector.extract_strided_slice %38 {offsets = [0, 32], sizes = [64, 32], strides = [1, 1]} : vector<64x64xf32> to vector<64x32xf32>
    %41 = arith.negf %40 : vector<64x32xf32>
    %42 = math.exp %41 : vector<64x32xf32>
    %cst_24 = arith.constant 1.000000e+00 : f32
    %43 = vector.broadcast %cst_24 : f32 to vector<64x32xf32>
    %44 = arith.addf %43, %42 : vector<64x32xf32>
    %45 = arith.divf %43, %44 : vector<64x32xf32>
    %46 = arith.mulf %39, %45 : vector<64x32xf32>
    %47 = vector.shape_cast %46 : vector<64x32xf32> to vector<8x8x32xf32>
    %cst_25 = arith.constant 0.000000e+00 : f32
    %48 = vector.broadcast %cst_25 : f32 to vector<8x8x1xf32>
    %49 = arith.cmpf oeq, %10, %48 : vector<8x8x1xf32>
    %cst_26 = arith.constant 0.000000e+00 : f32
    %50 = vector.shape_cast %49 : vector<8x8x1xi1> to vector<8x8x1xi1>
    %51 = vector.broadcast %50 : vector<8x8x1xi1> to vector<8x8x32xi1>
    %52 = vector.broadcast %cst_26 : f32 to vector<8x8x32xf32>
    %53 = arith.select %51, %52, %47 : vector<8x8x32xi1>, vector<8x8x32xf32>
    %c88 = arith.constant 88 : index
    %c0_27 = arith.constant 0 : index
    %54 = vector.load %arg5[%c88, %c0_27] : memref<368x128xf32, #tpu.memory_space<vmem>>, vector<3x32xf32>
    %cst_28 = arith.constant 0.000000e+00 : f32
    %55 = vector.broadcast %cst_28 : f32 to vector<8x1x32xf32>
    %56 = vector.extract_strided_slice %53 {offsets = [0, 0, 0], sizes = [8, 7, 32], strides = [1, 1, 1]} : vector<8x8x32xf32> to vector<8x7x32xf32>
    %57 = tpu.concatenate %55, %56 in 1 : vector<8x1x32xf32>, vector<8x7x32xf32> -> vector<8x8x32xf32>
    %58 = vector.extract_strided_slice %53 {offsets = [0, 1, 0], sizes = [8, 7, 32], strides = [1, 1, 1]} : vector<8x8x32xf32> to vector<8x7x32xf32>
    %59 = tpu.concatenate %58, %55 in 1 : vector<8x7x32xf32>, vector<8x1x32xf32> -> vector<8x8x32xf32>
    %60 = vector.extract_strided_slice %54 {offsets = [0, 0], sizes = [1, 32], strides = [1, 1]} : vector<3x32xf32> to vector<1x32xf32>
    %61 = vector.shape_cast %60 : vector<1x32xf32> to vector<1x1x32xf32>
    %62 = vector.broadcast %61 : vector<1x1x32xf32> to vector<8x8x32xf32>
    %63 = arith.mulf %62, %57 : vector<8x8x32xf32>
    %64 = vector.extract_strided_slice %54 {offsets = [1, 0], sizes = [1, 32], strides = [1, 1]} : vector<3x32xf32> to vector<1x32xf32>
    %65 = vector.shape_cast %64 : vector<1x32xf32> to vector<1x1x32xf32>
    %66 = vector.broadcast %65 : vector<1x1x32xf32> to vector<8x8x32xf32>
    %67 = arith.mulf %66, %53 : vector<8x8x32xf32>
    %68 = arith.addf %63, %67 : vector<8x8x32xf32>
    %69 = vector.extract_strided_slice %54 {offsets = [2, 0], sizes = [1, 32], strides = [1, 1]} : vector<3x32xf32> to vector<1x32xf32>
    %70 = vector.shape_cast %69 : vector<1x32xf32> to vector<1x1x32xf32>
    %71 = vector.broadcast %70 : vector<1x1x32xf32> to vector<8x8x32xf32>
    %72 = arith.mulf %71, %59 : vector<8x8x32xf32>
    %73 = arith.addf %68, %72 : vector<8x8x32xf32>
    %74 = vector.shape_cast %73 : vector<8x8x32xf32> to vector<64x32xf32>
    %c96 = arith.constant 96 : index
    %c0_29 = arith.constant 0 : index
    %75 = vector.load %arg5[%c96, %c0_29] : memref<368x128xf32, #tpu.memory_space<vmem>>, vector<32x32xf32>
    %cst_30 = arith.constant dense<0.000000e+00> : vector<64x32xf32>
    %76 = tpu.matmul %74, %75, %cst_30 {dimension_numbers = #tpu.dot_dimension_numbers<[1], [0], [0], [1], [0, 0, 1, 1], [], []>} : vector<64x32xf32>, vector<32x32xf32>, vector<64x32xf32> -> vector<64x32xf32>
    %c128 = arith.constant 128 : index
    %c0_31 = arith.constant 0 : index
    %77 = vector.load %arg5[%c128, %c0_31] : memref<368x128xf32, #tpu.memory_space<vmem>>, vector<1x32xf32>
    %78 = vector.broadcast %77 : vector<1x32xf32> to vector<64x32xf32>
    %79 = arith.addf %76, %78 : vector<64x32xf32>
    %80 = arith.addf %2, %79 : vector<64x32xf32>
    %c16 = arith.constant 16 : index
    %c0_32 = arith.constant 0 : index
    %81 = vector.load %arg5[%c16, %c0_32] : memref<368x128xf32, #tpu.memory_space<vmem>>, vector<1x32xf32>
    %c24 = arith.constant 24 : index
    %c0_33 = arith.constant 0 : index
    %82 = vector.load %arg5[%c24, %c0_33] : memref<368x128xf32, #tpu.memory_space<vmem>>, vector<1x32xf32>
    %cst_34 = arith.constant dense<0.000000e+00> : vector<64xf32>
    %83 = vector.multi_reduction <add>, %80, %cst_34 [1] : vector<64x32xf32> to vector<64xf32>
    %84 = vector.shape_cast %83 : vector<64xf32> to vector<64x1xf32>
    %cst_35 = arith.constant 3.200000e+01 : f32
    %85 = vector.broadcast %cst_35 : f32 to vector<64x1xf32>
    %86 = arith.divf %84, %85 : vector<64x1xf32>
    %87 = vector.broadcast %86 : vector<64x1xf32> to vector<64x32xf32>
    %88 = arith.subf %80, %87 : vector<64x32xf32>
    %89 = arith.mulf %88, %88 : vector<64x32xf32>
    %cst_36 = arith.constant dense<0.000000e+00> : vector<64xf32>
    %90 = vector.multi_reduction <add>, %89, %cst_36 [1] : vector<64x32xf32> to vector<64xf32>
    %91 = vector.shape_cast %90 : vector<64xf32> to vector<64x1xf32>
    %cst_37 = arith.constant 0.0322580636 : f32
    %92 = vector.broadcast %cst_37 : f32 to vector<64x1xf32>
    %93 = arith.mulf %91, %92 : vector<64x1xf32>
    %94 = math.sqrt %93 : vector<64x1xf32>
    %95 = vector.broadcast %81 : vector<1x32xf32> to vector<64x32xf32>
    %96 = arith.mulf %95, %88 : vector<64x32xf32>
    %cst_38 = arith.constant 9.99999997E-7 : f32
    %97 = vector.broadcast %cst_38 : f32 to vector<64x1xf32>
    %98 = arith.addf %94, %97 : vector<64x1xf32>
    %99 = tpu.reciprocal %98 {approx = true} : vector<64x1xf32> -> vector<64x1xf32>
    %100 = vector.broadcast %99 : vector<64x1xf32> to vector<64x32xf32>
    %101 = arith.mulf %96, %100 : vector<64x32xf32>
    %102 = vector.broadcast %82 : vector<1x32xf32> to vector<64x32xf32>
    %103 = arith.addf %101, %102 : vector<64x32xf32>
    %c136 = arith.constant 136 : index
    %c0_39 = arith.constant 0 : index
    %104 = vector.load %arg5[%c136, %c0_39] : memref<368x128xf32, #tpu.memory_space<vmem>>, vector<32x32xf32>
    %cst_40 = arith.constant dense<0.000000e+00> : vector<64x32xf32>
    %105 = tpu.matmul %103, %104, %cst_40 {dimension_numbers = #tpu.dot_dimension_numbers<[1], [0], [0], [1], [0, 0, 1, 1], [], []>} : vector<64x32xf32>, vector<32x32xf32>, vector<64x32xf32> -> vector<64x32xf32>
    %c168 = arith.constant 168 : index
    %c0_41 = arith.constant 0 : index
    %106 = vector.load %arg5[%c168, %c0_41] : memref<368x128xf32, #tpu.memory_space<vmem>>, vector<1x32xf32>
    %107 = vector.broadcast %106 : vector<1x32xf32> to vector<64x32xf32>
    %108 = arith.addf %105, %107 : vector<64x32xf32>
    %109 = vector.shape_cast %108 : vector<64x32xf32> to vector<8x8x32xf32>
    %c176 = arith.constant 176 : index
    %c0_42 = arith.constant 0 : index
    %110 = vector.load %arg5[%c176, %c0_42] : memref<368x128xf32, #tpu.memory_space<vmem>>, vector<32x64xf32>
    %cst_43 = arith.constant dense<0.000000e+00> : vector<64x64xf32>
    %111 = tpu.matmul %3, %110, %cst_43 {dimension_numbers = #tpu.dot_dimension_numbers<[1], [0], [0], [1], [0, 0, 1, 1], [], []>} : vector<64x32xf32>, vector<32x64xf32>, vector<64x64xf32> -> vector<64x64xf32>
    %c208 = arith.constant 208 : index
    %c0_44 = arith.constant 0 : index
    %112 = vector.load %arg5[%c208, %c0_44] : memref<368x128xf32, #tpu.memory_space<vmem>>, vector<1x64xf32>
    %113 = vector.broadcast %112 : vector<1x64xf32> to vector<64x64xf32>
    %114 = arith.addf %111, %113 : vector<64x64xf32>
    %115 = vector.extract_strided_slice %114 {offsets = [0, 0], sizes = [64, 32], strides = [1, 1]} : vector<64x64xf32> to vector<64x32xf32>
    %116 = vector.shape_cast %115 : vector<64x32xf32> to vector<8x8x32xf32>
    %117 = vector.extract_strided_slice %114 {offsets = [0, 32], sizes = [64, 32], strides = [1, 1]} : vector<64x64xf32> to vector<64x32xf32>
    %118 = vector.shape_cast %117 : vector<64x32xf32> to vector<8x8x32xf32>
    %119 = vector.extract_strided_slice %109 {offsets = [0, 0, 0], sizes = [8, 8, 8], strides = [1, 1, 1]} : vector<8x8x32xf32> to vector<8x8x8xf32>
    %120 = vector.extract_strided_slice %116 {offsets = [0, 0, 0], sizes = [8, 8, 8], strides = [1, 1, 1]} : vector<8x8x32xf32> to vector<8x8x8xf32>
    "tpu.trace_start"() <{level = 10 : i32, message = "btd,bsd->bts"}> : () -> ()
    %cst_45 = arith.constant dense<0.000000e+00> : vector<8x8x8xf32>
    %121 = tpu.matmul %119, %120, %cst_45 {dimension_numbers = #tpu.dot_dimension_numbers<[2], [2], [1], [1], [0, 0, 0, 1, 1, 1], [0], [0]>} : vector<8x8x8xf32>, vector<8x8x8xf32>, vector<8x8x8xf32> -> vector<8x8x8xf32>
    "tpu.trace_stop"() : () -> ()
    %122 = vector.broadcast %9 : vector<8x1x8xf32> to vector<8x8x8xf32>
    %123 = arith.addf %121, %122 : vector<8x8x8xf32>
    %cst_46 = arith.constant dense<0xFF800000> : vector<8x8xf32>
    %124 = vector.multi_reduction <maximumf>, %123, %cst_46 [2] : vector<8x8x8xf32> to vector<8x8xf32>
    %125 = vector.shape_cast %124 : vector<8x8xf32> to vector<8x8x1xf32>
    %126 = vector.broadcast %125 : vector<8x8x1xf32> to vector<8x8x8xf32>
    %127 = arith.subf %123, %126 : vector<8x8x8xf32>
    %128 = math.exp %127 : vector<8x8x8xf32>
    %cst_47 = arith.constant dense<0.000000e+00> : vector<8x8xf32>
    %129 = vector.multi_reduction <add>, %128, %cst_47 [2] : vector<8x8x8xf32> to vector<8x8xf32>
    %130 = vector.shape_cast %129 : vector<8x8xf32> to vector<8x8x1xf32>
    %131 = tpu.reciprocal %130 {approx = true} : vector<8x8x1xf32> -> vector<8x8x1xf32>
    %132 = vector.broadcast %131 : vector<8x8x1xf32> to vector<8x8x8xf32>
    %133 = arith.mulf %128, %132 : vector<8x8x8xf32>
    %134 = vector.extract_strided_slice %118 {offsets = [0, 0, 0], sizes = [8, 8, 8], strides = [1, 1, 1]} : vector<8x8x32xf32> to vector<8x8x8xf32>
    "tpu.trace_start"() <{level = 10 : i32, message = "bts,bsd->btd"}> : () -> ()
    %cst_48 = arith.constant dense<0.000000e+00> : vector<8x8x8xf32>
    %135 = tpu.matmul %133, %134, %cst_48 {dimension_numbers = #tpu.dot_dimension_numbers<[2], [1], [1], [2], [0, 0, 0, 1, 1, 2], [0], [0]>} : vector<8x8x8xf32>, vector<8x8x8xf32>, vector<8x8x8xf32> -> vector<8x8x8xf32>
    "tpu.trace_stop"() : () -> ()
    %136 = vector.extract_strided_slice %109 {offsets = [0, 0, 8], sizes = [8, 8, 8], strides = [1, 1, 1]} : vector<8x8x32xf32> to vector<8x8x8xf32>
    %137 = vector.extract_strided_slice %116 {offsets = [0, 0, 8], sizes = [8, 8, 8], strides = [1, 1, 1]} : vector<8x8x32xf32> to vector<8x8x8xf32>
    "tpu.trace_start"() <{level = 10 : i32, message = "btd,bsd->bts"}> : () -> ()
    %cst_49 = arith.constant dense<0.000000e+00> : vector<8x8x8xf32>
    %138 = tpu.matmul %136, %137, %cst_49 {dimension_numbers = #tpu.dot_dimension_numbers<[2], [2], [1], [1], [0, 0, 0, 1, 1, 1], [0], [0]>} : vector<8x8x8xf32>, vector<8x8x8xf32>, vector<8x8x8xf32> -> vector<8x8x8xf32>
    "tpu.trace_stop"() : () -> ()
    %139 = vector.broadcast %9 : vector<8x1x8xf32> to vector<8x8x8xf32>
    %140 = arith.addf %138, %139 : vector<8x8x8xf32>
    %cst_50 = arith.constant dense<0xFF800000> : vector<8x8xf32>
    %141 = vector.multi_reduction <maximumf>, %140, %cst_50 [2] : vector<8x8x8xf32> to vector<8x8xf32>
    %142 = vector.shape_cast %141 : vector<8x8xf32> to vector<8x8x1xf32>
    %143 = vector.broadcast %142 : vector<8x8x1xf32> to vector<8x8x8xf32>
    %144 = arith.subf %140, %143 : vector<8x8x8xf32>
    %145 = math.exp %144 : vector<8x8x8xf32>
    %cst_51 = arith.constant dense<0.000000e+00> : vector<8x8xf32>
    %146 = vector.multi_reduction <add>, %145, %cst_51 [2] : vector<8x8x8xf32> to vector<8x8xf32>
    %147 = vector.shape_cast %146 : vector<8x8xf32> to vector<8x8x1xf32>
    %148 = tpu.reciprocal %147 {approx = true} : vector<8x8x1xf32> -> vector<8x8x1xf32>
    %149 = vector.broadcast %148 : vector<8x8x1xf32> to vector<8x8x8xf32>
    %150 = arith.mulf %145, %149 : vector<8x8x8xf32>
    %151 = vector.extract_strided_slice %118 {offsets = [0, 0, 8], sizes = [8, 8, 8], strides = [1, 1, 1]} : vector<8x8x32xf32> to vector<8x8x8xf32>
    "tpu.trace_start"() <{level = 10 : i32, message = "bts,bsd->btd"}> : () -> ()
    %cst_52 = arith.constant dense<0.000000e+00> : vector<8x8x8xf32>
    %152 = tpu.matmul %150, %151, %cst_52 {dimension_numbers = #tpu.dot_dimension_numbers<[2], [1], [1], [2], [0, 0, 0, 1, 1, 2], [0], [0]>} : vector<8x8x8xf32>, vector<8x8x8xf32>, vector<8x8x8xf32> -> vector<8x8x8xf32>
    "tpu.trace_stop"() : () -> ()
    %153 = vector.extract_strided_slice %109 {offsets = [0, 0, 16], sizes = [8, 8, 8], strides = [1, 1, 1]} : vector<8x8x32xf32> to vector<8x8x8xf32>
    %154 = vector.extract_strided_slice %116 {offsets = [0, 0, 16], sizes = [8, 8, 8], strides = [1, 1, 1]} : vector<8x8x32xf32> to vector<8x8x8xf32>
    "tpu.trace_start"() <{level = 10 : i32, message = "btd,bsd->bts"}> : () -> ()
    %cst_53 = arith.constant dense<0.000000e+00> : vector<8x8x8xf32>
    %155 = tpu.matmul %153, %154, %cst_53 {dimension_numbers = #tpu.dot_dimension_numbers<[2], [2], [1], [1], [0, 0, 0, 1, 1, 1], [0], [0]>} : vector<8x8x8xf32>, vector<8x8x8xf32>, vector<8x8x8xf32> -> vector<8x8x8xf32>
    "tpu.trace_stop"() : () -> ()
    %156 = vector.broadcast %9 : vector<8x1x8xf32> to vector<8x8x8xf32>
    %157 = arith.addf %155, %156 : vector<8x8x8xf32>
    %cst_54 = arith.constant dense<0xFF800000> : vector<8x8xf32>
    %158 = vector.multi_reduction <maximumf>, %157, %cst_54 [2] : vector<8x8x8xf32> to vector<8x8xf32>
    %159 = vector.shape_cast %158 : vector<8x8xf32> to vector<8x8x1xf32>
    %160 = vector.broadcast %159 : vector<8x8x1xf32> to vector<8x8x8xf32>
    %161 = arith.subf %157, %160 : vector<8x8x8xf32>
    %162 = math.exp %161 : vector<8x8x8xf32>
    %cst_55 = arith.constant dense<0.000000e+00> : vector<8x8xf32>
    %163 = vector.multi_reduction <add>, %162, %cst_55 [2] : vector<8x8x8xf32> to vector<8x8xf32>
    %164 = vector.shape_cast %163 : vector<8x8xf32> to vector<8x8x1xf32>
    %165 = tpu.reciprocal %164 {approx = true} : vector<8x8x1xf32> -> vector<8x8x1xf32>
    %166 = vector.broadcast %165 : vector<8x8x1xf32> to vector<8x8x8xf32>
    %167 = arith.mulf %162, %166 : vector<8x8x8xf32>
    %168 = vector.extract_strided_slice %118 {offsets = [0, 0, 16], sizes = [8, 8, 8], strides = [1, 1, 1]} : vector<8x8x32xf32> to vector<8x8x8xf32>
    "tpu.trace_start"() <{level = 10 : i32, message = "bts,bsd->btd"}> : () -> ()
    %cst_56 = arith.constant dense<0.000000e+00> : vector<8x8x8xf32>
    %169 = tpu.matmul %167, %168, %cst_56 {dimension_numbers = #tpu.dot_dimension_numbers<[2], [1], [1], [2], [0, 0, 0, 1, 1, 2], [0], [0]>} : vector<8x8x8xf32>, vector<8x8x8xf32>, vector<8x8x8xf32> -> vector<8x8x8xf32>
    "tpu.trace_stop"() : () -> ()
    %170 = vector.extract_strided_slice %109 {offsets = [0, 0, 24], sizes = [8, 8, 8], strides = [1, 1, 1]} : vector<8x8x32xf32> to vector<8x8x8xf32>
    %171 = vector.extract_strided_slice %116 {offsets = [0, 0, 24], sizes = [8, 8, 8], strides = [1, 1, 1]} : vector<8x8x32xf32> to vector<8x8x8xf32>
    "tpu.trace_start"() <{level = 10 : i32, message = "btd,bsd->bts"}> : () -> ()
    %cst_57 = arith.constant dense<0.000000e+00> : vector<8x8x8xf32>
    %172 = tpu.matmul %170, %171, %cst_57 {dimension_numbers = #tpu.dot_dimension_numbers<[2], [2], [1], [1], [0, 0, 0, 1, 1, 1], [0], [0]>} : vector<8x8x8xf32>, vector<8x8x8xf32>, vector<8x8x8xf32> -> vector<8x8x8xf32>
    "tpu.trace_stop"() : () -> ()
    %173 = vector.broadcast %9 : vector<8x1x8xf32> to vector<8x8x8xf32>
    %174 = arith.addf %172, %173 : vector<8x8x8xf32>
    %cst_58 = arith.constant dense<0xFF800000> : vector<8x8xf32>
    %175 = vector.multi_reduction <maximumf>, %174, %cst_58 [2] : vector<8x8x8xf32> to vector<8x8xf32>
    %176 = vector.shape_cast %175 : vector<8x8xf32> to vector<8x8x1xf32>
    %177 = vector.broadcast %176 : vector<8x8x1xf32> to vector<8x8x8xf32>
    %178 = arith.subf %174, %177 : vector<8x8x8xf32>
    %179 = math.exp %178 : vector<8x8x8xf32>
    %cst_59 = arith.constant dense<0.000000e+00> : vector<8x8xf32>
    %180 = vector.multi_reduction <add>, %179, %cst_59 [2] : vector<8x8x8xf32> to vector<8x8xf32>
    %181 = vector.shape_cast %180 : vector<8x8xf32> to vector<8x8x1xf32>
    %182 = tpu.reciprocal %181 {approx = true} : vector<8x8x1xf32> -> vector<8x8x1xf32>
    %183 = vector.broadcast %182 : vector<8x8x1xf32> to vector<8x8x8xf32>
    %184 = arith.mulf %179, %183 : vector<8x8x8xf32>
    %185 = vector.extract_strided_slice %118 {offsets = [0, 0, 24], sizes = [8, 8, 8], strides = [1, 1, 1]} : vector<8x8x32xf32> to vector<8x8x8xf32>
    "tpu.trace_start"() <{level = 10 : i32, message = "bts,bsd->btd"}> : () -> ()
    %cst_60 = arith.constant dense<0.000000e+00> : vector<8x8x8xf32>
    %186 = tpu.matmul %184, %185, %cst_60 {dimension_numbers = #tpu.dot_dimension_numbers<[2], [1], [1], [2], [0, 0, 0, 1, 1, 2], [0], [0]>} : vector<8x8x8xf32>, vector<8x8x8xf32>, vector<8x8x8xf32> -> vector<8x8x8xf32>
    "tpu.trace_stop"() : () -> ()
    %187 = tpu.concatenate %135, %152, %169, %186 in 2 : vector<8x8x8xf32>, vector<8x8x8xf32>, vector<8x8x8xf32>, vector<8x8x8xf32> -> vector<8x8x32xf32>
    %188 = vector.shape_cast %187 : vector<8x8x32xf32> to vector<64x32xf32>
    %c216 = arith.constant 216 : index
    %c0_61 = arith.constant 0 : index
    %189 = vector.load %arg5[%c216, %c0_61] : memref<368x128xf32, #tpu.memory_space<vmem>>, vector<32x32xf32>
    %cst_62 = arith.constant dense<0.000000e+00> : vector<64x32xf32>
    %190 = tpu.matmul %188, %189, %cst_62 {dimension_numbers = #tpu.dot_dimension_numbers<[1], [0], [0], [1], [0, 0, 1, 1], [], []>} : vector<64x32xf32>, vector<32x32xf32>, vector<64x32xf32> -> vector<64x32xf32>
    %c248 = arith.constant 248 : index
    %c0_63 = arith.constant 0 : index
    %191 = vector.load %arg5[%c248, %c0_63] : memref<368x128xf32, #tpu.memory_space<vmem>>, vector<1x32xf32>
    %192 = vector.broadcast %191 : vector<1x32xf32> to vector<64x32xf32>
    %193 = arith.addf %190, %192 : vector<64x32xf32>
    %194 = arith.addf %80, %193 : vector<64x32xf32>
    %c32 = arith.constant 32 : index
    %c0_64 = arith.constant 0 : index
    %195 = vector.load %arg5[%c32, %c0_64] : memref<368x128xf32, #tpu.memory_space<vmem>>, vector<1x32xf32>
    %c40 = arith.constant 40 : index
    %c0_65 = arith.constant 0 : index
    %196 = vector.load %arg5[%c40, %c0_65] : memref<368x128xf32, #tpu.memory_space<vmem>>, vector<1x32xf32>
    %cst_66 = arith.constant dense<0.000000e+00> : vector<64xf32>
    %197 = vector.multi_reduction <add>, %194, %cst_66 [1] : vector<64x32xf32> to vector<64xf32>
    %198 = vector.shape_cast %197 : vector<64xf32> to vector<64x1xf32>
    %cst_67 = arith.constant 3.200000e+01 : f32
    %199 = vector.broadcast %cst_67 : f32 to vector<64x1xf32>
    %200 = arith.divf %198, %199 : vector<64x1xf32>
    %201 = vector.broadcast %200 : vector<64x1xf32> to vector<64x32xf32>
    %202 = arith.subf %194, %201 : vector<64x32xf32>
    %203 = arith.mulf %202, %202 : vector<64x32xf32>
    %cst_68 = arith.constant dense<0.000000e+00> : vector<64xf32>
    %204 = vector.multi_reduction <add>, %203, %cst_68 [1] : vector<64x32xf32> to vector<64xf32>
    %205 = vector.shape_cast %204 : vector<64xf32> to vector<64x1xf32>
    %cst_69 = arith.constant 0.0322580636 : f32
    %206 = vector.broadcast %cst_69 : f32 to vector<64x1xf32>
    %207 = arith.mulf %205, %206 : vector<64x1xf32>
    %208 = math.sqrt %207 : vector<64x1xf32>
    %209 = vector.broadcast %195 : vector<1x32xf32> to vector<64x32xf32>
    %210 = arith.mulf %209, %202 : vector<64x32xf32>
    %cst_70 = arith.constant 9.99999997E-7 : f32
    %211 = vector.broadcast %cst_70 : f32 to vector<64x1xf32>
    %212 = arith.addf %208, %211 : vector<64x1xf32>
    %213 = tpu.reciprocal %212 {approx = true} : vector<64x1xf32> -> vector<64x1xf32>
    %214 = vector.broadcast %213 : vector<64x1xf32> to vector<64x32xf32>
    %215 = arith.mulf %210, %214 : vector<64x32xf32>
    %216 = vector.broadcast %196 : vector<1x32xf32> to vector<64x32xf32>
    %217 = arith.addf %215, %216 : vector<64x32xf32>
    %c256 = arith.constant 256 : index
    %c0_71 = arith.constant 0 : index
    %218 = vector.load %arg5[%c256, %c0_71] : memref<368x128xf32, #tpu.memory_space<vmem>>, vector<32x64xf32>
    %cst_72 = arith.constant dense<0.000000e+00> : vector<64x64xf32>
    %219 = tpu.matmul %217, %218, %cst_72 {dimension_numbers = #tpu.dot_dimension_numbers<[1], [0], [0], [1], [0, 0, 1, 1], [], []>} : vector<64x32xf32>, vector<32x64xf32>, vector<64x64xf32> -> vector<64x64xf32>
    %c288 = arith.constant 288 : index
    %c0_73 = arith.constant 0 : index
    %220 = vector.load %arg5[%c288, %c0_73] : memref<368x128xf32, #tpu.memory_space<vmem>>, vector<1x64xf32>
    %221 = vector.broadcast %220 : vector<1x64xf32> to vector<64x64xf32>
    %222 = arith.addf %219, %221 : vector<64x64xf32>
    %cst_74 = arith.constant 0.000000e+00 : f32
    %223 = vector.broadcast %cst_74 : f32 to vector<64x64xf32>
    %224 = arith.maximumf %222, %223 : vector<64x64xf32>
    %c296 = arith.constant 296 : index
    %c0_75 = arith.constant 0 : index
    %225 = vector.load %arg5[%c296, %c0_75] : memref<368x128xf32, #tpu.memory_space<vmem>>, vector<64x32xf32>
    %cst_76 = arith.constant dense<0.000000e+00> : vector<64x32xf32>
    %226 = tpu.matmul %224, %225, %cst_76 {dimension_numbers = #tpu.dot_dimension_numbers<[1], [0], [0], [1], [0, 0, 1, 1], [], []>} : vector<64x64xf32>, vector<64x32xf32>, vector<64x32xf32> -> vector<64x32xf32>
    %c360 = arith.constant 360 : index
    %c0_77 = arith.constant 0 : index
    %227 = vector.load %arg5[%c360, %c0_77] : memref<368x128xf32, #tpu.memory_space<vmem>>, vector<1x32xf32>
    %228 = vector.broadcast %227 : vector<1x32xf32> to vector<64x32xf32>
    %229 = arith.addf %226, %228 : vector<64x32xf32>
    %230 = arith.addf %194, %229 : vector<64x32xf32>
    %231 = vector.shape_cast %230 : vector<64x32xf32> to vector<8x8x32xf32>
    %c0_78 = arith.constant 0 : index
    %c0_79 = arith.constant 0 : index
    %c0_80 = arith.constant 0 : index
    %232 = vector.load %arg6[%c0_78, %c0_79, %c0_80] : memref<8x8x32xf32, #tpu.memory_space<vmem>>, vector<8x8x32xf32>
    tpu.vector_store %arg6[%c0_78, %c0_79, %c0_80], %231 {strides = array<i32>} : memref<8x8x32xf32, #tpu.memory_space<vmem>>, vector<8x8x32xf32>,
    return
  }
  func.func @transform_0(%arg0: i32) -> (i32, i32, i32) {
    %c0_i32 = arith.constant 0 : i32
    %c0_i32_0 = arith.constant 0 : i32
    %c0_i32_1 = arith.constant 0 : i32
    return %arg0, %c0_i32, %c0_i32_0 : i32, i32, i32
  }
  func.func @transform_1(%arg0: i32) -> (i32, i32, i32) {
    %c0_i32 = arith.constant 0 : i32
    %c0_i32_0 = arith.constant 0 : i32
    %c0_i32_1 = arith.constant 0 : i32
    return %arg0, %c0_i32, %c0_i32_0 : i32, i32, i32
  }
  func.func @transform_2(%arg0: i32) -> (i32, i32, i32) {
    %c0_i32 = arith.constant 0 : i32
    %c0_i32_0 = arith.constant 0 : i32
    %c0_i32_1 = arith.constant 0 : i32
    return %arg0, %c0_i32, %c0_i32_0 : i32, i32, i32
  }
  func.func @transform_3(%arg0: i32) -> (i32, i32, i32) {
    %c0_i32 = arith.constant 0 : i32
    %c0_i32_0 = arith.constant 0 : i32
    %c0_i32_1 = arith.constant 0 : i32
    return %arg0, %c0_i32, %c0_i32_0 : i32, i32, i32
  }
  func.func @transform_4(%arg0: i32) -> (i32, i32) {
    %c0_i32 = arith.constant 0 : i32
    %c0_i32_0 = arith.constant 0 : i32
    %c0_i32_1 = arith.constant 0 : i32
    return %c0_i32, %c0_i32_0 : i32, i32
  }
  func.func @transform_5(%arg0: i32) -> (i32, i32, i32) {
    %c0_i32 = arith.constant 0 : i32
    %c0_i32_0 = arith.constant 0 : i32
    %c0_i32_1 = arith.constant 0 : i32
    return %arg0, %c0_i32, %c0_i32_0 : i32, i32, i32
  }
}

</mosaic_0001>

<bundles_post_ra>
// kernel: tpu_custom_call.1
= control target key start
LH: loop header
LB: loop body
LE: loop exit
PB: predicated region body
PF: predicated region fallthrough
CT: control target
= control target key end

     0   :  { %10 = vsyncpa [#allocation3], 0  ;;  %s10851_s0 = inlined_call_operand.vmem [shape: f32[16,8,32], index: 0, kind: input, shape index: {}]   ;;  %s10852_s1 = inlined_call_operand.hbm [shape: f32[16,8,32], index: 1, kind: input, shape index: {}]   ;;  %s10853_s2 = inlined_call_operand.vmem [shape: f32[16,1,8], index: 2, kind: input, shape index: {}]   ;;  %s10854_s3 = inlined_call_operand.vmem [shape: f32[16,8,1], index: 3, kind: input, shape index: {}]   ;;  %s10855_s4 = inlined_call_operand.hbm [shape: f32[368,128], index: 4, kind: input, shape index: {}]   ;;  %s10856_s5 = inlined_call_operand.hbm [shape: f32[16,8,32], index: 5, kind: output, shape index: {}]  }
   0x1   :  { %12 = vsyncpa [#allocation3 + $0x1], 0 }
   0x2   :  { %13 = vsyncpa [#allocation6], 0 }
   0x3   :  { %14 = vsyncpa [#allocation4], 0 }
   0x4   :  { %16 = vsyncpa [#allocation4 + $0x1], 0  ;;  %s9154_s18 = smov 0   ;;  %s9156_s19 = smov 0  }
   0x5   :  { %s9158_s20 = smov 0   ;;  %s9160_s21 = smov 0  }
   0x6 LB: > { %s9175_s22 = sadd.s32 4294967295, %s9103_s21   ;;  %s7762_s23 = sadd.s32 4294967294, %s9103_s21   ;;  %s9103_s21 = sphi %s9160_s21, %s10909_s21   ;;  %s9099_s20 = sphi %s9158_s20, %s10908_s20   ;;  %s9095_s19 = sphi %s9156_s19, %s10907_s19   ;;  %s9091_s18 = sphi %s9154_s18, %s10906_s18  }
   0x7   : > { %p68_p0 = scmp.ne.s32.totalorder %s9095_s19, %s9091_s18  ;;  %p10857_p1 = scmp.eq.s32.totalorder %s9175_s22, 0 }
   0x8   : > { %p171_p3 = scmp.eq.s32.totalorder %s7762_s23, 1  ;;  %p7763_p5 = scmp.ge.s32.totalorder %s9103_s21, 1 }
   0x9   : > { %p9184_p4 = por %p10857_p1, %p68_p0  ;;  %p178_p7 = scmp.lt.s32.totalorder %s9103_s21, 3 }
   0xa   : > { %p9189_p6 = por %p171_p3, %p68_p0  ;;  %s9105_s27 = smov [#allocation5]  }
   0xb   : > { %s10872_s24 = scalar_select %p9184_p4, 1, 0 }
   0xc   : > { %s10873_s25 = scalar_select %p9189_p6, 1, 0 }
   0xd   : > { %p9194_p8 = pnand %p7763_p5, %p178_p7  ;;  %s190_s28 = sshll.u32 %s9105_s27, 4  ;;  %s191_s28 = int_to_ptr.vmem [resolvable:$true] %s190_s28 }
   0xe   : > { %s9208_s30 = sadd.s32 1, %s9103_s21   ;;  %s55_s6 = sadd.s32 1, %s9099_s20 }
   0xf   : > { %s10874_s26 = scalar_select %p9194_p8, 1, 0 }
  0x10   : > { %p8658_p9 = pneg %p9194_p8  ;;  %s52_s7 = ssub.s32 %s9103_s21, %s9208_s30 }
  0x11   : > { %s8992_s8 = scalar_lea.vmem %s191_s28, 5888  ;;  %p9000_p5 = scmp.lt.s32.totalorder %s191_s28, %s191_s28 }
  0x12   : > { %p9203_p11 = pnand %p8658_p9, %p10857_p1  ;;  %p8993_p13 = scmp.ne.s32.totalorder %s191_s28, %s8992_s8 }
  0x13   : > { %p9001_p7 = scmp.lt.s32.totalorder %s8992_s8, %s8992_s8 }
  0x14   : > { %p8983_p12 = pneg %p9203_p11 }
  0x15   : > { %p9002_p10 = por %p9001_p7, %p9000_p5 }
  0x16   : > { %p8995_p0 = pnand %p8993_p13, %p8983_p12 }
  0x18   : > { %p8996_p3 = pneg %p8995_p0 }
  0x1a   : > { %p9003_p2 = pnand %p9002_p10, %p8996_p3 }
  0x1c   : > { %9006 = shalt.err (!%p9003_p2)
}
  0x1d   : > { %s10858_s9 = smov 128   ;;  %s9107_s10 = smov 8  }
  0x1e   : > { %8661 = dma.hbm_to_vmem [thread:$0]  (!%p9203_p11), %s10855_s4, 5888, %s191_s28, [#allocation6], %s10858_s9, %s10858_s9, %s9107_s10  }
  0x1f   : > { %p53_p2 = scmp.eq.s32.totalorder %s52_s7, 0  ;;  %p62_p9 = scmp.ne.s32.totalorder %s9099_s20, %s9095_s19 }
  0x20   : > { %p63_p10 = scmp.eq.s32.totalorder %s9103_s21, 0  ;;  %p8671_p12 = scmp.lt.s32.totalorder %s9103_s21, 2 }
  0x21   : > { %s9228_s13 = scalar_select %p53_p2, %s9099_s20, %s55_s6  }
  0x22   : > { %p64_p13 = por %p63_p10, %p62_p9  ;;  %p10876_p0 = scmp.eq.s32.totalorder %s9175_s22, 1 }
  0x23   : > { %s213_s15 = sand.u32 1, %s9099_s20   ;;  %s7956_s16 = sshll.u32 %s9103_s21, 10 }
  0x24   : > { %p9232_p3 = por %p10876_p0, %p62_p9  ;;  %s7766_s17 = sshll.u32 %s213_s15, 6 }
  0x25   : > { %s9241_s29 = scalar_lea.hbm %s10852_s1, %s7956_s16  ;;  %s217_s28 = scalar_lea.vmem [#allocation2], %s7766_s17 }
  0x26   : > { %s10877_s14 = scalar_select %p9232_p3, 1, 0 }
  0x27   : > { %s224_s6 = sshll.u32 %s217_s28, 4  ;;  %p9243_p11 = pnand %p8671_p12, %p64_p13  ;;  %s9247_s6 = int_to_ptr.vmem [resolvable:$true] %s224_s6 }
  0x28   : > { %s9249_s8 = scalar_lea.sflag [#allocation3], %s213_s15  ;;  %s9007_s11 = scalar_lea.hbm %s9241_s29, 1024 }
  0x29   : > { %p9008_p5 = scmp.ne.s32.totalorder %s9241_s29, %s9007_s11  ;;  %p9009_p7 = pneg %p9243_p11 }
  0x2a   : > { %s9012_s17 = scalar_lea.hbm %s10852_s1, 2048  ;;  %p9013_p10 = scmp.lt.s32.totalorder %s9241_s29, %s10852_s1 }
  0x2b   : > { %p9010_p2 = pnand %p9009_p7, %p9008_p5  ;;  %p9014_p12 = scmp.lt.s32.totalorder %s9012_s17, %s9007_s11 }
  0x2d   : > { %p9011_p9 = pneg %p9010_p2  ;;  %p9015_p13 = por %p9014_p12, %p9013_p10 }
  0x2f   : > { %p9016_p0 = pnand %p9015_p13, %p9011_p9 }
  0x31   : > { %9019 = shalt.err (!%p9016_p0)
}
  0x32   : > { %s9020_s15 = scalar_lea.vmem %s9247_s6, 1024  ;;  %s9108_s28 = smov [#allocation2]  }
  0x33   : > { %p9021_p1 = scmp.ne.s32.totalorder %s9247_s6, %s9020_s15  ;;  %s9025_s9 = sshll.u32 %s9108_s28, 4  ;;  %s9026_s9 = int_to_ptr.vmem [resolvable:$false] %s9025_s9 }
  0x34   : > { %s9027_s12 = scalar_lea.vmem %s9026_s9, 2048  ;;  %p9028_p2 = scmp.lt.s32.totalorder %s9247_s6, %s9026_s9 }
  0x35   : > { %p9023_p6 = pnand %p9021_p1, %p9009_p7  ;;  %p9029_p3 = scmp.lt.s32.totalorder %s9027_s12, %s9020_s15 }
  0x37   : > { %p9024_p5 = pneg %p9023_p6  ;;  %p9030_p4 = por %p9029_p3, %p9028_p2 }
  0x39   : > { %p9031_p8 = pnand %p9030_p4, %p9024_p5 }
  0x3b   : > { %9034 = shalt.err (!%p9031_p8)
}
  0x3c   : > { %s10879_s11 = smov 128   ;;  %p10880_p1 = scmp.ne.s32.totalorder %s10874_s26, 0 }
  0x3d   : > { %8665 = dma.hbm_to_vmem [thread:$0]  (!%p9243_p11), %s9241_s29, 1024, %s9247_s6, %s9249_s8, %s10879_s11, %s10879_s11, %s9107_s10  }
  0x3e   : > { %253 = sbr.rel (%p10880_p1) target bundleno = 4841 (0x12e9), region = 40 }
  0x43   : > { %s9276_s16 = sand.u32 1, %s9095_s19   ;;  %p10881_p4 = scmp.ne.s32.totalorder %s10872_s24, 0 }
  0x44   : > { %s7770_s9 = sshll.u32 %s9276_s16, 6  ;;  %s256_s17 = scalar_lea.sflag [#allocation3], %s9276_s16 }
  0x45   : > { %s9282_s7 = scalar_lea.vmem [#allocation2], %s7770_s9 }
  0x46   : > { %9078 = dma.done.wait (%p10881_p4), %s256_s17, 1024  }
  0x47   : > { %9080 = vsyncadd (%p10881_p4), %s256_s17, 4294966272  ;;  %p10882_p6 = scmp.eq.s32.totalorder %s9175_s22, 0 }
  0x49   : > { %9082 = dma.done.wait (%p10882_p6), [#allocation6], 5888   ;;  %p10883_p8 = pmov %p10882_p6 }
  0x4a   : > { %s7773_s26 = sshll.u32 %s9175_s22, 3  ;;  %vm373_vm0 = vcmask 261120   ;;  %v562_v56 = vld [vmem:[#allocation5 + $0x48] sm:$0xff]  ;;  %v561_v57 = vld [vmem:[#allocation5 + $0x40] sm:$0xff]  ;;  %v560_v58 = vld [vmem:[#allocation5 + $0x38] sm:$0xff]  ;;  %v9109_v60 = vmov 0  }
  0x4b   : > { %9084 = vsyncadd (%p10883_p8), [#allocation6], 4294961408  ;;  %p305_p3 = scmp.lt.s32.totalorder %s7773_s26, 15  ;;  %8174 = vmatprep.subr.mxu0 %v562_v56  ;;  %8642 = vmatprep.subr.mxu1 %v562_v56  ;;  %v559_v59 = vld [vmem:[#allocation5 + $0x30] sm:$0xff]  ;;  %s9110_s15 = smov 96  }
  0x4c   : > { %8175 = vmatpush3.msra.mxu0 %v562_v56  ;;  %8646 = vmatpush3.msra.mxu1 %v562_v56  ;;  %s9113_s17 = smov 120   ;;  %s9117_s29 = smov 104  }
  0x4d   : > { %s10911_s26 = smov (!%p305_p3, %s7773_s26), 15  ;;  %8176 = vmatprep.subr.mxu0 %v561_v57  ;;  %8643 = vmatprep.subr.mxu1 %v561_v57  ;;  %s9118_s6 = smov 72  }
  0x4e   : > { %s7774_s10 = sshll.u32 %s10911_s26, 3  ;;  %8177 = vmatpush3.msra.mxu0 %v561_v57  ;;  %8647 = vmatpush3.msra.mxu1 %v561_v57  ;;  %s9794_s11 = scalar_lea.vmem %s10853_s2, %s10911_s26 }
  0x4f   : > { %s308_s24 = scalar_lea.vmem %s10851_s0, %s7774_s10  ;;  %8178 = vmatprep.subr.mxu0 %v560_v58  ;;  %8644 = vmatprep.subr.mxu1 %v560_v58  ;;  %s9386_s27 = scalar_lea.vmem %s10854_s3, %s7774_s10 }
  0x50   : > { %v9301_v0 = vld [vmem:[%s308_s24] sm:$0xff]  ;;  %v9303_v1 = vld [vmem:[%s308_s24 + $0x10] sm:$0xff]  ;;  %v9305_v2 = vld [vmem:[%s308_s24 + $0x8] sm:$0xff]  ;;  %8179 = vmatpush3.msra.mxu0 %v560_v58  ;;  %8648 = vmatpush3.msra.mxu1 %v560_v58  ;;  %s9115_s26 = smov 112   ;;  %s9116_s10 = smov 80  }
  0x51   : > { %v374_v3 = vsel %vm373_vm0, %v9301_v0, 0.0  ;;  %v380_v4 = vsel %vm373_vm0, %v9303_v1, 0.0  ;;  %v9311_v5 = vld [vmem:[%s308_s24 + $0x18] sm:$0xff]  ;;  %v377_v6 = vsel %vm373_vm0, %v9305_v2, 0.0  ;;  %v9317_v8 = vld [vmem:[%s308_s24 + $0x20] sm:$0xff]  ;;  %v9319_v9 = vld [vmem:[%s308_s24 + $0x28] sm:$0xff]  ;;  %8180 = vmatprep.subr.mxu0 %v559_v59  ;;  %8645 = vmatprep.subr.mxu1 %v559_v59 }
  0x52   : > { %375 = vadd.xlane.f32.xlu0 %v374_v3  ;;  %381 = vadd.xlane.f32.xlu1 %v380_v4  ;;  %v383_v7 = vsel %vm373_vm0, %v9311_v5, 0.0  ;;  %v386_v10 = vsel %vm373_vm0, %v9317_v8, 0.0  ;;  %v389_v11 = vsel %vm373_vm0, %v9319_v9, 0.0  ;;  %v9325_v12 = vld [vmem:[%s308_s24 + $0x30] sm:$0xff]  ;;  %v9327_v13 = vld [vmem:[%s308_s24 + $0x38] sm:$0xff]  ;;  %v364_v61 = vld [vmem:[%s9386_s27 + $0x8] sm:$0xff] }
  0x53   : > { %v392_v14 = vsel %vm373_vm0, %v9325_v12, 0.0  ;;  %v395_v15 = vsel %vm373_vm0, %v9327_v13, 0.0  ;;  %8181 = vmatpush3.msra.mxu0 %v559_v59  ;;  %8649 = vmatpush3.msra.mxu1 %v559_v59  ;;  %vm786_vm1 = vcmp.eq.f32.partialorder %v364_v61, 0.0  ;;  %s9119_s24 = smov 8   ;;  %s9120_s8 = smov 16  }
  0x54   : > { %8724 = vset.pattern.permute.xlu1 %v9109_v60  ;;  %8723 = vset.pattern.permute.xlu0 %v9109_v60  ;;  %v794_v62 = vsel %vm786_vm1, 1, %v9109_v60  ;;  %s9121_s23 = smov 24   ;;  %p10903_p7 = scmp.ne.s32.totalorder %s10877_s14, 0 }
  0x56   : > { %378 = vadd.xlane.f32.xlu0 %v377_v6  ;;  %384 = vadd.xlane.f32.xlu1 %v383_v7 }
  0x5a   : > { %387 = vadd.xlane.f32.xlu0 %v386_v10  ;;  %390 = vadd.xlane.f32.xlu1 %v389_v11 }
  0x5e   : > { %393 = vadd.xlane.f32.xlu0 %v392_v14  ;;  %396 = vadd.xlane.f32.xlu1 %v395_v15 }
  0xdb   : > { %v376_v16 = vpop.xlane.xlu0 %375  ;;  %v382_v17 = vpop.xlane.xlu1 %381 }
  0xdc   : > { %v399_v18 = vmul.f32 0.03125, %v376_v16  ;;  %v401_v19 = vmul.f32 0.03125, %v382_v17 }
  0xde   : > { %v9334_v20 = vsub.f32 %v9301_v0, %v399_v18  ;;  %v9337_v21 = vsub.f32 %v9303_v1, %v401_v19 }
  0xdf   : > { %v379_v22 = vpop.xlane.xlu0 %378  ;;  %v385_v23 = vpop.xlane.xlu1 %384 }
  0xe0   : > { %v400_v24 = vmul.f32 0.03125, %v379_v22  ;;  %v402_v25 = vmul.f32 0.03125, %v385_v23  ;;  %v415_v26 = vmul.f32 %v9334_v20, %v9334_v20  ;;  %v417_v27 = vmul.f32 %v9337_v21, %v9337_v21 }
  0xe2   : > { %v9344_v28 = vsub.f32 %v9305_v2, %v400_v24  ;;  %v9347_v29 = vsub.f32 %v9311_v5, %v402_v25  ;;  %v423_v30 = vsel %vm373_vm0, %v415_v26, 0.0  ;;  %v429_v35 = vsel %vm373_vm0, %v417_v27, 0.0 }
  0xe3   : > { %424 = vadd.xlane.f32.xlu0 %v423_v30  ;;  %v388_v31 = vpop.xlane.xlu0 %387  ;;  %v391_v32 = vpop.xlane.xlu1 %390 }
  0xe4   : > { %v403_v33 = vmul.f32 0.03125, %v388_v31  ;;  %v404_v34 = vmul.f32 0.03125, %v391_v32  ;;  %v416_v36 = vmul.f32 %v9344_v28, %v9344_v28  ;;  %v418_v37 = vmul.f32 %v9347_v29, %v9347_v29 }
  0xe6   : > { %v9356_v38 = vsub.f32 %v9317_v8, %v403_v33  ;;  %v9359_v39 = vsub.f32 %v9319_v9, %v404_v34  ;;  %v426_v40 = vsel %vm373_vm0, %v416_v36, 0.0  ;;  %v432_v46 = vsel %vm373_vm0, %v418_v37, 0.0 }
  0xe7   : > { %430 = vadd.xlane.f32.xlu0 %v429_v35  ;;  %v394_v41 = vpop.xlane.xlu0 %393  ;;  %v397_v42 = vpop.xlane.xlu1 %396  ;;  %427 = vadd.xlane.f32.xlu1 %v426_v40 }
  0xe8   : > { %v405_v43 = vmul.f32 0.03125, %v394_v41  ;;  %v406_v44 = vmul.f32 0.03125, %v397_v42  ;;  %v419_v45 = vmul.f32 %v9356_v38, %v9356_v38  ;;  %v420_v47 = vmul.f32 %v9359_v39, %v9359_v39 }
  0xea   : > { %v9368_v48 = vsub.f32 %v9325_v12, %v405_v43  ;;  %v9371_v49 = vsub.f32 %v9327_v13, %v406_v44  ;;  %v435_v50 = vsel %vm373_vm0, %v419_v45, 0.0  ;;  %v438_v52 = vsel %vm373_vm0, %v420_v47, 0.0 }
  0xeb   : > { %436 = vadd.xlane.f32.xlu0 %v435_v50  ;;  %433 = vadd.xlane.f32.xlu1 %v432_v46 }
  0xec   : > { %v421_v51 = vmul.f32 %v9368_v48, %v9368_v48  ;;  %v422_v53 = vmul.f32 %v9371_v49, %v9371_v49 }
  0xee   : > { %v441_v54 = vsel %vm373_vm0, %v421_v51, 0.0  ;;  %v444_v55 = vsel %vm373_vm0, %v422_v53, 0.0 }
  0xef   : > { %442 = vadd.xlane.f32.xlu0 %v441_v54  ;;  %439 = vadd.xlane.f32.xlu1 %v438_v52 }
  0xf3   : > { %445 = vadd.xlane.f32.xlu1 %v444_v55 }
 0x104   : > { %805 = vperm.xlu1 %8724, %v794_v62  }
 0x16c   : > { %v425_v63 = vpop.xlane.xlu0 %424 }
 0x16d   : > { %v447_v3 = vmul.f32 0.032258064, %v425_v63 }
 0x16f   : > { %8725 = vrsqrt.f32 %v447_v3  ;;  %vm457_vm2 = vcmp.eq.f32.partialorder %v447_v3, inf  ;;  %v460_v30 = vand.u32 2147483648, %v447_v3  ;;  %vm459_vm3 = vcmp.eq.f32.partialorder %v447_v3, 0.0 }
 0x170   : > { %v431_v4 = vpop.xlane.xlu0 %430  ;;  %v428_v6 = vpop.xlane.xlu1 %427 }
 0x171   : > { %v449_v7 = vmul.f32 0.032258064, %v431_v4  ;;  %v448_v10 = vmul.f32 0.032258064, %v428_v6 }
 0x173   : > { %8727 = vrsqrt.f32 %v449_v7  ;;  %vm471_vm4 = vcmp.eq.f32.partialorder %v449_v7, inf  ;;  %vm473_vm5 = vcmp.eq.f32.partialorder %v449_v7, 0.0  ;;  %vm464_vm6 = vcmp.eq.f32.partialorder %v448_v10, inf }
 0x174   : > { %8729 = vrsqrt.f32 %v448_v10  ;;  %v437_v11 = vpop.xlane.xlu0 %436  ;;  %v434_v14 = vpop.xlane.xlu1 %433  ;;  %v474_v36 = vand.u32 2147483648, %v449_v7  ;;  %vm466_vm7 = vcmp.eq.f32.partialorder %v448_v10, 0.0  ;;  %v467_v40 = vand.u32 2147483648, %v448_v10 }
 0x175   : > { %v451_v15 = vmul.f32 0.032258064, %v437_v11  ;;  %v450_v16 = vmul.f32 0.032258064, %v434_v14 }
 0x177   : > { %8731 = vrsqrt.f32 %v451_v15  ;;  %vm485_vm8 = vcmp.eq.f32.partialorder %v451_v15, inf  ;;  %vm487_vm9 = vcmp.eq.f32.partialorder %v451_v15, 0.0  ;;  %v488_v51 = vand.u32 2147483648, %v451_v15 }
 0x178   : > { %8733 = vrsqrt.f32 %v450_v16  ;;  %v443_v17 = vpop.xlane.xlu0 %442  ;;  %v440_v18 = vpop.xlane.xlu1 %439  ;;  %vm478_vm10 = vcmp.eq.f32.partialorder %v450_v16, inf  ;;  %vm480_vm11 = vcmp.eq.f32.partialorder %v450_v16, 0.0  ;;  %v481_v54 = vand.u32 2147483648, %v450_v16 }
 0x179   : > { %v9392_v19 = vmul.f32 0.032258064, %v443_v17  ;;  %v9394_v22 = vmul.f32 0.032258064, %v440_v18 }
 0x17b   : > { %8735 = vrsqrt.f32 %v9392_v19  ;;  %vm499_vm12 = vcmp.eq.f32.partialorder %v9392_v19, inf  ;;  %v502_v58 = vand.u32 2147483648, %v9392_v19  ;;  %vm501_vm13 = vcmp.eq.f32.partialorder %v9392_v19, 0.0 }
 0x17c   : > { %v8726_v23 = vpop.eup %8725  ;;  %8737 = vrsqrt.f32 %v9394_v22  ;;  %v446_v25 = vpop.xlane.xlu1 %445  ;;  %vm492_vm14 = vcmp.eq.f32.partialorder %v9394_v22, inf  ;;  %vm494_vm15 = vcmp.eq.f32.partialorder %v9394_v22, 0.0 }
 0x17d   : > { %v456_v24 = vmul.f32 %v8726_v23, %v447_v3  ;;  %v9398_v26 = vmul.f32 0.032258064, %v446_v25 }
 0x17f   : > { %v458_v27 = vsel %vm457_vm2, %v447_v3, %v456_v24  ;;  %8739 = vrsqrt.f32 %v9398_v26  ;;  %vm506_vm1 = vcmp.eq.f32.partialorder %v9398_v26, inf  ;;  %v509_v25 = vand.u32 2147483648, %v9398_v26 }
 0x180   : > { %v8728_v31 = vpop.eup %8727  ;;  %v461_v34 = vsel %vm459_vm3, %v460_v30, %v458_v27  ;;  %vm508_vm2 = vcmp.eq.f32.partialorder %v9398_v26, 0.0 }
 0x181   : > { %v8730_v32 = vpop.eup %8729  ;;  %v470_v33 = vmul.f32 %v8728_v31, %v449_v7  ;;  %v523_v37 = vadd.f32 1e-06, %v461_v34  ;;  %v7779_v31 = vld [vmem:[#allocation5 + $0x8] ss:$0 sm:$0xff] }
 0x182   : > { %v463_v35 = vmul.f32 %v8730_v32, %v448_v10 }
 0x183   : > { %v472_v41 = vsel %vm471_vm4, %v449_v7, %v470_v33  ;;  %8741 = vrcp.f32 %v523_v37  ;;  %v495_v7 = vand.u32 2147483648, %v9394_v22 }
 0x184   : > { %v8732_v42 = vpop.eup %8731  ;;  %v465_v43 = vsel %vm464_vm6, %v448_v10, %v463_v35  ;;  %v475_v44 = vsel %vm473_vm5, %v474_v36, %v472_v41 }
 0x185   : > { %v8734_v45 = vpop.eup %8733  ;;  %v468_v46 = vsel %vm466_vm7, %v467_v40, %v465_v43  ;;  %v525_v47 = vadd.f32 1e-06, %v475_v44  ;;  %v484_v50 = vmul.f32 %v8732_v42, %v451_v15 }
 0x186   : > { %v524_v52 = vadd.f32 1e-06, %v468_v46  ;;  %v477_v53 = vmul.f32 %v8734_v45, %v450_v16 }
 0x187   : > { %8743 = vrcp.f32 %v525_v47  ;;  %v486_v55 = vsel %vm485_vm8, %v451_v15, %v484_v50 }
 0x188   : > { %v8736_v56 = vpop.eup %8735  ;;  %8745 = vrcp.f32 %v524_v52  ;;  %v479_v57 = vsel %vm478_vm10, %v450_v16, %v477_v53  ;;  %v489_v59 = vsel %vm487_vm9, %v488_v51, %v486_v55  ;;  %v7778_v16 = vld [vmem:[#allocation5] ss:$0 sm:$0xff] }
 0x189   : > { %v8738_v61 = vpop.eup %8737  ;;  %v482_v62 = vsel %vm480_vm11, %v481_v54, %v479_v57  ;;  %v498_v63 = vmul.f32 %v8736_v56, %v9392_v19  ;;  %v527_v3 = vadd.f32 1e-06, %v489_v59  ;;  %v517_v34 = vmul.f32 %v7778_v16, %v9337_v21  ;;  %v365_v59 = vld [vmem:[%s9386_s27 + $0x10] sm:$0xff] }
 0x18a   : > { %v526_v4 = vadd.f32 1e-06, %v482_v62  ;;  %v491_v6 = vmul.f32 %v8738_v61, %v9394_v22  ;;  %v516_v36 = vmul.f32 %v7778_v16, %v9344_v28  ;;  %v518_v44 = vmul.f32 %v7778_v16, %v9347_v29  ;;  %v366_v62 = vld [vmem:[%s9386_s27 + $0x18] sm:$0xff] }
 0x18b   : > { %v500_v10 = vsel %vm499_vm12, %v9392_v19, %v498_v63  ;;  %8747 = vrcp.f32 %v527_v3  ;;  %v521_v28 = vmul.f32 %v7778_v16, %v9368_v48  ;;  %v520_v52 = vmul.f32 %v7778_v16, %v9359_v39  ;;  %v367_v63 = vld [vmem:[%s9386_s27 + $0x20] sm:$0xff] }
 0x18c   : > { %8749 = vrcp.f32 %v526_v4  ;;  %v493_v11 = vsel %vm492_vm14, %v9394_v22, %v491_v6  ;;  %v503_v14 = vsel %vm501_vm13, %v502_v58, %v500_v10  ;;  %v8740_v15 = vpop.eup %8739  ;;  %v515_v22 = vmul.f32 %v7778_v16, %v9334_v20  ;;  %v363_v4 = vld [vmem:[%s9386_s27] sm:$0xff] }
 0x18d   : > { %v496_v17 = vsel %vm494_vm15, %v495_v7, %v493_v11  ;;  %v529_v18 = vadd.f32 1e-06, %v503_v14  ;;  %v505_v24 = vmul.f32 %v8740_v15, %v9398_v26  ;;  %v519_v20 = vmul.f32 %v7778_v16, %v9356_v38  ;;  %v368_v7 = vld [vmem:[%s9386_s27 + $0x28] sm:$0xff]  ;;  %v369_v11 = vld [vmem:[%s9386_s27 + $0x30] sm:$0xff]  ;;  %v370_v15 = vld [vmem:[%s9386_s27 + $0x38] sm:$0xff]  ;;  %s10775_s27 = scalar_lea.vmem [#allocation7], %s7770_s9 }
 0x18e   : > { %v528_v23 = vadd.f32 1e-06, %v496_v17  ;;  %v522_v56 = vmul.f32 %v7778_v16, %v9371_v49  ;;  %vm787_vm3 = vcmp.eq.f32.partialorder %v365_v59, 0.0  ;;  %vm788_vm4 = vcmp.eq.f32.partialorder %v366_v62, 0.0  ;;  %v7780_v17 = vld [vmem:[#allocation5 + $0x50] ss:$0 sm:$0xff] }
 0x18f   : > { %8751 = vrcp.f32 %v529_v18  ;;  %v507_v19 = vsel %vm506_vm1, %v9398_v26, %v505_v24  ;;  %v795_v61 = vsel %vm787_vm3, 1, %v9109_v60  ;;  %v796_v49 = vsel %vm788_vm4, 1, %v9109_v60  ;;  %v952_v59 = vld [vmem:[#allocation5 + $0x60] sm:$0xff]  ;;  %s7957_s9 = sshll.u32 %s9175_s22, 10  ;;  %s7633_s22 = scalar_lea.sflag [#allocation4], %s9276_s16 }
 0x190   : > { %8753 = vrcp.f32 %v528_v23  ;;  %v8742_v27 = vpop.eup %8741  ;;  %v510_v30 = vsel %vm508_vm2, %v509_v25, %v507_v19  ;;  %808 = vperm.xlu1 %8724, %v795_v61   ;;  %vm789_vm5 = vcmp.eq.f32.partialorder %v367_v63, 0.0  ;;  %vm785_vm6 = vcmp.eq.f32.partialorder %v363_v4, 0.0 }
 0x191   : > { %v530_v32 = vadd.f32 1e-06, %v510_v30  ;;  %v539_v33 = vmul.f32 %v8742_v27, %v515_v22  ;;  %v797_v3 = vsel %vm789_vm5, 1, %v9109_v60  ;;  %v793_v6 = vsel %vm785_vm6, 1, %v9109_v60 }
 0x192   : > { %802 = vperm.xlu0 %8723, %v793_v6   ;;  %vm790_vm7 = vcmp.eq.f32.partialorder %v368_v7, 0.0  ;;  %vm791_vm8 = vcmp.eq.f32.partialorder %v369_v11, 0.0  ;;  %vm792_vm9 = vcmp.eq.f32.partialorder %v370_v15, 0.0  ;;  %vm866_vm11 = vcmask 1040384  }
 0x193   : > { %8755 = vrcp.f32 %v530_v32  ;;  %v551_v37 = vadd.f32 %v7779_v31, %v539_v33  ;;  %v798_v10 = vsel %vm790_vm7, 1, %v9109_v60  ;;  %v799_v14 = vsel %vm791_vm8, 1, %v9109_v60 }
 0x194   : > { %v8744_v35 = vpop.eup %8743  ;;  %811 = vperm.xlu1 %8724, %v796_v49   ;;  %v800_v16 = vsel %vm792_vm9, 1, %v9109_v60  ;;  %vm891_vm13 = vcmask 1046528  }
 0x195   : > { %v8746_v40 = vpop.eup %8745  ;;  %v541_v41 = vmul.f32 %v8744_v35, %v517_v34  ;;  %8182 = vmatprep.mubr.msk.f32.mxu0 %vm373_vm0, %v551_v37 }
 0x196   : > { %v540_v42 = vmul.f32 %v8746_v40, %v516_v36  ;;  %817 = vperm.xlu0 %8723, %v798_v10  }
 0x197   : > { %v553_v26 = vadd.f32 %v7779_v31, %v541_v41 }
 0x198   : > { %v8748_v43 = vpop.eup %8747  ;;  %v552_v45 = vadd.f32 %v7779_v31, %v540_v42  ;;  %814 = vperm.xlu1 %8724, %v797_v3  }
 0x199   : > { %v8750_v46 = vpop.eup %8749  ;;  %v543_v47 = vmul.f32 %v8748_v43, %v519_v20 }
 0x19a   : > { %8183 = vmatmul.mubr.msk.f32.vlgmr.msra.gmra.mxu0 %vm373_vm0, %v552_v45  ;;  %v542_v21 = vmul.f32 %v8750_v46, %v518_v44  ;;  %820 = vperm.xlu0 %8723, %v799_v14   ;;  %v806_v14 = vpop.permute.xlu1 %805 }
 0x19b   : > { %8185 = vmatprep.mubr.msk.f32.mxu0 %vm373_vm0, %v553_v26  ;;  %v555_v50 = vadd.f32 %v7779_v31, %v543_v47  ;;  %vm826_vm10 = vcmp.eq.s32.totalorder %v806_v14, 1 }
 0x19c   : > { %v8752_v51 = vpop.eup %8751  ;;  %v554_v53 = vadd.f32 %v7779_v31, %v542_v21 }
 0x19d   : > { %v8754_v38 = vpop.eup %8753  ;;  %8188 = vmatprep.mubr.msk.f32.mxu1 %vm373_vm0, %v555_v50  ;;  %v545_v29 = vmul.f32 %v8752_v51, %v521_v28 }
 0x19e   : > { %8186 = vmatmul.mubr.msk.f32.gmra.mxu0 %vm373_vm0, %v554_v53  ;;  %v544_v54 = vmul.f32 %v8754_v38, %v520_v52  ;;  %823 = vperm.xlu0 %8723, %v800_v16   ;;  %v955_v38 = vld [vmem:[#allocation5 + $0x78] sm:$0xff] }
 0x19f   : > { %v557_v55 = vadd.f32 %v7779_v31, %v545_v29  ;;  %8194 = vmatprep.subr.mxu1 %v955_v38 }
 0x1a0   : > { %v556_v48 = vadd.f32 %v7779_v31, %v544_v54  ;;  %v8756_v57 = vpop.eup %8755 }
 0x1a1   : > { %v546_v58 = vmul.f32 %v8756_v57, %v522_v56  ;;  %v954_v56 = vld [vmem:[#allocation5 + $0x70] sm:$0xff] }
 0x1a2   : > { %8189 = vmatmul.mubr.msk.f32.vlgmr.msra.gmra.mxu1 %vm373_vm0, %v556_v48 }
 0x1a3   : > { %8191 = vmatprep.mubr.msk.f32.mxu1 %vm373_vm0, %v557_v55  ;;  %v558_v39 = vadd.f32 %v7779_v31, %v546_v58  ;;  %8195 = vmatpush3.msra.mxu1 %v955_v38  ;;  %v953_v58 = vld [vmem:[#allocation5 + $0x68] sm:$0xff] }
 0x1a4   : > { %8196 = vmatprep.subr.mxu1 %v954_v56 }
 0x1a5   : > { %8197 = vmatpush3.msra.mxu1 %v954_v56 }
 0x1a6   : > { %8192 = vmatmul.mubr.msk.f32.gmra.mxu1 %vm373_vm0, %v558_v39  ;;  %8198 = vmatprep.subr.mxu1 %v953_v58 }
 0x1a7   : > { %8199 = vmatpush3.msra.mxu1 %v953_v58 }
 0x1a8   : > { %8200 = vmatprep.subr.mxu1 %v952_v59 }
 0x1a9   : > { %8201 = vmatpush3.msra.mxu1 %v952_v59 }
 0x20b   : > { %v9480_v15 = vpop.permute.xlu1 %808 }
 0x20c   : > { %vm827_vm2 = vcmp.eq.s32.totalorder %v9480_v15, 1 }
 0x20f   : > { %v812_v16 = vpop.permute.xlu1 %811 }
 0x210   : > { %vm828_vm15 = vcmp.eq.s32.totalorder %v812_v16, 1 }
 0x25a   : > { %v8184_v18 = vpop.f32.mrf.mxu0 }
 0x25b   : > { %v9448_v23 = vadd.f32 %v8184_v18, %v7780_v17  ;;  %v900_v18 = vlaneseq }
 0x25c   : > { %v658_v24 = vpop.f32.mrf.mxu0 }
 0x25d   : > { %v7790_v25 = vmul.f32 -1.442695, %v9448_v23  ;;  %v9451_v19 = vadd.f32 %v7780_v17, %v658_v24  ;;  %v815_v24 = vpop.permute.xlu1 %814 }
 0x25e   : > { %v8187_v22 = vpop.f32.mrf.mxu0  ;;  %vm829_vm14 = vcmp.eq.s32.totalorder %v815_v24, 1 }
 0x25f   : > { %8757 = vpow2.f32 %v7790_v25  ;;  %v7789_v27 = vmul.f32 -1.442695, %v9451_v19  ;;  %v9454_v30 = vadd.f32 %v8187_v22, %v7780_v17  ;;  %v901_v22 = vshrl.u32 %v900_v18, 7 }
 0x260   : > { %v668_v31 = vpop.f32.mrf.mxu0 }
 0x261   : > { %8759 = vpow2.f32 %v7789_v27  ;;  %v7792_v60 = vmul.f32 -1.442695, %v9454_v30  ;;  %v9457_v34 = vadd.f32 %v7780_v17, %v668_v31  ;;  %v9484_v27 = vsub.s32 0, %v901_v22 }
 0x262   : > { %v8190_v32 = vpop.f32.mrf.mxu1 }
 0x263   : > { %8761 = vpow2.f32 %v7792_v60  ;;  %v7791_v41 = vmul.f32 -1.442695, %v9457_v34  ;;  %v9465_v42 = vadd.f32 %v8190_v32, %v7780_v17  ;;  %v914_v60 = vsub.s32 1, %v901_v22 }
 0x264   : > { %v678_v33 = vpop.f32.mrf.mxu1 }
 0x265   : > { %v9459_v35 = vadd.f32 %v7780_v17, %v678_v33  ;;  %v7794_v45 = vmul.f32 -1.442695, %v9465_v42 }
 0x266   : > { %v8193_v36 = vpop.f32.mrf.mxu1 }
 0x267   : > { %v7793_v37 = vmul.f32 -1.442695, %v9459_v35  ;;  %v9462_v40 = vadd.f32 %v8193_v36, %v7780_v17  ;;  %v841_v36 = vld [vmem:[#allocation5 + $0x58] sm:$0x7] }
 0x268   : > { %v688_v20 = vpop.f32.mrf.mxu1 }
 0x269   : > { %8763 = vpow2.f32 %v7793_v37  ;;  %v7796_v26 = vmul.f32 -1.442695, %v9462_v40  ;;  %v9469_v46 = vadd.f32 %v7780_v17, %v688_v20  ;;  %v803_v17 = vpop.permute.xlu0 %802 }
 0x26a   : > { %vm825_vm12 = vcmp.eq.s32.totalorder %v803_v17, 1 }
 0x26b   : > { %8765 = vpow2.f32 %v7796_v26  ;;  %v7795_v28 = vmul.f32 -1.442695, %v9469_v46 }
 0x26c   : > { %v8758_v43 = vpop.eup %8757  ;;  %8767 = vpow2.f32 %v7791_v41  ;;  %v9490_v41 = vrot.slane %v841_v36, %v9484_v27 }
 0x26d   : > { %v722_v44 = vadd.f32 1.0, %v8758_v43  ;;  %v9482_v25 = vpop.permute.xlu0 %817 }
 0x26e   : > { %v8760_v47 = vpop.eup %8759  ;;  %vm830_vm3 = vcmp.eq.s32.totalorder %v9482_v25, 1 }
 0x26f   : > { %8769 = vrcp.f32 %v722_v44  ;;  %v721_v21 = vadd.f32 1.0, %v8760_v47  ;;  %v9493_v44 = vrot.slane %v841_v36, %v914_v60 }
 0x270   : > { %8771 = vpow2.f32 %v7794_v45  ;;  %v8762_v50 = vpop.eup %8761  ;;  %v934_v45 = vsub.s32 2, %v901_v22 }
 0x271   : > { %8773 = vrcp.f32 %v721_v21  ;;  %v724_v29 = vadd.f32 1.0, %v8762_v50  ;;  %v9487_v33 = vpop.permute.xlu0 %820 }
 0x272   : > { %8775 = vpow2.f32 %v7795_v28  ;;  %vm831_vm4 = vcmp.eq.s32.totalorder %v9487_v33, 1 }
 0x276   : > { %v8764_v51 = vpop.eup %8763 }
 0x277   : > { %v725_v52 = vadd.f32 1.0, %v8764_v51 }
 0x278   : > { %v8766_v53 = vpop.eup %8765 }
 0x279   : > { %8777 = vrcp.f32 %v725_v52  ;;  %v728_v54 = vadd.f32 1.0, %v8766_v53  ;;  %v8768_v55 = vpop.eup %8767  ;;  %v824_v52 = vpop.permute.xlu0 %823  ;;  %v9497_v53 = vrot.slane %v841_v36, %v934_v45 }
 0x27a   : > { %v723_v57 = vadd.f32 1.0, %v8768_v55  ;;  %vm832_vm1 = vcmp.eq.s32.totalorder %v824_v52, 1 }
 0x27b   : > { %8779 = vrcp.f32 %v728_v54 }
 0x27c   : > { %v8770_v48 = vpop.eup %8769  ;;  %8781 = vrcp.f32 %v724_v29 }
 0x27d   : > { %755 = vrot.lane.b32.xlu1 %v8770_v48, %s9110_s15  ;;  %v8772_v39 = vpop.eup %8771  ;;  %8783 = vrcp.f32 %v723_v57 }
 0x27e   : > { %v8774_v61 = vpop.eup %8773  ;;  %v726_v62 = vadd.f32 1.0, %v8772_v39 }
 0x27f   : > { %v8776_v49 = vpop.eup %8775 }
 0x280   : > { %8785 = vrcp.f32 %v726_v62  ;;  %v727_v63 = vadd.f32 1.0, %v8776_v49 }
 0x281   : > { %753 = vrot.lane.b32.xlu1 %v8774_v61, %s9110_s15 }
 0x282   : > { %8787 = vrcp.f32 %v727_v63 }
 0x286   : > { %v8778_v3 = vpop.eup %8777 }
 0x287   : > { %761 = vrot.lane.b32.xlu1 %v8778_v3, %s9110_s15 }
 0x288   : > { %v8780_v4 = vpop.eup %8779 }
 0x289   : > { %767 = vrot.lane.b32.xlu0 %v8780_v4, %s9110_s15  ;;  %v8782_v6 = vpop.eup %8781 }
 0x28a   : > { %v8784_v7 = vpop.eup %8783 }
 0x28b   : > { %759 = vrot.lane.b32.xlu1 %v8782_v6, %s9110_s15 }
 0x28d   : > { %v8786_v10 = vpop.eup %8785 }
 0x28f   : > { %757 = vrot.lane.b32.xlu1 %v8784_v7, %s9110_s15  ;;  %v8788_v11 = vpop.eup %8787 }
 0x293   : > { %763 = vrot.lane.b32.xlu1 %v8786_v10, %s9110_s15 }
 0x297   : > { %765 = vrot.lane.b32.xlu1 %v8788_v11, %s9110_s15 }
 0x2ef   : > { %v756_v31 = vpop.permute.xlu1 %755 }
 0x2f0   : > { %v778_v32 = vmul.f32 %v756_v31, %v9448_v23 }
 0x2f2   : > { %v834_v37 = vsel %vm826_vm10, 0.0, %v778_v32 }
 0x2f3   : > { %v851_v26 = vrot.slane %v834_v37, 7  ;;  %v754_v20 = vpop.permute.xlu1 %753  ;;  %v876_v47 = vrot.slane %v834_v37, 1  ;;  %v917_v38 = vmul.f32 %v9493_v44, %v834_v37 }
 0x2f4   : > { %v777_v43 = vmul.f32 %v754_v20, %v9451_v19 }
 0x2f5   : > { %v868_v23 = vsel %vm866_vm11, 0.0, %v851_v26  ;;  %v893_v55 = vsel %vm891_vm13, %v876_v47, 0.0 }
 0x2f6   : > { %v833_v21 = vsel %vm825_vm12, 0.0, %v777_v43  ;;  %v905_v28 = vmul.f32 %v9490_v41, %v868_v23  ;;  %v937_v61 = vmul.f32 %v9497_v53, %v893_v55 }
 0x2f7   : > { %v850_v50 = vrot.slane %v833_v21, 7  ;;  %v875_v51 = vrot.slane %v833_v21, 1  ;;  %v916_v48 = vmul.f32 %v9493_v44, %v833_v21 }
 0x2f8   : > { %v925_v58 = vadd.f32 %v917_v38, %v905_v28 }
 0x2f9   : > { %v867_v29 = vsel %vm866_vm11, 0.0, %v850_v50  ;;  %v892_v19 = vsel %vm891_vm13, %v875_v51, 0.0  ;;  %v762_v54 = vpop.permute.xlu1 %761 }
 0x2fa   : > { %v904_v56 = vmul.f32 %v9490_v41, %v867_v29  ;;  %v781_v57 = vmul.f32 %v762_v54, %v9459_v35  ;;  %v936_v59 = vmul.f32 %v9497_v53, %v892_v19  ;;  %v945_v6 = vadd.f32 %v937_v61, %v925_v58 }
 0x2fb   : > { %v768_v49 = vpop.permute.xlu0 %767 }
 0x2fc   : > { %v924_v39 = vadd.f32 %v916_v48, %v904_v56  ;;  %v837_v62 = vsel %vm829_vm14, 0.0, %v781_v57  ;;  %v784_v10 = vmul.f32 %v768_v49, %v9462_v40 }
 0x2fd   : > { %v760_v63 = vpop.permute.xlu1 %759  ;;  %v854_v7 = vrot.slane %v837_v62, 7  ;;  %v879_v17 = vrot.slane %v837_v62, 1  ;;  %v920_v32 = vmul.f32 %v9493_v44, %v837_v62 }
 0x2fe   : > { %v780_v3 = vmul.f32 %v760_v63, %v9454_v30  ;;  %v944_v4 = vadd.f32 %v936_v59, %v924_v39  ;;  %v840_v16 = vsel %vm832_vm1, 0.0, %v784_v10 }
 0x2ff   : > { %v871_v30 = vsel %vm866_vm11, 0.0, %v854_v7  ;;  %v857_v26 = vrot.slane %v840_v16, 7  ;;  %v882_v43 = vrot.slane %v840_v16, 1 }
 0x300   : > { %v836_v11 = vsel %vm828_vm15, 0.0, %v780_v3  ;;  %8202 = vmatprep.mubr.msk.f32.mxu1 %vm373_vm0, %v944_v4  ;;  %v908_v15 = vmul.f32 %v9490_v41, %v871_v30 }
 0x301   : > { %v853_v35 = vrot.slane %v836_v11, 7  ;;  %v758_v14 = vpop.permute.xlu1 %757  ;;  %8203 = vmatmul.mubr.msk.f32.vlgmr.msra.gmra.mxu1 %vm373_vm0, %v945_v6  ;;  %v878_v22 = vrot.slane %v836_v11, 1  ;;  %v919_v23 = vmul.f32 %v9493_v44, %v836_v11  ;;  %v874_v55 = vsel %vm866_vm11, 0.0, %v857_v26 }
 0x302   : > { %v779_v24 = vmul.f32 %v758_v14, %v9457_v34  ;;  %v896_v34 = vsel %vm891_vm13, %v879_v17, 0.0  ;;  %v928_v54 = vadd.f32 %v920_v32, %v908_v15  ;;  %v911_v63 = vmul.f32 %v9490_v41, %v874_v55 }
 0x303   : > { %v870_v18 = vsel %vm866_vm11, 0.0, %v853_v35  ;;  %v895_v45 = vsel %vm891_vm13, %v878_v22, 0.0  ;;  %v940_v49 = vmul.f32 %v9497_v53, %v896_v34  ;;  %v923_v17 = vmul.f32 %v9493_v44, %v840_v16 }
 0x304   : > { %v835_v40 = vsel %vm827_vm2, 0.0, %v779_v24  ;;  %v907_v60 = vmul.f32 %v9490_v41, %v870_v18  ;;  %v939_v56 = vmul.f32 %v9497_v53, %v895_v45  ;;  %v899_v24 = vsel %vm891_vm13, %v882_v43, 0.0 }
 0x305   : > { %v764_v31 = vpop.permute.xlu1 %763  ;;  %v852_v36 = vrot.slane %v835_v40, 7  ;;  %v877_v37 = vrot.slane %v835_v40, 1  ;;  %v918_v50 = vmul.f32 %v9493_v44, %v835_v40  ;;  %v948_v14 = vadd.f32 %v940_v49, %v928_v54 }
 0x306   : > { %v782_v20 = vmul.f32 %v764_v31, %v9465_v42  ;;  %v927_v38 = vadd.f32 %v919_v23, %v907_v60  ;;  %v931_v40 = vadd.f32 %v923_v17, %v911_v63 }
 0x307   : > { %v869_v47 = vsel %vm866_vm11, 0.0, %v852_v36  ;;  %v894_v21 = vsel %vm891_vm13, %v877_v37, 0.0 }
 0x308   : > { %v906_v28 = vmul.f32 %v9490_v41, %v869_v47  ;;  %v838_v51 = vsel %vm830_vm3, 0.0, %v782_v20  ;;  %v938_v57 = vmul.f32 %v9497_v53, %v894_v21  ;;  %v947_v4 = vadd.f32 %v939_v56, %v927_v38 }
 0x309   : > { %v766_v52 = vpop.permute.xlu1 %765  ;;  %v855_v29 = vrot.slane %v838_v51, 7  ;;  %v880_v42 = vrot.slane %v838_v51, 1  ;;  %v921_v61 = vmul.f32 %v9493_v44, %v838_v51 }
 0x30a   : > { %v783_v19 = vmul.f32 %v766_v52, %v9469_v46  ;;  %v926_v48 = vadd.f32 %v918_v50, %v906_v28 }
 0x30b   : > { %v872_v58 = vsel %vm866_vm11, 0.0, %v855_v29  ;;  %v897_v39 = vsel %vm891_vm13, %v880_v42, 0.0 }
 0x30c   : > { %v839_v25 = vsel %vm831_vm4, 0.0, %v783_v19  ;;  %v909_v59 = vmul.f32 %v9490_v41, %v872_v58  ;;  %v946_v3 = vadd.f32 %v938_v57, %v926_v48  ;;  %v941_v7 = vmul.f32 %v9497_v53, %v897_v39 }
 0x30d   : > { %v856_v46 = vrot.slane %v839_v25, 7  ;;  %v881_v62 = vrot.slane %v839_v25, 1  ;;  %v922_v35 = vmul.f32 %v9493_v44, %v839_v25  ;;  %v7797_v44 = vld [vmem:[#allocation5 + $0x80] ss:$0 sm:$0xff] }
 0x30e   : > { %v929_v6 = vadd.f32 %v921_v61, %v909_v59  ;;  %8205 = vmatprep.mubr.msk.f32.mxu1 %vm373_vm0, %v946_v3 }
 0x30f   : > { %v873_v10 = vsel %vm866_vm11, 0.0, %v856_v46  ;;  %v898_v33 = vsel %vm891_vm13, %v881_v62, 0.0  ;;  %8206 = vmatmul.mubr.msk.f32.gmra.mxu1 %vm373_vm0, %v947_v4 }
 0x310   : > { %v910_v11 = vmul.f32 %v9490_v41, %v873_v10  ;;  %v949_v18 = vadd.f32 %v941_v7, %v929_v6  ;;  %v942_v22 = vmul.f32 %v9497_v53, %v898_v33  ;;  %8208 = vmatprep.mubr.msk.f32.mxu1 %vm373_vm0, %v948_v14  ;;  %v943_v41 = vmul.f32 %v9497_v53, %v899_v24 }
 0x312   : > { %v930_v30 = vadd.f32 %v922_v35, %v910_v11  ;;  %v951_v32 = vadd.f32 %v943_v41, %v931_v40 }
 0x313   : > { %8209 = vmatmul.mubr.msk.f32.gmra.mxu1 %vm373_vm0, %v949_v18 }
 0x314   : > { %v950_v31 = vadd.f32 %v942_v22, %v930_v30 }
 0x316   : > { %8211 = vmatprep.mubr.msk.f32.mxu1 %vm373_vm0, %v950_v31 }
 0x317   : > { %8212 = vmatmul.mubr.msk.f32.gmra.mxu1 %vm373_vm0, %v951_v32 }
 0x3c1   : > { %v8204_v16 = vpop.f32.mrf.mxu1 }
 0x3c2   : > { %v1057_v60 = vadd.f32 %v8204_v16, %v7797_v44 }
 0x3c3   : > { %v1051_v36 = vpop.f32.mrf.mxu1 }
 0x3c4   : > { %v9559_v37 = vadd.f32 %v1057_v60, %v9305_v2  ;;  %v1052_v34 = vadd.f32 %v7797_v44, %v1051_v36 }
 0x3c6   : > { %10884 = vst [vmem:[#allocation11_spill] sm:$0xff] %v9559_v37  ;;  %v9562_v15 = vadd.f32 %v1052_v34, %v9301_v0  ;;  %v1103_v53 = vsel %vm373_vm0, %v9559_v37, 0.0 }
 0x3c7   : > { %1104 = vadd.xlane.f32.xlu0 %v1103_v53 }
 0x3c8   : > { %10885 = vst [vmem:[#allocation12_spill] sm:$0xff] %v9562_v15  ;;  %v1100_v26 = vsel %vm373_vm0, %v9562_v15, 0.0 }
 0x3c9   : > { %1101 = vadd.xlane.f32.xlu1 %v1100_v26 }
 0x3cf   : > { %v8207_v20 = vpop.f32.mrf.mxu1 }
 0x3d0   : > { %v1067_v43 = vadd.f32 %v8207_v20, %v7797_v44 }
 0x3d1   : > { %v1061_v45 = vpop.f32.mrf.mxu1 }
 0x3d2   : > { %v9569_v23 = vadd.f32 %v1067_v43, %v9311_v5  ;;  %v1062_v2 = vadd.f32 %v7797_v44, %v1061_v45 }
 0x3d3   : > { %v8210_v47 = vpop.f32.mrf.mxu1 }
 0x3d4   : > { %10886 = vst [vmem:[#allocation13_spill] sm:$0xff] %v9569_v23  ;;  %v9572_v21 = vadd.f32 %v1062_v2, %v9303_v1  ;;  %v1077_v0 = vadd.f32 %v8210_v47, %v7797_v44  ;;  %v1109_v28 = vsel %vm373_vm0, %v9569_v23, 0.0  ;;  %v1425_v2 = vld [vmem:[#allocation5 + $0xc8] sm:$0xff]  ;;  %v1424_v47 = vld [vmem:[#allocation5 + $0xc0] sm:$0xff] }
 0x3d5   : > { %1110 = vadd.xlane.f32.xlu1 %v1109_v28  ;;  %v1071_v50 = vpop.f32.mrf.mxu1  ;;  %8234 = vmatprep.subr.mxu1 %v1425_v2  ;;  %v1423_v28 = vld [vmem:[#allocation5 + $0xb8] sm:$0xff] }
 0x3d6   : > { %10887 = vst [vmem:[#allocation14_spill] sm:$0xff] %v9572_v21  ;;  %v9577_v51 = vadd.f32 %v1077_v0, %v9319_v9  ;;  %v1072_v52 = vadd.f32 %v7797_v44, %v1071_v50  ;;  %v1106_v38 = vsel %vm373_vm0, %v9572_v21, 0.0  ;;  %8235 = vmatpush3.msra.mxu1 %v1425_v2  ;;  %v1287_v0 = vld [vmem:[#allocation5 + $0xa0] sm:$0xff]  ;;  %v1286_v50 = vld [vmem:[#allocation5 + $0x98] sm:$0xff] }
 0x3d7   : > { %1107 = vadd.xlane.f32.xlu0 %v1106_v38  ;;  %v8213_v5 = vpop.f32.mrf.mxu1  ;;  %8236 = vmatprep.subr.mxu1 %v1424_v47  ;;  %v331_v38 = vld [vmem:[%s9282_s7] sm:$0xff] }
 0x3d8   : > { %10888 = vst [vmem:[#allocation15_spill] sm:$0xff] %v9577_v51  ;;  %v9582_v29 = vadd.f32 %v1072_v52, %v9317_v8  ;;  %v1087_v1 = vadd.f32 %v8213_v5, %v7797_v44  ;;  %v1115_v42 = vsel %vm373_vm0, %v9577_v51, 0.0  ;;  %8237 = vmatpush3.msra.mxu1 %v1424_v47  ;;  %8214 = vmatprep.subr.mxu0 %v1287_v0  ;;  %v1422_v52 = vld [vmem:[#allocation5 + $0xb0] sm:$0xff] }
 0x3d9   : > { %1116 = vadd.xlane.f32.xlu1 %v1115_v42  ;;  %v1081_v19 = vpop.f32.mrf.mxu1  ;;  %8238 = vmatprep.subr.mxu1 %v1423_v28  ;;  %v1285_v5 = vld [vmem:[#allocation5 + $0x90] sm:$0xff]  ;;  %v1284_v42 = vld [vmem:[#allocation5 + $0x88] sm:$0xff] }
 0x3da   : > { %10889 = vst [vmem:[#allocation16_spill] sm:$0xff] %v9582_v29  ;;  %v9587_v54 = vadd.f32 %v1087_v1, %v9327_v13  ;;  %v1082_v9 = vadd.f32 %v7797_v44, %v1081_v19  ;;  %v1112_v55 = vsel %vm373_vm0, %v9582_v29, 0.0  ;;  %8215 = vmatpush3.msra.mxu0 %v1287_v0  ;;  %8239 = vmatpush3.msra.mxu1 %v1423_v28  ;;  %v332_v1 = vld [vmem:[%s9282_s7 + $0x8] sm:$0xff]  ;;  %v333_v19 = vld [vmem:[%s9282_s7 + $0x10] sm:$0xff] }
 0x3db   : > { %1113 = vadd.xlane.f32.xlu0 %v1112_v55  ;;  %8216 = vmatprep.subr.mxu0 %v1286_v50  ;;  %v335_v55 = vld [vmem:[%s9282_s7 + $0x20] sm:$0xff] }
 0x3dc   : > { %10890 = vst [vmem:[#allocation17_spill] sm:$0xff] %v9587_v54  ;;  %v9592_v56 = vadd.f32 %v1082_v9, %v9325_v12  ;;  %v1121_v8 = vsel %vm373_vm0, %v9587_v54, 0.0  ;;  %8240 = vmatprep.subr.mxu1 %v1422_v52  ;;  %8217 = vmatpush3.msra.mxu0 %v1286_v50  ;;  %v334_v9 = vld [vmem:[%s9282_s7 + $0x18] sm:$0xff] }
 0x3dd   : > { %1122 = vadd.xlane.f32.xlu1 %v1121_v8  ;;  %8241 = vmatpush3.msra.mxu1 %v1422_v52  ;;  %v336_v8 = vld [vmem:[%s9282_s7 + $0x28] sm:$0xff] }
 0x3de   : > { %10891 = vst [vmem:[#allocation18_spill] sm:$0xff] %v9592_v56  ;;  %v1118_v48 = vsel %vm373_vm0, %v9592_v56, 0.0  ;;  %8242 = vmatprep.mubr.msk.f32.mxu1 %vm373_vm0, %v331_v38  ;;  %8218 = vmatprep.subr.mxu0 %v1285_v5 }
 0x3df   : > { %1119 = vadd.xlane.f32.xlu0 %v1118_v48  ;;  %8243 = vmatmul.mubr.msk.f32.vlgmr.msra.gmra.mxu1 %vm373_vm0, %v332_v1  ;;  %v337_v48 = vld [vmem:[%s9282_s7 + $0x30] sm:$0xff] }
 0x3e0   : > { %8219 = vmatpush3.msra.mxu0 %v1285_v5  ;;  %8245 = vmatprep.mubr.msk.f32.mxu1 %vm373_vm0, %v333_v19 }
 0x3e1   : > { %8220 = vmatprep.subr.mxu0 %v1284_v42 }
 0x3e2   : > { %8221 = vmatpush3.msra.mxu0 %v1284_v42 }
 0x3e3   : > { %8246 = vmatmul.mubr.msk.f32.gmra.mxu1 %vm373_vm0, %v334_v9 }
 0x3e4   : > { %8248 = vmatprep.mubr.msk.f32.mxu1 %vm373_vm0, %v335_v55 }
 0x3e7   : > { %8249 = vmatmul.mubr.msk.f32.gmra.mxu1 %vm373_vm0, %v336_v8 }
 0x3e8   : > { %8251 = vmatprep.mubr.msk.f32.mxu1 %vm373_vm0, %v337_v48 }
 0x450   : > { %v1105_v57 = vpop.xlane.xlu0 %1104 }
 0x451   : > { %v1125_v58 = vmul.f32 0.03125, %v1105_v57  ;;  %v338_v57 = vld [vmem:[%s9282_s7 + $0x38] sm:$0xff]  ;;  %s9114_s7 = smov 88  }
 0x452   : > { %v1102_v13 = vpop.xlane.xlu1 %1101  ;;  %8252 = vmatmul.mubr.msk.f32.gmra.mxu1 %vm373_vm0, %v338_v57 }
 0x453   : > { %v9599_v39 = vsub.f32 %v9559_v37, %v1125_v58  ;;  %v1124_v25 = vmul.f32 0.03125, %v1102_v13  ;;  %v10862_v58 = vmov 0.0  }
 0x454   : > { %8254 = vmatprep.subr.mxu0 %v10862_v58  ;;  %8259 = vmatprep.subr.mxu1 %v10862_v58 }
 0x455   : > { %v9602_v59 = vsub.f32 %v9562_v15, %v1124_v25  ;;  %v1141_v12 = vmul.f32 %v9599_v39, %v9599_v39 }
 0x457   : > { %v1151_v61 = vsel %vm373_vm0, %v1141_v12, 0.0  ;;  %v1140_v46 = vmul.f32 %v9602_v59, %v9602_v59 }
 0x458   : > { %1152 = vadd.xlane.f32.xlu1 %v1151_v61 }
 0x459   : > { %v1148_v62 = vsel %vm373_vm0, %v1140_v46, 0.0 }
 0x45a   : > { %1149 = vadd.xlane.f32.xlu0 %v1148_v62 }
 0x45e   : > { %v1111_v49 = vpop.xlane.xlu1 %1110 }
 0x45f   : > { %v1127_v63 = vmul.f32 0.03125, %v1111_v49 }
 0x460   : > { %v1108_v3 = vpop.xlane.xlu0 %1107 }
 0x461   : > { %v9611_v4 = vsub.f32 %v9569_v23, %v1127_v63  ;;  %v1126_v6 = vmul.f32 0.03125, %v1108_v3 }
 0x462   : > { %v1117_v7 = vpop.xlane.xlu1 %1116 }
 0x463   : > { %v9614_v10 = vsub.f32 %v9572_v21, %v1126_v6  ;;  %v1129_v33 = vmul.f32 0.03125, %v1117_v7  ;;  %v1143_v11 = vmul.f32 %v9611_v4, %v9611_v4 }
 0x464   : > { %v1114_v35 = vpop.xlane.xlu0 %1113 }
 0x465   : > { %v9619_v14 = vsub.f32 %v9577_v51, %v1129_v33  ;;  %v1128_v17 = vmul.f32 0.03125, %v1114_v35  ;;  %v1157_v18 = vsel %vm373_vm0, %v1143_v11, 0.0  ;;  %v1142_v30 = vmul.f32 %v9614_v10, %v9614_v10 }
 0x466   : > { %v1123_v24 = vpop.xlane.xlu1 %1122  ;;  %1158 = vadd.xlane.f32.xlu1 %v1157_v18 }
 0x467   : > { %v9625_v22 = vsub.f32 %v9582_v29, %v1128_v17  ;;  %v1131_v40 = vmul.f32 0.03125, %v1123_v24  ;;  %v1145_v31 = vmul.f32 %v9619_v14, %v9619_v14  ;;  %v1154_v41 = vsel %vm373_vm0, %v1142_v30, 0.0 }
 0x468   : > { %v1120_v32 = vpop.xlane.xlu0 %1119  ;;  %1155 = vadd.xlane.f32.xlu0 %v1154_v41 }
 0x469   : > { %v9631_v44 = vsub.f32 %v9587_v54, %v1131_v40  ;;  %v1130_v16 = vmul.f32 0.03125, %v1120_v32  ;;  %v1163_v60 = vsel %vm373_vm0, %v1145_v31, 0.0  ;;  %v1144_v36 = vmul.f32 %v9625_v22, %v9625_v22 }
 0x46a   : > { %1164 = vadd.xlane.f32.xlu1 %v1163_v60 }
 0x46b   : > { %v9637_v34 = vsub.f32 %v9592_v56, %v1130_v16  ;;  %v1147_v53 = vmul.f32 %v9631_v44, %v9631_v44  ;;  %v1160_v26 = vsel %vm373_vm0, %v1144_v36, 0.0 }
 0x46c   : > { %1161 = vadd.xlane.f32.xlu0 %v1160_v26 }
 0x46d   : > { %v1169_v20 = vsel %vm373_vm0, %v1147_v53, 0.0  ;;  %v1146_v43 = vmul.f32 %v9637_v34, %v9637_v34 }
 0x46e   : > { %1170 = vadd.xlane.f32.xlu1 %v1169_v20 }
 0x46f   : > { %v1166_v45 = vsel %vm373_vm0, %v1146_v43, 0.0 }
 0x470   : > { %1167 = vadd.xlane.f32.xlu0 %v1166_v45  ;;  %v9667_v45 = vld [vmem:[#allocation5 + $0x10] ss:$0 sm:$0xff] }
 0x471   : > { %v1241_v52 = vmul.f32 %v9667_v45, %v9599_v39  ;;  %v1240_v38 = vmul.f32 %v9667_v45, %v9602_v59  ;;  %v7807_v59 = vld [vmem:[#allocation5 + $0x18] ss:$0 sm:$0xff] }
 0x4e1   : > { %v1153_v13 = vpop.xlane.xlu1 %1152 }
 0x4e2   : > { %v1173_v25 = vmul.f32 0.032258064, %v1153_v13 }
 0x4e3   : > { %v1150_v12 = vpop.xlane.xlu0 %1149 }
 0x4e4   : > { %8789 = vrsqrt.f32 %v1173_v25  ;;  %v1172_v61 = vmul.f32 0.032258064, %v1150_v12  ;;  %vm1189_vm5 = vcmp.eq.f32.partialorder %v1173_v25, inf  ;;  %v1192_v3 = vand.u32 2147483648, %v1173_v25 }
 0x4e5   : > { %vm1191_vm6 = vcmp.eq.f32.partialorder %v1173_v25, 0.0 }
 0x4e6   : > { %8791 = vrsqrt.f32 %v1172_v61  ;;  %vm1182_vm7 = vcmp.eq.f32.partialorder %v1172_v61, inf  ;;  %v1185_v30 = vand.u32 2147483648, %v1172_v61  ;;  %vm1184_vm8 = vcmp.eq.f32.partialorder %v1172_v61, 0.0 }
 0x4ef   : > { %v1159_v62 = vpop.xlane.xlu1 %1158 }
 0x4f0   : > { %v1175_v63 = vmul.f32 0.032258064, %v1159_v62 }
 0x4f1   : > { %v8790_v46 = vpop.eup %8789  ;;  %v1156_v33 = vpop.xlane.xlu0 %1155 }
 0x4f2   : > { %v1188_v49 = vmul.f32 %v8790_v46, %v1173_v25  ;;  %8793 = vrsqrt.f32 %v1175_v63  ;;  %v1174_v17 = vmul.f32 0.032258064, %v1156_v33  ;;  %vm1203_vm9 = vcmp.eq.f32.partialorder %v1175_v63, inf }
 0x4f3   : > { %v8792_v6 = vpop.eup %8791  ;;  %v1165_v18 = vpop.xlane.xlu1 %1164  ;;  %v1206_v47 = vand.u32 2147483648, %v1175_v63  ;;  %vm1205_vm10 = vcmp.eq.f32.partialorder %v1175_v63, 0.0 }
 0x4f4   : > { %v1190_v7 = vsel %vm1189_vm5, %v1173_v25, %v1188_v49  ;;  %v1181_v35 = vmul.f32 %v8792_v6, %v1172_v61  ;;  %v1177_v40 = vmul.f32 0.032258064, %v1165_v18  ;;  %8795 = vrsqrt.f32 %v1174_v17 }
 0x4f5   : > { %v1193_v11 = vsel %vm1191_vm6, %v1192_v3, %v1190_v7  ;;  %v1162_v32 = vpop.xlane.xlu0 %1161  ;;  %vm1196_vm11 = vcmp.eq.f32.partialorder %v1174_v17, inf  ;;  %vm1198_vm12 = vcmp.eq.f32.partialorder %v1174_v17, 0.0  ;;  %v1199_v9 = vand.u32 2147483648, %v1174_v17 }
 0x4f6   : > { %v1249_v24 = vadd.f32 1e-06, %v1193_v11  ;;  %v1183_v31 = vsel %vm1182_vm7, %v1172_v61, %v1181_v35  ;;  %v1176_v36 = vmul.f32 0.032258064, %v1162_v32  ;;  %vm1217_vm13 = vcmp.eq.f32.partialorder %v1177_v40, inf }
 0x4f7   : > { %v1186_v41 = vsel %vm1184_vm8, %v1185_v30, %v1183_v31  ;;  %v1171_v60 = vpop.xlane.xlu1 %1170  ;;  %vm1219_vm14 = vcmp.eq.f32.partialorder %v1177_v40, 0.0  ;;  %v1220_v13 = vand.u32 2147483648, %v1177_v40  ;;  %vm1608_vm6 = vcmask 64512  }
 0x4f8   : > { %8797 = vrcp.f32 %v1249_v24  ;;  %v1248_v16 = vadd.f32 1e-06, %v1186_v41  ;;  %v1179_v53 = vmul.f32 0.032258064, %v1171_v60  ;;  %vm1210_vm15 = vcmp.eq.f32.partialorder %v1176_v36, inf }
 0x4f9   : > { %8799 = vrsqrt.f32 %v1177_v40  ;;  %v1168_v26 = vpop.xlane.xlu0 %1167  ;;  %vm1212_vm1 = vcmp.eq.f32.partialorder %v1176_v36, 0.0  ;;  %v1213_v3 = vand.u32 2147483648, %v1176_v36  ;;  %vm9112_vm7 = vmmov 0  }
 0x4fa   : > { %8801 = vrcp.f32 %v1248_v16  ;;  %v9664_v20 = vmul.f32 0.032258064, %v1168_v26  ;;  %vm1231_vm2 = vcmp.eq.f32.partialorder %v1179_v53, inf  ;;  %v1234_v35 = vand.u32 2147483648, %v1179_v53  ;;  %8261 = vmatprep.mubr.msk.f32.mxu1 %vm9112_vm7, %v10862_v58 }
 0x4fb   : > { %8803 = vrsqrt.f32 %v1176_v36  ;;  %vm1233_vm3 = vcmp.eq.f32.partialorder %v1179_v53, 0.0 }
 0x4fc   : > { %8805 = vrsqrt.f32 %v1179_v53  ;;  %vm1224_vm4 = vcmp.eq.f32.partialorder %v9664_v20, inf  ;;  %v1227_v16 = vand.u32 2147483648, %v9664_v20  ;;  %vm1226_vm5 = vcmp.eq.f32.partialorder %v9664_v20, 0.0 }
 0x4fd   : > { %8807 = vrsqrt.f32 %v9664_v20 }
 0x4ff   : > { %v8794_v43 = vpop.eup %8793 }
 0x500   : > { %v1202_v2 = vmul.f32 %v8794_v43, %v1175_v63  ;;  %v1243_v43 = vmul.f32 %v9667_v45, %v9611_v4 }
 0x501   : > { %v8796_v0 = vpop.eup %8795 }
 0x502   : > { %v1204_v28 = vsel %vm1203_vm9, %v1175_v63, %v1202_v2  ;;  %v1195_v1 = vmul.f32 %v8796_v0, %v1174_v17  ;;  %v1242_v2 = vmul.f32 %v9667_v45, %v9614_v10 }
 0x503   : > { %v1207_v5 = vsel %vm1205_vm10, %v1206_v47, %v1204_v28 }
 0x504   : > { %v1251_v19 = vadd.f32 1e-06, %v1207_v5  ;;  %v1197_v55 = vsel %vm1196_vm11, %v1174_v17, %v1195_v1 }
 0x505   : > { %v8798_v50 = vpop.eup %8797  ;;  %v1200_v57 = vsel %vm1198_vm12, %v1199_v9, %v1197_v55  ;;  %v1246_v9 = vmul.f32 %v9667_v45, %v9637_v34 }
 0x506   : > { %v8800_v42 = vpop.eup %8799  ;;  %8809 = vrcp.f32 %v1251_v19  ;;  %v1265_v25 = vmul.f32 %v8798_v50, %v1241_v52  ;;  %v1250_v12 = vadd.f32 1e-06, %v1200_v57  ;;  %v1245_v52 = vmul.f32 %v9667_v45, %v9619_v14 }
 0x507   : > { %v1216_v8 = vmul.f32 %v8800_v42, %v1177_v40  ;;  %v8802_v48 = vpop.eup %8801  ;;  %v1247_v19 = vmul.f32 %v9667_v45, %v9631_v44  ;;  %v8244_v44 = vpop.f32.mrf.mxu1 }
 0x508   : > { %v8804_v39 = vpop.eup %8803  ;;  %v1264_v46 = vmul.f32 %v8802_v48, %v1240_v38  ;;  %8811 = vrcp.f32 %v1250_v12  ;;  %v1277_v17 = vadd.f32 %v7807_v59, %v1265_v25  ;;  %v7817_v25 = vld [vmem:[#allocation5 + $0xd0] ss:$0 sm:$0xff] }
 0x509   : > { %v1218_v61 = vsel %vm1217_vm13, %v1177_v40, %v1216_v8  ;;  %v8806_v62 = vpop.eup %8805  ;;  %v1209_v63 = vmul.f32 %v8804_v39, %v1176_v36  ;;  %v9698_v39 = vadd.f32 %v8244_v44, %v7817_v25  ;;  %v1521_v34 = vpop.f32.mrf.mxu1  ;;  %v346_v44 = vld [vmem:[%s9794_s11 + $0x7] sm:$0x1] }
 0x50a   : > { %v1221_v49 = vsel %vm1219_vm14, %v1220_v13, %v1218_v61  ;;  %v1230_v7 = vmul.f32 %v8806_v62, %v1179_v53  ;;  %v1276_v33 = vadd.f32 %v7807_v59, %v1264_v46  ;;  %v8808_v18 = vpop.eup %8807  ;;  %v7808_v61 = vld [vmem:[#allocation5 + $0xa8] ss:$0 sm:$0xff]  ;;  %vm354_vm14 = vcmp.eq.f32.partialorder %v346_v44, 0.0 }
 0x50b   : > { %v1253_v6 = vadd.f32 1e-06, %v1221_v49  ;;  %v1211_v11 = vsel %vm1210_vm15, %v1176_v36, %v1209_v63  ;;  %v1223_v41 = vmul.f32 %v8808_v18, %v9664_v20  ;;  %8260 = vmatpush3.xpose.msk.msra.mxu1 %vm1608_vm6, %v9698_v39  ;;  %v8247_v12 = vpop.f32.mrf.mxu1 }
 0x50c   : > { %v1214_v24 = vsel %vm1212_vm1, %v1213_v3, %v1211_v11  ;;  %v1232_v30 = vsel %vm1231_vm2, %v1179_v53, %v1230_v7  ;;  %8222 = vmatprep.mubr.msk.f32.mxu0 %vm373_vm0, %v1276_v33  ;;  %8269 = vmatprep.subr.mxu1 %v10862_v58  ;;  %v9712_v62 = vadd.f32 %v8247_v12, %v7817_v25  ;;  %vm6977_vm1 = vcmask 130048  }
 0x50d   : > { %8813 = vrcp.f32 %v1253_v6  ;;  %v1252_v40 = vadd.f32 1e-06, %v1214_v24  ;;  %v1235_v31 = vsel %vm1233_vm3, %v1234_v35, %v1232_v30  ;;  %8223 = vmatmul.mubr.msk.f32.vlgmr.msra.gmra.mxu0 %vm373_vm0, %v1277_v17  ;;  %v1225_v60 = vsel %vm1224_vm4, %v9664_v20, %v1223_v41 }
 0x50e   : > { %v1255_v32 = vadd.f32 1e-06, %v1235_v31  ;;  %v1228_v36 = vsel %vm1226_vm5, %v1227_v16, %v1225_v60  ;;  %v1244_v20 = vmul.f32 %v9667_v45, %v9625_v22  ;;  %v9700_v45 = vadd.f32 %v7817_v25, %v1521_v34 }
 0x50f   : > { %8815 = vrcp.f32 %v1252_v40  ;;  %v1254_v53 = vadd.f32 1e-06, %v1228_v36  ;;  %vm6986_vm2 = vcmask 195584  }
 0x510   : > { %8817 = vrcp.f32 %v1255_v32  ;;  %8255 = vmatpush3.xpose.msk.msra.mxu0 %vm1608_vm6, %v9700_v45 }
 0x511   : > { %8819 = vrcp.f32 %v1254_v53  ;;  %8264 = vmatprep.subr.mxu0 %v10862_v58 }
 0x513   : > { %v8810_v26 = vpop.eup %8809 }
 0x514   : > { %v1267_v0 = vmul.f32 %v8810_v26, %v1243_v43 }
 0x515   : > { %v8812_v47 = vpop.eup %8811 }
 0x516   : > { %v1266_v28 = vmul.f32 %v8812_v47, %v1242_v2  ;;  %v1279_v5 = vadd.f32 %v7807_v59, %v1267_v0  ;;  %v340_v0 = vld [vmem:[%s9794_s11 + $0x1] sm:$0x1] }
 0x517   : > { %vm348_vm8 = vcmp.eq.f32.partialorder %v340_v0, 0.0 }
 0x518   : > { %v1278_v38 = vadd.f32 %v7807_v59, %v1266_v28  ;;  %v339_v28 = vld [vmem:[%s9794_s11] sm:$0x1] }
 0x519   : > { %vm347_vm9 = vcmp.eq.f32.partialorder %v339_v28, 0.0 }
 0x51a   : > { %v8814_v50 = vpop.eup %8813  ;;  %8225 = vmatprep.mubr.msk.f32.mxu0 %vm373_vm0, %v1278_v38 }
 0x51b   : > { %v1269_v42 = vmul.f32 %v8814_v50, %v1245_v52  ;;  %8226 = vmatmul.mubr.msk.f32.gmra.mxu0 %vm373_vm0, %v1279_v5  ;;  %v356_v50 = vsel %vm348_vm8, -1e+09, %v10862_v58  ;;  %v355_v52 = vsel %vm347_vm9, -1e+09, %v10862_v58 }
 0x51c   : > { %v8816_v1 = vpop.eup %8815  ;;  %v9801_v38 = vrot.slane %v356_v50, %v9484_v27 }
 0x51d   : > { %v8818_v4 = vpop.eup %8817  ;;  %v1268_v10 = vmul.f32 %v8816_v1, %v1244_v20  ;;  %v1281_v8 = vadd.f32 %v7807_v59, %v1269_v42  ;;  %v9804_v20 = vrot.slane %v355_v52, %v9484_v27 }
 0x51e   : > { %v8820_v55 = vpop.eup %8819  ;;  %v1271_v48 = vmul.f32 %v8818_v4, %v1247_v19 }
 0x51f   : > { %v1280_v14 = vadd.f32 %v7807_v59, %v1268_v10  ;;  %v1270_v22 = vmul.f32 %v8820_v55, %v1246_v9 }
 0x520   : > { %v1283_v13 = vadd.f32 %v7807_v59, %v1271_v48  ;;  %v344_v48 = vld [vmem:[%s9794_s11 + $0x5] sm:$0x1] }
 0x521   : > { %8228 = vmatprep.mubr.msk.f32.mxu0 %vm373_vm0, %v1280_v14  ;;  %v1282_v57 = vadd.f32 %v7807_v59, %v1270_v22  ;;  %v1531_v59 = vpop.f32.mrf.mxu1  ;;  %v342_v14 = vld [vmem:[%s9794_s11 + $0x3] sm:$0x1]  ;;  %vm352_vm12 = vcmp.eq.f32.partialorder %v344_v48, 0.0 }
 0x522   : > { %8229 = vmatmul.mubr.msk.f32.gmra.mxu0 %vm373_vm0, %v1281_v8  ;;  %v9716_v3 = vadd.f32 %v7817_v25, %v1531_v59  ;;  %v341_v8 = vld [vmem:[%s9794_s11 + $0x2] sm:$0x1]  ;;  %vm350_vm10 = vcmp.eq.f32.partialorder %v342_v14, 0.0  ;;  %v360_v12 = vsel %vm352_vm12, -1e+09, %v10862_v58 }
 0x523   : > { %8231 = vmatprep.mubr.msk.f32.mxu0 %vm373_vm0, %v1282_v57  ;;  %v8250_v7 = vpop.f32.mrf.mxu1  ;;  %vm349_vm11 = vcmp.eq.f32.partialorder %v341_v8, 0.0  ;;  %v358_v22 = vsel %vm350_vm10, -1e+09, %v10862_v58  ;;  %v343_v57 = vld [vmem:[%s9794_s11 + $0x4] sm:$0x1] }
 0x524   : > { %v9734_v11 = vadd.f32 %v8250_v7, %v7817_v25  ;;  %vm351_vm13 = vcmp.eq.f32.partialorder %v343_v57, 0.0 }
 0x525   : > { %v1541_v33 = vpop.f32.mrf.mxu1 }
 0x526   : > { %8232 = vmatmul.mubr.msk.f32.gmra.mxu0 %vm373_vm0, %v1283_v13  ;;  %v9738_v24 = vadd.f32 %v7817_v25, %v1541_v33  ;;  %v357_v13 = vsel %vm349_vm11, -1e+09, %v10862_v58 }
 0x527   : > { %8256 = vmatprep.mubr.msk.f32.mxu0 %vm9112_vm7, %v10862_v58  ;;  %v8253_v17 = vpop.f32.mrf.mxu1  ;;  %v9827_v34 = vrot.slane %v357_v13, %v9484_v27 }
 0x528   : > { %v9748_v41 = vadd.f32 %v8253_v17, %v7817_v25 }
 0x529   : > { %v1551_v31 = vpop.f32.mrf.mxu1 }
 0x52a   : > { %v9759_v60 = vadd.f32 %v7817_v25, %v1551_v31  ;;  %v9823_v25 = vrot.slane %v358_v22, %v9484_v27  ;;  %v362_v31 = vsel %vm354_vm14, -1e+09, %v10862_v58 }
 0x52b   : > { %v9854_v50 = vrot.slane %v362_v31, %v9484_v27 }
 0x5cd   : > { %v8224_v46 = vpop.f32.mrf.mxu0 }
 0x5ce   : > { %v9714_v49 = vadd.f32 %v8224_v46, %v7808_v61 }
 0x5cf   : > { %v1383_v63 = vpop.f32.mrf.mxu0 }
 0x5d0   : > { %v9718_v6 = vadd.f32 %v7808_v61, %v1383_v63  ;;  %8262 = vmatmul.mubr.msk.f32.vlgmr.msra.gmra.mxu1 %vm1608_vm6, %v9714_v49  ;;  %v359_v63 = vsel %vm351_vm13, -1e+09, %v10862_v58 }
 0x5d1   : > { %8270 = vmatpush3.xpose.msk.msra.mxu1 %vm1608_vm6, %v9712_v62  ;;  %8271 = vmatprep.mubr.msk.f32.mxu1 %vm9112_vm7, %v10862_v58 }
 0x5d2   : > { %8257 = vmatmul.mubr.msk.f32.vlgmr.msra.gmra.mxu0 %vm1608_vm6, %v9718_v6  ;;  %8279 = vmatprep.subr.mxu1 %v10862_v58 }
 0x5d3   : > { %8265 = vmatpush3.xpose.msk.msra.mxu0 %vm1608_vm6, %v9716_v3  ;;  %8266 = vmatprep.mubr.msk.f32.mxu0 %vm9112_vm7, %v10862_v58 }
 0x5d4   : > { %8274 = vmatprep.subr.mxu0 %v10862_v58 }
 0x5db   : > { %v8227_v35 = vpop.f32.mrf.mxu0 }
 0x5dc   : > { %v9736_v18 = vadd.f32 %v8227_v35, %v7808_v61  ;;  %v9836_v35 = vrot.slane %v360_v12, %v9484_v27 }
 0x5dd   : > { %v1393_v30 = vpop.f32.mrf.mxu0 }
 0x5de   : > { %v9740_v40 = vadd.f32 %v7808_v61, %v1393_v30  ;;  %8272 = vmatmul.mubr.msk.f32.vlgmr.msra.gmra.mxu1 %vm1608_vm6, %v9736_v18 }
 0x5df   : > { %8280 = vmatpush3.xpose.msk.msra.mxu1 %vm1608_vm6, %v9734_v11  ;;  %8281 = vmatprep.mubr.msk.f32.mxu1 %vm9112_vm7, %v10862_v58 }
 0x5e0   : > { %8267 = vmatmul.mubr.msk.f32.vlgmr.msra.gmra.mxu0 %vm1608_vm6, %v9740_v40  ;;  %8289 = vmatprep.subr.mxu1 %v10862_v58 }
 0x5e1   : > { %8275 = vmatpush3.xpose.msk.msra.mxu0 %vm1608_vm6, %v9738_v24  ;;  %8276 = vmatprep.mubr.msk.f32.mxu0 %vm9112_vm7, %v10862_v58 }
 0x5e2   : > { %v8230_v32 = vpop.f32.mrf.mxu0  ;;  %8284 = vmatprep.subr.mxu0 %v10862_v58 }
 0x5e3   : > { %v9753_v16 = vadd.f32 %v8230_v32, %v7808_v61 }
 0x5e4   : > { %v1403_v36 = vpop.f32.mrf.mxu0 }
 0x5e5   : > { %v9762_v53 = vadd.f32 %v7808_v61, %v1403_v36  ;;  %8282 = vmatmul.mubr.msk.f32.vlgmr.msra.gmra.mxu1 %vm1608_vm6, %v9753_v16  ;;  %v9845_v36 = vrot.slane %v359_v63, %v9484_v27 }
 0x5e6   : > { %8290 = vmatpush3.xpose.msk.msra.mxu1 %vm1608_vm6, %v9748_v41  ;;  %v8233_v26 = vpop.f32.mrf.mxu0  ;;  %8291 = vmatprep.mubr.msk.f32.mxu1 %vm9112_vm7, %v10862_v58 }
 0x5e7   : > { %v9770_v43 = vadd.f32 %v8233_v26, %v7808_v61  ;;  %8277 = vmatmul.mubr.msk.f32.vlgmr.msra.gmra.mxu0 %vm1608_vm6, %v9762_v53  ;;  %8299 = vmatprep.subr.mxu1 %v10862_v58 }
 0x5e8   : > { %8285 = vmatpush3.xpose.msk.msra.mxu0 %vm1608_vm6, %v9759_v60  ;;  %v1413_v2 = vpop.f32.mrf.mxu0  ;;  %8286 = vmatprep.mubr.msk.f32.mxu0 %vm9112_vm7, %v10862_v58 }
 0x5e9   : > { %v9779_v47 = vadd.f32 %v7808_v61, %v1413_v2  ;;  %8292 = vmatmul.mubr.msk.f32.vlgmr.msra.gmra.mxu1 %vm1608_vm6, %v9770_v43  ;;  %8294 = vmatprep.subr.mxu0 %v10862_v58  ;;  %v345_v61 = vld [vmem:[%s9794_s11 + $0x6] sm:$0x1]  ;;  %s10800_s11 = scalar_lea.hbm %s10856_s5, %s7957_s9 }
 0x5ea   : > { %8301 = vmatprep.mubr.msk.f32.mxu1 %vm9112_vm7, %v10862_v58  ;;  %vm353_vm15 = vcmp.eq.f32.partialorder %v345_v61, 0.0 }
 0x5eb   : > { %8287 = vmatmul.mubr.msk.f32.vlgmr.msra.gmra.mxu0 %vm1608_vm6, %v9779_v47  ;;  %v361_v0 = vsel %vm353_vm15, -1e+09, %v10862_v58 }
 0x5ec   : > { %8296 = vmatprep.mubr.msk.f32.mxu0 %vm9112_vm7, %v10862_v58 }
 0x690   : > { %v1757_v5 = vpop.f32.mrf.mxu1 }
 0x691   : > { %v9807_v1 = vadd.f32 %v1757_v5, %v9801_v38 }
 0x692   : > { %v1681_v42 = vpop.f32.mrf.mxu0  ;;  %v8263_v4 = vpop.f32.mrf.mxu1 }
 0x693   : > { %v9810_v10 = vadd.f32 %v1681_v42, %v9804_v20  ;;  %v2220_v19 = vsel %vm1608_vm6, %v9807_v1, -inf }
 0x694   : > { %2221 = vmax.xlane.f32.xlu1 %v2220_v19  ;;  %v8258_v9 = vpop.f32.mrf.mxu0  ;;  %v9860_v19 = vrot.slane %v361_v0, %v9484_v27 }
 0x695   : > { %v2217_v55 = vsel %vm1608_vm6, %v9810_v10, -inf }
 0x696   : > { %2218 = vmax.xlane.f32.xlu0 %v2217_v55 }
 0x69e   : > { %v1909_v59 = vpop.f32.mrf.mxu1 }
 0x69f   : > { %v9832_v46 = vadd.f32 %v1909_v59, %v9823_v25 }
 0x6a0   : > { %v1833_v7 = vpop.f32.mrf.mxu0  ;;  %v8273_v33 = vpop.f32.mrf.mxu1 }
 0x6a1   : > { %v9839_v17 = vadd.f32 %v1833_v7, %v9827_v34  ;;  %v2226_v30 = vsel %vm1608_vm6, %v9832_v46, -inf }
 0x6a2   : > { %2227 = vmax.xlane.f32.xlu1 %v2226_v30  ;;  %v8268_v32 = vpop.f32.mrf.mxu0 }
 0x6a3   : > { %v2223_v2 = vsel %vm1608_vm6, %v9839_v17, -inf }
 0x6a4   : > { %2224 = vmax.xlane.f32.xlu0 %v2223_v2 }
 0x6a5   : > { %v2061_v26 = vpop.f32.mrf.mxu1 }
 0x6a6   : > { %v9851_v28 = vadd.f32 %v2061_v26, %v9836_v35 }
 0x6a7   : > { %v8283_v52 = vpop.f32.mrf.mxu1  ;;  %v1985_v5 = vpop.f32.mrf.mxu0 }
 0x6a8   : > { %v1986_v42 = vadd.f32 %v1985_v5, %v9845_v36  ;;  %v2232_v4 = vsel %vm1608_vm6, %v9851_v28, -inf }
 0x6a9   : > { %2233 = vmax.xlane.f32.xlu1 %v2232_v4  ;;  %v8278_v9 = vpop.f32.mrf.mxu0  ;;  %v2213_v14 = vpop.f32.mrf.mxu1 }
 0x6aa   : > { %v2214_v55 = vadd.f32 %v2213_v14, %v9854_v50  ;;  %v2229_v8 = vsel %vm1608_vm6, %v1986_v42, -inf }
 0x6ab   : > { %v8293_v48 = vpop.f32.mrf.mxu1  ;;  %2230 = vmax.xlane.f32.xlu0 %v2229_v8  ;;  %v2137_v22 = vpop.f32.mrf.mxu0 }
 0x6ac   : > { %v2138_v57 = vadd.f32 %v2137_v22, %v9860_v19  ;;  %v2238_v13 = vsel %vm1608_vm6, %v2214_v55, -inf }
 0x6ad   : > { %2239 = vmax.xlane.f32.xlu1 %v2238_v13  ;;  %v8288_v44 = vpop.f32.mrf.mxu0 }
 0x6ae   : > { %v2235_v12 = vsel %vm1608_vm6, %v2138_v57, -inf }
 0x6af   : > { %2236 = vmax.xlane.f32.xlu0 %v2235_v12 }
 0x6be   : > { %2381 = vrot.lane.b32.xlu1 %v9698_v39, %s9110_s15 }
 0x6c2   : > { %2457 = vrot.lane.b32.xlu1 %v9716_v3, %s9110_s15 }
 0x6c5   : > { %2305 = vrot.lane.b32.xlu0 %v9700_v45, %s9110_s15 }
 0x6c6   : > { %2609 = vrot.lane.b32.xlu1 %v9738_v24, %s9110_s15 }
 0x6c9   : > { %2533 = vrot.lane.b32.xlu0 %v9712_v62, %s9110_s15 }
 0x6ca   : > { %2761 = vrot.lane.b32.xlu1 %v9759_v60, %s9110_s15 }
 0x6cd   : > { %2685 = vrot.lane.b32.xlu0 %v9734_v11, %s9110_s15 }
 0x6ce   : > { %2915 = vrot.lane.b32.xlu1 %v9700_v45, %s9113_s17 }
 0x6d1   : > { %2837 = vrot.lane.b32.xlu0 %v9748_v41, %s9110_s15  ;;  %s7646_s15 = sshll.u32 %s10775_s27, 4  ;;  %s10805_s15 = int_to_ptr.vmem [resolvable:$true] %s7646_s15 }
 0x6d2   : > { %2913 = vrot.lane.b32.xlu1 %v9718_v6, %s9113_s17 }
 0x6d5   : > { %2993 = vrot.lane.b32.xlu0 %v9698_v39, %s9113_s17 }
 0x6d6   : > { %3071 = vrot.lane.b32.xlu1 %v9716_v3, %s9113_s17 }
 0x6d9   : > { %2991 = vrot.lane.b32.xlu0 %v9714_v49, %s9113_s17 }
 0x6da   : > { %3069 = vrot.lane.b32.xlu1 %v9740_v40, %s9113_s17 }
 0x6dd   : > { %3149 = vrot.lane.b32.xlu0 %v9712_v62, %s9113_s17 }
 0x71d   : > { %v2222_v27 = vpop.xlane.xlu1 %2221 }
 0x71e   : > { %v2242_v61 = vsub.f32 %v9807_v1, %v2222_v27 }
 0x71f   : > { %v2219_v59 = vpop.xlane.xlu0 %2218 }
 0x720   : > { %v2251_v63 = vmul.f32 1.442695, %v2242_v61  ;;  %v2241_v7 = vsub.f32 %v9810_v10, %v2219_v59 }
 0x722   : > { %8821 = vpow2.f32 %v2251_v63  ;;  %v2249_v33 = vmul.f32 1.442695, %v2241_v7 }
 0x724   : > { %8823 = vpow2.f32 %v2249_v33 }
 0x72b   : > { %v2228_v30 = vpop.xlane.xlu1 %2227 }
 0x72c   : > { %v2244_v31 = vsub.f32 %v9832_v46, %v2228_v30 }
 0x72d   : > { %v2225_v26 = vpop.xlane.xlu0 %2224 }
 0x72e   : > { %v2255_v2 = vmul.f32 1.442695, %v2244_v31  ;;  %v2243_v0 = vsub.f32 %v9839_v17, %v2225_v26 }
 0x72f   : > { %v9900_v32 = vpop.eup %8821 }
 0x730   : > { %v2268_v52 = vsel %vm1608_vm6, %v9900_v32, 0.0  ;;  %8825 = vpow2.f32 %v2255_v2  ;;  %v2253_v10 = vmul.f32 1.442695, %v2243_v0 }
 0x731   : > { %v9905_v1 = vpop.eup %8823  ;;  %2269 = vadd.xlane.f32.xlu1 %v2268_v52 }
 0x732   : > { %v2234_v5 = vpop.xlane.xlu1 %2233  ;;  %v2265_v4 = vsel %vm1608_vm6, %v9905_v1, 0.0  ;;  %8827 = vpow2.f32 %v2253_v10 }
 0x733   : > { %v2246_v46 = vsub.f32 %v9851_v28, %v2234_v5  ;;  %2266 = vadd.xlane.f32.xlu0 %v2265_v4 }
 0x734   : > { %v2231_v9 = vpop.xlane.xlu0 %2230 }
 0x735   : > { %v2259_v14 = vmul.f32 1.442695, %v2246_v46  ;;  %v2245_v8 = vsub.f32 %v1986_v42, %v2231_v9 }
 0x736   : > { %v2240_v17 = vpop.xlane.xlu1 %2239 }
 0x737   : > { %8829 = vpow2.f32 %v2259_v14  ;;  %v2257_v48 = vmul.f32 1.442695, %v2245_v8  ;;  %v2248_v22 = vsub.f32 %v2214_v55, %v2240_v17 }
 0x738   : > { %v2237_v13 = vpop.xlane.xlu0 %2236 }
 0x739   : > { %8831 = vpow2.f32 %v2257_v48  ;;  %v2263_v44 = vmul.f32 1.442695, %v2248_v22  ;;  %v2247_v12 = vsub.f32 %v2138_v57, %v2237_v13 }
 0x73a   : > { %v2382_v27 = vpop.permute.xlu1 %2381 }
 0x73b   : > { %8833 = vpow2.f32 %v2263_v44  ;;  %v2261_v61 = vmul.f32 1.442695, %v2247_v12  ;;  %8300 = vmatpush3.msra.mxu1 %v2382_v27 }
 0x73c   : > { %v2306_v59 = vpop.permute.xlu0 %2305  ;;  %8309 = vmatprep.subr.mxu1 %v10862_v58 }
 0x73d   : > { %8835 = vpow2.f32 %v2261_v61  ;;  %8295 = vmatpush3.msra.mxu0 %v2306_v59  ;;  %v9912_v28 = vpop.eup %8825 }
 0x73e   : > { %8304 = vmatprep.subr.mxu0 %v10862_v58  ;;  %v2274_v42 = vsel %vm1608_vm6, %v9912_v28, 0.0  ;;  %v2458_v52 = vpop.permute.xlu1 %2457 }
 0x73f   : > { %v9916_v55 = vpop.eup %8827  ;;  %2275 = vadd.xlane.f32.xlu1 %v2274_v42 }
 0x740   : > { %v2271_v57 = vsel %vm1608_vm6, %v9916_v55, 0.0  ;;  %v2534_v5 = vpop.permute.xlu0 %2533 }
 0x741   : > { %2272 = vadd.xlane.f32.xlu0 %v2271_v57 }
 0x742   : > { %v2610_v10 = vpop.permute.xlu1 %2609 }
 0x744   : > { %v9920_v63 = vpop.eup %8829  ;;  %v2686_v46 = vpop.permute.xlu0 %2685 }
 0x745   : > { %v2280_v7 = vsel %vm1608_vm6, %v9920_v63, 0.0 }
 0x746   : > { %v9924_v33 = vpop.eup %8831  ;;  %2281 = vadd.xlane.f32.xlu1 %v2280_v7  ;;  %v9954_v4 = vpop.permute.xlu1 %2761 }
 0x747   : > { %v2277_v30 = vsel %vm1608_vm6, %v9924_v33, 0.0 }
 0x748   : > { %v9928_v31 = vpop.eup %8833  ;;  %2278 = vadd.xlane.f32.xlu0 %v2277_v30  ;;  %v2838_v14 = vpop.permute.xlu0 %2837 }
 0x749   : > { %v2286_v26 = vsel %vm1608_vm6, %v9928_v31, 0.0 }
 0x74a   : > { %v9932_v2 = vpop.eup %8835  ;;  %2287 = vadd.xlane.f32.xlu1 %v2286_v26  ;;  %v9956_v9 = vpop.permute.xlu1 %2915 }
 0x74b   : > { %v2283_v0 = vsel %vm1608_vm6, %v9932_v2, 0.0 }
 0x74c   : > { %2284 = vadd.xlane.f32.xlu0 %v2283_v0  ;;  %v9960_v17 = vpop.permute.xlu0 %2993 }
 0x74e   : > { %v9958_v8 = vpop.permute.xlu1 %2913 }
 0x750   : > { %v9964_v22 = vpop.permute.xlu0 %2991 }
 0x752   : > { %v9962_v48 = vpop.permute.xlu1 %3071 }
 0x754   : > { %v9968_v44 = vpop.permute.xlu0 %3149 }
 0x756   : > { %v9966_v13 = vpop.permute.xlu1 %3069 }
 0x75b   : > { %3227 = vrot.lane.b32.xlu1 %v9738_v24, %s9113_s17 }
 0x75f   : > { %3225 = vrot.lane.b32.xlu1 %v9762_v53, %s9113_s17 }
 0x762   : > { %3147 = vrot.lane.b32.xlu0 %v9736_v18, %s9113_s17 }
 0x763   : > { %3383 = vrot.lane.b32.xlu1 %v9759_v60, %s9113_s17 }
 0x766   : > { %3305 = vrot.lane.b32.xlu0 %v9734_v11, %s9113_s17 }
 0x767   : > { %3381 = vrot.lane.b32.xlu1 %v9779_v47, %s9113_s17 }
 0x76a   : > { %3303 = vrot.lane.b32.xlu0 %v9753_v16, %s9113_s17 }
 0x76e   : > { %3461 = vrot.lane.b32.xlu0 %v9748_v41, %s9113_s17 }
 0x772   : > { %3459 = vrot.lane.b32.xlu0 %v9770_v43, %s9113_s17  ;;  %s9035_s17 = scalar_lea.vmem %s10805_s15, 1024 }
 0x773   : > { %p9036_p11 = scmp.ne.s32.totalorder %s10805_s15, %s9035_s17 }
 0x775   : > { %p9037_p9 = pnand %p9036_p11, %p10903_p7 }
 0x777   : > { %p9038_p10 = pneg %p9037_p9 }
 0x7ba   : > { %v2270_v12 = vpop.xlane.xlu1 %2269 }
 0x7bb   : > { %8837 = vrcp.f32 %v2270_v12 }
 0x7bc   : > { %v2267_v27 = vpop.xlane.xlu0 %2266 }
 0x7bd   : > { %8839 = vrcp.f32 %v2267_v27 }
 0x7c8   : > { %v8838_v61 = vpop.eup %8837  ;;  %v2276_v57 = vpop.xlane.xlu1 %2275 }
 0x7c9   : > { %v2298_v59 = vmul.f32 %v8838_v61, %v9900_v32  ;;  %8841 = vrcp.f32 %v2276_v57 }
 0x7ca   : > { %v8840_v42 = vpop.eup %8839  ;;  %v2273_v30 = vpop.xlane.xlu0 %2272 }
 0x7cb   : > { %8302 = vmatmul.mubr.msk.f32.vlgmr.msra.gmra.mxu1 %vm1608_vm6, %v2298_v59  ;;  %v2297_v7 = vmul.f32 %v8840_v42, %v9905_v1  ;;  %8843 = vrcp.f32 %v2273_v30 }
 0x7cc   : > { %8310 = vmatpush3.msra.mxu1 %v2534_v5  ;;  %8311 = vmatprep.mubr.msk.f32.mxu1 %vm9112_vm7, %v10862_v58 }
 0x7cd   : > { %8297 = vmatmul.mubr.msk.f32.vlgmr.msra.gmra.mxu0 %vm1608_vm6, %v2297_v7  ;;  %8319 = vmatprep.subr.mxu1 %v10862_v58 }
 0x7ce   : > { %8305 = vmatpush3.msra.mxu0 %v2458_v52  ;;  %8306 = vmatprep.mubr.msk.f32.mxu0 %vm9112_vm7, %v10862_v58 }
 0x7cf   : > { %v2282_v32 = vpop.xlane.xlu1 %2281  ;;  %8314 = vmatprep.subr.mxu0 %v10862_v58 }
 0x7d0   : > { %8845 = vrcp.f32 %v2282_v32 }
 0x7d1   : > { %v2279_v26 = vpop.xlane.xlu0 %2278 }
 0x7d2   : > { %8847 = vrcp.f32 %v2279_v26 }
 0x7d3   : > { %v2288_v1 = vpop.xlane.xlu1 %2287 }
 0x7d4   : > { %8849 = vrcp.f32 %v2288_v1 }
 0x7d5   : > { %v2285_v0 = vpop.xlane.xlu0 %2284 }
 0x7d6   : > { %8851 = vrcp.f32 %v2285_v0  ;;  %v8842_v5 = vpop.eup %8841 }
 0x7d7   : > { %v2300_v12 = vmul.f32 %v8842_v5, %v9912_v28  ;;  %v3228_v7 = vpop.permute.xlu1 %3227 }
 0x7d8   : > { %v8844_v27 = vpop.eup %8843 }
 0x7d9   : > { %v3148_v61 = vpop.permute.xlu0 %3147  ;;  %8312 = vmatmul.mubr.msk.f32.vlgmr.msra.gmra.mxu1 %vm1608_vm6, %v2300_v12  ;;  %v2299_v52 = vmul.f32 %v8844_v27, %v9916_v55 }
 0x7da   : > { %8320 = vmatpush3.msra.mxu1 %v2686_v46  ;;  %8321 = vmatprep.mubr.msk.f32.mxu1 %vm9112_vm7, %v10862_v58 }
 0x7db   : > { %8307 = vmatmul.mubr.msk.f32.vlgmr.msra.gmra.mxu0 %vm1608_vm6, %v2299_v52  ;;  %8329 = vmatprep.subr.mxu1 %v10862_v58 }
 0x7dc   : > { %8315 = vmatpush3.msra.mxu0 %v2610_v10  ;;  %8316 = vmatprep.mubr.msk.f32.mxu0 %vm9112_vm7, %v10862_v58 }
 0x7dd   : > { %v8846_v59 = vpop.eup %8845  ;;  %8324 = vmatprep.subr.mxu0 %v10862_v58  ;;  %v3306_v57 = vpop.permute.xlu0 %3305 }
 0x7de   : > { %v2302_v42 = vmul.f32 %v8846_v59, %v9920_v63 }
 0x7df   : > { %v8848_v28 = vpop.eup %8847 }
 0x7e0   : > { %8322 = vmatmul.mubr.msk.f32.vlgmr.msra.gmra.mxu1 %vm1608_vm6, %v2302_v42  ;;  %v2301_v55 = vmul.f32 %v8848_v28, %v9924_v33 }
 0x7e1   : > { %v8850_v46 = vpop.eup %8849  ;;  %8330 = vmatpush3.msra.mxu1 %v2838_v14  ;;  %8331 = vmatprep.mubr.msk.f32.mxu1 %vm9112_vm7, %v10862_v58 }
 0x7e2   : > { %8317 = vmatmul.mubr.msk.f32.vlgmr.msra.gmra.mxu0 %vm1608_vm6, %v2301_v55  ;;  %8339 = vmatprep.subr.mxu1 %v10862_v58  ;;  %v2304_v63 = vmul.f32 %v8850_v46, %v9928_v31  ;;  %v3304_v31 = vpop.permute.xlu0 %3303 }
 0x7e3   : > { %v8852_v10 = vpop.eup %8851  ;;  %8325 = vmatpush3.msra.mxu0 %v9954_v4  ;;  %8326 = vmatprep.mubr.msk.f32.mxu0 %vm9112_vm7, %v10862_v58 }
 0x7e4   : > { %8332 = vmatmul.mubr.msk.f32.vlgmr.msra.gmra.mxu1 %vm1608_vm6, %v2304_v63  ;;  %8334 = vmatprep.subr.mxu0 %v10862_v58  ;;  %v2303_v33 = vmul.f32 %v8852_v10, %v9932_v2  ;;  %v3226_v2 = vpop.permute.xlu1 %3225 }
 0x7e5   : > { %8340 = vmatpush3.xpose.msk.msra.mxu1 %vm1608_vm6, %v9960_v17  ;;  %8341 = vmatprep.mubr.msk.f32.mxu1 %vm9112_vm7, %v10862_v58 }
 0x7e6   : > { %8327 = vmatmul.mubr.msk.f32.vlgmr.msra.gmra.mxu0 %vm1608_vm6, %v2303_v33  ;;  %8349 = vmatprep.subr.mxu1 %v10862_v58  ;;  %v3462_v4 = vpop.permute.xlu0 %3461 }
 0x7e7   : > { %8335 = vmatpush3.xpose.msk.msra.mxu0 %vm1608_vm6, %v9956_v9  ;;  %8336 = vmatprep.mubr.msk.f32.mxu0 %vm9112_vm7, %v10862_v58 }
 0x7e8   : > { %8342 = vmatmul.mubr.msk.f32.vlgmr.msra.gmra.mxu1 %vm1608_vm6, %v9964_v22  ;;  %8344 = vmatprep.subr.mxu0 %v10862_v58  ;;  %v3384_v9 = vpop.permute.xlu1 %3383 }
 0x7e9   : > { %8350 = vmatpush3.xpose.msk.msra.mxu1 %vm1608_vm6, %v9968_v44  ;;  %8351 = vmatprep.mubr.msk.f32.mxu1 %vm9112_vm7, %v10862_v58 }
 0x7ea   : > { %8337 = vmatmul.mubr.msk.f32.vlgmr.msra.gmra.mxu0 %vm1608_vm6, %v9958_v8  ;;  %8359 = vmatprep.subr.mxu1 %v10862_v58  ;;  %v3460_v14 = vpop.permute.xlu0 %3459 }
 0x7eb   : > { %8345 = vmatpush3.xpose.msk.msra.mxu0 %vm1608_vm6, %v9962_v48  ;;  %8346 = vmatprep.mubr.msk.f32.mxu0 %vm9112_vm7, %v10862_v58 }
 0x7ec   : > { %8352 = vmatmul.mubr.msk.f32.vlgmr.msra.gmra.mxu1 %vm1608_vm6, %v3148_v61  ;;  %8354 = vmatprep.subr.mxu0 %v10862_v58  ;;  %v3382_v8 = vpop.permute.xlu1 %3381 }
 0x7ed   : > { %8360 = vmatpush3.xpose.msk.msra.mxu1 %vm1608_vm6, %v3306_v57  ;;  %8361 = vmatprep.mubr.msk.f32.mxu1 %vm9112_vm7, %v10862_v58 }
 0x7ee   : > { %8347 = vmatmul.mubr.msk.f32.vlgmr.msra.gmra.mxu0 %vm1608_vm6, %v9966_v13  ;;  %8369 = vmatprep.subr.mxu1 %v10862_v58 }
 0x7ef   : > { %8355 = vmatpush3.xpose.msk.msra.mxu0 %vm1608_vm6, %v3228_v7  ;;  %8356 = vmatprep.mubr.msk.f32.mxu0 %vm9112_vm7, %v10862_v58 }
 0x7f0   : > { %8362 = vmatmul.mubr.msk.f32.vlgmr.msra.gmra.mxu1 %vm1608_vm6, %v3304_v31  ;;  %8364 = vmatprep.subr.mxu0 %v10862_v58 }
 0x7f1   : > { %8370 = vmatpush3.xpose.msk.msra.mxu1 %vm1608_vm6, %v3462_v4  ;;  %8371 = vmatprep.mubr.msk.f32.mxu1 %vm9112_vm7, %v10862_v58 }
 0x7f2   : > { %8357 = vmatmul.mubr.msk.f32.vlgmr.msra.gmra.mxu0 %vm1608_vm6, %v3226_v2  ;;  %8379 = vmatprep.subr.mxu1 %v10862_v58 }
 0x7f3   : > { %8365 = vmatpush3.xpose.msk.msra.mxu0 %vm1608_vm6, %v3384_v9  ;;  %8366 = vmatprep.mubr.msk.f32.mxu0 %vm9112_vm7, %v10862_v58 }
 0x7f4   : > { %8372 = vmatmul.mubr.msk.f32.vlgmr.msra.gmra.mxu1 %vm1608_vm6, %v3460_v14  ;;  %8374 = vmatprep.subr.mxu0 %v10862_v58 }
 0x7f5   : > { %8381 = vmatprep.mubr.msk.f32.mxu1 %vm9112_vm7, %v10862_v58 }
 0x7f6   : > { %8367 = vmatmul.mubr.msk.f32.vlgmr.msra.gmra.mxu0 %vm1608_vm6, %v3382_v8 }
 0x7f7   : > { %8376 = vmatprep.mubr.msk.f32.mxu0 %vm9112_vm7, %v10862_v58 }
 0x88b   : > { %v10056_v17 = vpop.f32.mrf.mxu1 }
 0x88d   : > { %v10058_v48 = vpop.f32.mrf.mxu0  ;;  %v8303_v22 = vpop.f32.mrf.mxu1 }
 0x88f   : > { %v8298_v13 = vpop.f32.mrf.mxu0 }
 0x899   : > { %v10060_v44 = vpop.f32.mrf.mxu1 }
 0x89b   : > { %v10062_v30 = vpop.f32.mrf.mxu0  ;;  %v8313_v32 = vpop.f32.mrf.mxu1 }
 0x89d   : > { %v8308_v26 = vpop.f32.mrf.mxu0 }
 0x8a0   : > { %v10064_v1 = vpop.f32.mrf.mxu1 }
 0x8a2   : > { %v10066_v0 = vpop.f32.mrf.mxu0  ;;  %v8323_v5 = vpop.f32.mrf.mxu1 }
 0x8a4   : > { %v8318_v12 = vpop.f32.mrf.mxu0  ;;  %v10068_v27 = vpop.f32.mrf.mxu1 }
 0x8a6   : > { %v10070_v61 = vpop.f32.mrf.mxu0  ;;  %v8333_v52 = vpop.f32.mrf.mxu1 }
 0x8a7   : > { %10892 = vst [vmem:[#allocation19_spill] sm:$0xff] %v10070_v61 }
 0x8a8   : > { %v8328_v59 = vpop.f32.mrf.mxu0  ;;  %v3065_v42 = vpop.f32.mrf.mxu1 }
 0x8a9   : > { %v3066_v28 = vadd.f32 %v3065_v42, %v9801_v38 }
 0x8aa   : > { %v2987_v55 = vpop.f32.mrf.mxu0  ;;  %v8343_v46 = vpop.f32.mrf.mxu1 }
 0x8ab   : > { %v2988_v57 = vadd.f32 %v2987_v55, %v9804_v20  ;;  %v3540_v63 = vsel %vm1608_vm6, %v3066_v28, -inf }
 0x8ac   : > { %3541 = vmax.xlane.f32.xlu0 %v3540_v63  ;;  %v8338_v10 = vpop.f32.mrf.mxu0  ;;  %v3221_v7 = vpop.f32.mrf.mxu1 }
 0x8ad   : > { %v3222_v33 = vadd.f32 %v3221_v7, %v9823_v25  ;;  %v3537_v31 = vsel %vm1608_vm6, %v2988_v57, -inf }
 0x8ae   : > { %v8353_v2 = vpop.f32.mrf.mxu1  ;;  %3538 = vmax.xlane.f32.xlu1 %v3537_v31  ;;  %v3143_v4 = vpop.f32.mrf.mxu0 }
 0x8af   : > { %v3144_v9 = vadd.f32 %v3143_v4, %v9827_v34  ;;  %v3546_v13 = vsel %vm1608_vm6, %v3222_v33, -inf }
 0x8b0   : > { %v8348_v14 = vpop.f32.mrf.mxu0  ;;  %v3377_v8 = vpop.f32.mrf.mxu1 }
 0x8b1   : > { %v3378_v22 = vadd.f32 %v3377_v8, %v9836_v35  ;;  %v3543_v32 = vsel %vm1608_vm6, %v3144_v9, -inf }
 0x8b2   : > { %v8363_v26 = vpop.f32.mrf.mxu1  ;;  %3547 = vmax.xlane.f32.xlu1 %v3546_v13  ;;  %3544 = vmax.xlane.f32.xlu0 %v3543_v32  ;;  %v3299_v5 = vpop.f32.mrf.mxu0 }
 0x8b3   : > { %v3300_v12 = vadd.f32 %v3299_v5, %v9845_v36  ;;  %v3552_v55 = vsel %vm1608_vm6, %v3378_v22, -inf }
 0x8b4   : > { %v8358_v52 = vpop.f32.mrf.mxu0  ;;  %v3533_v59 = vpop.f32.mrf.mxu1 }
 0x8b5   : > { %v3534_v42 = vadd.f32 %v3533_v59, %v9854_v50  ;;  %v3549_v46 = vsel %vm1608_vm6, %v3300_v12, -inf }
 0x8b6   : > { %v8373_v63 = vpop.f32.mrf.mxu1  ;;  %3553 = vmax.xlane.f32.xlu1 %v3552_v55  ;;  %3550 = vmax.xlane.f32.xlu0 %v3549_v46  ;;  %v3455_v10 = vpop.f32.mrf.mxu0 }
 0x8b7   : > { %v3456_v7 = vadd.f32 %v3455_v10, %v9860_v19  ;;  %v3558_v2 = vsel %vm1608_vm6, %v3534_v42, -inf }
 0x8b8   : > { %v8368_v31 = vpop.f32.mrf.mxu0 }
 0x8b9   : > { %v3555_v4 = vsel %vm1608_vm6, %v3456_v7, -inf }
 0x8ba   : > { %3559 = vmax.xlane.f32.xlu1 %v3558_v2  ;;  %3556 = vmax.xlane.f32.xlu0 %v3555_v4 }
 0x8cb   : > { %3701 = vrot.lane.b32.xlu1 %v9698_v39, %s9114_s7 }
 0x8cf   : > { %3777 = vrot.lane.b32.xlu1 %v9716_v3, %s9114_s7 }
 0x8d0   : > { %3625 = vrot.lane.b32.xlu0 %v9700_v45, %s9114_s7 }
 0x8d3   : > { %3929 = vrot.lane.b32.xlu1 %v9738_v24, %s9114_s7 }
 0x8d4   : > { %3853 = vrot.lane.b32.xlu0 %v9712_v62, %s9114_s7 }
 0x8d7   : > { %4081 = vrot.lane.b32.xlu1 %v9759_v60, %s9114_s7 }
 0x8d8   : > { %4005 = vrot.lane.b32.xlu0 %v9734_v11, %s9114_s7 }
 0x8db   : > { %4235 = vrot.lane.b32.xlu1 %v9700_v45, %s9115_s26 }
 0x8dc   : > { %4157 = vrot.lane.b32.xlu0 %v9748_v41, %s9114_s7  ;;  %s9122_s7 = smov [#allocation7]  }
 0x8df   : > { %4233 = vrot.lane.b32.xlu1 %v9718_v6, %s9115_s26 }
 0x8e0   : > { %4313 = vrot.lane.b32.xlu0 %v9698_v39, %s9115_s26 }
 0x8e3   : > { %4391 = vrot.lane.b32.xlu1 %v9716_v3, %s9115_s26 }
 0x8e4   : > { %4311 = vrot.lane.b32.xlu0 %v9714_v49, %s9115_s26 }
 0x8e7   : > { %4389 = vrot.lane.b32.xlu1 %v9740_v40, %s9115_s26 }
 0x8e8   : > { %4469 = vrot.lane.b32.xlu0 %v9712_v62, %s9115_s26 }
 0x935   : > { %v3542_v14 = vpop.xlane.xlu0 %3541 }
 0x936   : > { %v3562_v8 = vsub.f32 %v3066_v28, %v3542_v14 }
 0x937   : > { %v3539_v13 = vpop.xlane.xlu1 %3538 }
 0x938   : > { %v3571_v32 = vmul.f32 1.442695, %v3562_v8  ;;  %v3561_v26 = vsub.f32 %v2988_v57, %v3539_v13 }
 0x93a   : > { %8853 = vpow2.f32 %v3571_v32  ;;  %v3569_v5 = vmul.f32 1.442695, %v3561_v26 }
 0x93b   : > { %v3548_v52 = vpop.xlane.xlu1 %3547  ;;  %v3545_v59 = vpop.xlane.xlu0 %3544 }
 0x93c   : > { %8855 = vpow2.f32 %v3569_v5  ;;  %v3564_v55 = vsub.f32 %v3222_v33, %v3548_v52  ;;  %v3563_v46 = vsub.f32 %v3144_v9, %v3545_v59 }
 0x93e   : > { %v3575_v63 = vmul.f32 1.442695, %v3564_v55  ;;  %v3573_v10 = vmul.f32 1.442695, %v3563_v46 }
 0x93f   : > { %v3554_v31 = vpop.xlane.xlu1 %3553  ;;  %v3551_v2 = vpop.xlane.xlu0 %3550 }
 0x940   : > { %8857 = vpow2.f32 %v3575_v63  ;;  %v3566_v4 = vsub.f32 %v3378_v22, %v3554_v31  ;;  %v3565_v58 = vsub.f32 %v3300_v12, %v3551_v2 }
 0x941   : > { %8859 = vpow2.f32 %v3573_v10 }
 0x942   : > { %v3579_v56 = vmul.f32 1.442695, %v3566_v4  ;;  %v3577_v28 = vmul.f32 1.442695, %v3565_v58 }
 0x943   : > { %v3560_v14 = vpop.xlane.xlu1 %3559  ;;  %v3557_v8 = vpop.xlane.xlu0 %3556 }
 0x944   : > { %8861 = vpow2.f32 %v3579_v56  ;;  %v3568_v57 = vsub.f32 %v3534_v42, %v3560_v14  ;;  %v3567_v13 = vsub.f32 %v3456_v7, %v3557_v8  ;;  %v10893_v56 = vmov 0.0  }
 0x945   : > { %8863 = vpow2.f32 %v3577_v28 }
 0x946   : > { %v3583_v32 = vmul.f32 1.442695, %v3568_v57  ;;  %v3581_v26 = vmul.f32 1.442695, %v3567_v13 }
 0x947   : > { %v10110_v33 = vpop.eup %8853  ;;  %v3702_v9 = vpop.permute.xlu1 %3701 }
 0x948   : > { %v3626_v5 = vpop.permute.xlu0 %3625  ;;  %8865 = vpow2.f32 %v3583_v32  ;;  %8380 = vmatpush3.msra.mxu1 %v3702_v9  ;;  %v3588_v22 = vsel %vm1608_vm6, %v10110_v33, 0.0 }
 0x949   : > { %8375 = vmatpush3.msra.mxu0 %v3626_v5  ;;  %v10114_v12 = vpop.eup %8855  ;;  %8867 = vpow2.f32 %v3581_v26  ;;  %3589 = vadd.xlane.f32.xlu1 %v3588_v22 }
 0x94a   : > { %8389 = vmatprep.subr.mxu1 %v10893_v56  ;;  %v3585_v58 = vsel %vm1608_vm6, %v10114_v12, 0.0  ;;  %8384 = vmatprep.subr.mxu0 %v10893_v56 }
 0x94b   : > { %3586 = vadd.xlane.f32.xlu0 %v3585_v58  ;;  %v3778_v14 = vpop.permute.xlu1 %3777 }
 0x94c   : > { %v3854_v57 = vpop.permute.xlu0 %3853 }
 0x94d   : > { %v10120_v42 = vpop.eup %8857 }
 0x94e   : > { %v10122_v7 = vpop.eup %8859  ;;  %v3594_v52 = vsel %vm1608_vm6, %v10120_v42, 0.0 }
 0x94f   : > { %3595 = vadd.xlane.f32.xlu1 %v3594_v52  ;;  %v3591_v59 = vsel %vm1608_vm6, %v10122_v7, 0.0  ;;  %v3930_v8 = vpop.permute.xlu1 %3929 }
 0x950   : > { %3592 = vadd.xlane.f32.xlu0 %v3591_v59  ;;  %v4006_v32 = vpop.permute.xlu0 %4005 }
 0x951   : > { %v10128_v55 = vpop.eup %8861 }
 0x952   : > { %v10130_v46 = vpop.eup %8863  ;;  %v3600_v63 = vsel %vm1608_vm6, %v10128_v55, 0.0 }
 0x953   : > { %3601 = vadd.xlane.f32.xlu1 %v3600_v63  ;;  %v3597_v10 = vsel %vm1608_vm6, %v10130_v46, 0.0  ;;  %v4082_v13 = vpop.permute.xlu1 %4081 }
 0x954   : > { %3598 = vadd.xlane.f32.xlu0 %v3597_v10  ;;  %v4158_v9 = vpop.permute.xlu0 %4157 }
 0x955   : > { %v10136_v31 = vpop.eup %8865 }
 0x956   : > { %v10138_v2 = vpop.eup %8867  ;;  %v3606_v4 = vsel %vm1608_vm6, %v10136_v31, 0.0 }
 0x957   : > { %3607 = vadd.xlane.f32.xlu1 %v3606_v4  ;;  %v3603_v28 = vsel %vm1608_vm6, %v10138_v2, 0.0  ;;  %v10162_v26 = vpop.permute.xlu1 %4235 }
 0x958   : > { %3604 = vadd.xlane.f32.xlu0 %v3603_v28  ;;  %v10166_v22 = vpop.permute.xlu0 %4313 }
 0x95b   : > { %v10164_v5 = vpop.permute.xlu1 %4233 }
 0x95c   : > { %v10170_v52 = vpop.permute.xlu0 %4311 }
 0x95f   : > { %v10168_v58 = vpop.permute.xlu1 %4391 }
 0x960   : > { %v10174_v63 = vpop.permute.xlu0 %4469 }
 0x963   : > { %v10172_v59 = vpop.permute.xlu1 %4389 }
 0x968   : > { %4547 = vrot.lane.b32.xlu1 %v9738_v24, %s9115_s26 }
 0x96c   : > { %4545 = vrot.lane.b32.xlu1 %v9762_v53, %s9115_s26 }
 0x96e   : > { %4467 = vrot.lane.b32.xlu0 %v9736_v18, %s9115_s26 }
 0x970   : > { %4703 = vrot.lane.b32.xlu1 %v9759_v60, %s9115_s26 }
 0x972   : > { %4625 = vrot.lane.b32.xlu0 %v9734_v11, %s9115_s26 }
 0x974   : > { %4701 = vrot.lane.b32.xlu1 %v9779_v47, %s9115_s26 }
 0x976   : > { %4623 = vrot.lane.b32.xlu0 %v9753_v16, %s9115_s26 }
 0x97a   : > { %4781 = vrot.lane.b32.xlu0 %v9748_v41, %s9115_s26 }
 0x97e   : > { %4779 = vrot.lane.b32.xlu0 %v9770_v43, %s9115_s26  ;;  %s9039_s26 = sshll.u32 %s9122_s7, 4  ;;  %s9040_s26 = int_to_ptr.vmem [resolvable:$false] %s9039_s26 }
 0x97f   : > { %p9042_p12 = scmp.lt.s32.totalorder %s10805_s15, %s9040_s26 }
 0x9d2   : > { %v3590_v10 = vpop.xlane.xlu1 %3589 }
 0x9d3   : > { %8869 = vrcp.f32 %v3590_v10 }
 0x9d4   : > { %v3587_v4 = vpop.xlane.xlu0 %3586 }
 0x9d5   : > { %8871 = vrcp.f32 %v3587_v4 }
 0x9d8   : > { %v3596_v28 = vpop.xlane.xlu1 %3595 }
 0x9d9   : > { %8873 = vrcp.f32 %v3596_v28  ;;  %v3593_v54 = vpop.xlane.xlu0 %3592 }
 0x9da   : > { %8875 = vrcp.f32 %v3593_v54 }
 0x9dc   : > { %v3602_v29 = vpop.xlane.xlu1 %3601 }
 0x9dd   : > { %8877 = vrcp.f32 %v3602_v29  ;;  %v3599_v51 = vpop.xlane.xlu0 %3598 }
 0x9de   : > { %8879 = vrcp.f32 %v3599_v51 }
 0x9e0   : > { %v8870_v21 = vpop.eup %8869  ;;  %v3608_v23 = vpop.xlane.xlu1 %3607 }
 0x9e1   : > { %8881 = vrcp.f32 %v3608_v23  ;;  %v3605_v15 = vpop.xlane.xlu0 %3604  ;;  %v3618_v37 = vmul.f32 %v8870_v21, %v10110_v33 }
 0x9e2   : > { %v8872_v61 = vpop.eup %8871  ;;  %8883 = vrcp.f32 %v3605_v15 }
 0x9e3   : > { %8382 = vmatmul.mubr.msk.f32.vlgmr.msra.gmra.mxu1 %vm1608_vm6, %v3618_v37  ;;  %v3617_v10 = vmul.f32 %v8872_v61, %v10114_v12 }
 0x9e4   : > { %8390 = vmatpush3.msra.mxu1 %v3854_v57  ;;  %8391 = vmatprep.mubr.msk.f32.mxu1 %vm9112_vm7, %v10893_v56 }
 0x9e5   : > { %8377 = vmatmul.mubr.msk.f32.vlgmr.msra.gmra.mxu0 %vm1608_vm6, %v3617_v10  ;;  %8399 = vmatprep.subr.mxu1 %v10893_v56  ;;  %v4468_v15 = vpop.permute.xlu0 %4467 }
 0x9e6   : > { %v8874_v51 = vpop.eup %8873  ;;  %8385 = vmatpush3.msra.mxu0 %v3778_v14  ;;  %8386 = vmatprep.mubr.msk.f32.mxu0 %vm9112_vm7, %v10893_v56  ;;  %v4548_v14 = vpop.permute.xlu1 %4547 }
 0x9e7   : > { %v8876_v23 = vpop.eup %8875  ;;  %8394 = vmatprep.subr.mxu0 %v10893_v56  ;;  %v3620_v37 = vmul.f32 %v8874_v51, %v10120_v42 }
 0x9e8   : > { %v3619_v21 = vmul.f32 %v8876_v23, %v10122_v7 }
 0x9e9   : > { %8392 = vmatmul.mubr.msk.f32.vlgmr.msra.gmra.mxu1 %vm1608_vm6, %v3620_v37  ;;  %v4626_v42 = vpop.permute.xlu0 %4625 }
 0x9ea   : > { %v8878_v29 = vpop.eup %8877  ;;  %8387 = vmatmul.mubr.msk.f32.vlgmr.msra.gmra.mxu0 %vm1608_vm6, %v3619_v21  ;;  %8400 = vmatpush3.msra.mxu1 %v4006_v32 }
 0x9eb   : > { %v8880_v54 = vpop.eup %8879  ;;  %8395 = vmatpush3.msra.mxu0 %v3930_v8  ;;  %8396 = vmatprep.mubr.msk.f32.mxu0 %vm9112_vm7, %v10893_v56  ;;  %v3622_v61 = vmul.f32 %v8878_v29, %v10128_v55 }
 0x9ec   : > { %8401 = vmatprep.mubr.msk.f32.mxu1 %vm9112_vm7, %v10893_v56  ;;  %8404 = vmatprep.subr.mxu0 %v10893_v56  ;;  %v3621_v33 = vmul.f32 %v8880_v54, %v10130_v46 }
 0x9ed   : > { %8409 = vmatprep.subr.mxu1 %v10893_v56  ;;  %8402 = vmatmul.mubr.msk.f32.vlgmr.msra.gmra.mxu1 %vm1608_vm6, %v3622_v61 }
 0x9ee   : > { %v8882_v12 = vpop.eup %8881  ;;  %8397 = vmatmul.mubr.msk.f32.vlgmr.msra.gmra.mxu0 %vm1608_vm6, %v3621_v33  ;;  %8410 = vmatpush3.msra.mxu1 %v4158_v9 }
 0x9ef   : > { %v8884_v7 = vpop.eup %8883  ;;  %8405 = vmatpush3.msra.mxu0 %v4082_v13  ;;  %8406 = vmatprep.mubr.msk.f32.mxu0 %vm9112_vm7, %v10893_v56  ;;  %v3624_v55 = vmul.f32 %v8882_v12, %v10136_v31  ;;  %v4624_v31 = vpop.permute.xlu0 %4623 }
 0x9f0   : > { %8411 = vmatprep.mubr.msk.f32.mxu1 %vm9112_vm7, %v10893_v56  ;;  %8414 = vmatprep.subr.mxu0 %v10893_v56  ;;  %v3623_v46 = vmul.f32 %v8884_v7, %v10138_v2  ;;  %v4546_v2 = vpop.permute.xlu1 %4545 }
 0x9f1   : > { %8419 = vmatprep.subr.mxu1 %v10893_v56  ;;  %8412 = vmatmul.mubr.msk.f32.vlgmr.msra.gmra.mxu1 %vm1608_vm6, %v3624_v55 }
 0x9f2   : > { %8407 = vmatmul.mubr.msk.f32.vlgmr.msra.gmra.mxu0 %vm1608_vm6, %v3623_v46  ;;  %8420 = vmatpush3.xpose.msk.msra.mxu1 %vm1608_vm6, %v10166_v22 }
 0x9f3   : > { %8415 = vmatpush3.xpose.msk.msra.mxu0 %vm1608_vm6, %v10162_v26  ;;  %8416 = vmatprep.mubr.msk.f32.mxu0 %vm9112_vm7, %v10893_v56  ;;  %v4782_v8 = vpop.permute.xlu0 %4781 }
 0x9f4   : > { %8421 = vmatprep.mubr.msk.f32.mxu1 %vm9112_vm7, %v10893_v56  ;;  %8424 = vmatprep.subr.mxu0 %v10893_v56  ;;  %v4704_v57 = vpop.permute.xlu1 %4703 }
 0x9f5   : > { %8429 = vmatprep.subr.mxu1 %v10893_v56  ;;  %8422 = vmatmul.mubr.msk.f32.vlgmr.msra.gmra.mxu1 %vm1608_vm6, %v10170_v52 }
 0x9f6   : > { %8417 = vmatmul.mubr.msk.f32.vlgmr.msra.gmra.mxu0 %vm1608_vm6, %v10164_v5  ;;  %8430 = vmatpush3.xpose.msk.msra.mxu1 %vm1608_vm6, %v10174_v63 }
 0x9f7   : > { %8425 = vmatpush3.xpose.msk.msra.mxu0 %vm1608_vm6, %v10168_v58  ;;  %8426 = vmatprep.mubr.msk.f32.mxu0 %vm9112_vm7, %v10893_v56  ;;  %v4780_v13 = vpop.permute.xlu0 %4779 }
 0x9f8   : > { %8431 = vmatprep.mubr.msk.f32.mxu1 %vm9112_vm7, %v10893_v56  ;;  %8434 = vmatprep.subr.mxu0 %v10893_v56  ;;  %v4702_v32 = vpop.permute.xlu1 %4701 }
 0x9f9   : > { %8439 = vmatprep.subr.mxu1 %v10893_v56  ;;  %8432 = vmatmul.mubr.msk.f32.vlgmr.msra.gmra.mxu1 %vm1608_vm6, %v4468_v15 }
 0x9fa   : > { %8427 = vmatmul.mubr.msk.f32.vlgmr.msra.gmra.mxu0 %vm1608_vm6, %v10172_v59  ;;  %8440 = vmatpush3.xpose.msk.msra.mxu1 %vm1608_vm6, %v4626_v42 }
 0x9fb   : > { %8435 = vmatpush3.xpose.msk.msra.mxu0 %vm1608_vm6, %v4548_v14  ;;  %8436 = vmatprep.mubr.msk.f32.mxu0 %vm9112_vm7, %v10893_v56 }
 0x9fc   : > { %8441 = vmatprep.mubr.msk.f32.mxu1 %vm9112_vm7, %v10893_v56  ;;  %8444 = vmatprep.subr.mxu0 %v10893_v56 }
 0x9fd   : > { %8449 = vmatprep.subr.mxu1 %v10893_v56  ;;  %8442 = vmatmul.mubr.msk.f32.vlgmr.msra.gmra.mxu1 %vm1608_vm6, %v4624_v31 }
 0x9fe   : > { %8437 = vmatmul.mubr.msk.f32.vlgmr.msra.gmra.mxu0 %vm1608_vm6, %v4546_v2  ;;  %8450 = vmatpush3.xpose.msk.msra.mxu1 %vm1608_vm6, %v4782_v8 }
 0x9ff   : > { %8445 = vmatpush3.xpose.msk.msra.mxu0 %vm1608_vm6, %v4704_v57  ;;  %8446 = vmatprep.mubr.msk.f32.mxu0 %vm9112_vm7, %v10893_v56 }
 0xa00   : > { %8451 = vmatprep.mubr.msk.f32.mxu1 %vm9112_vm7, %v10893_v56  ;;  %8454 = vmatprep.subr.mxu0 %v10893_v56 }
 0xa01   : > { %8452 = vmatmul.mubr.msk.f32.vlgmr.msra.gmra.mxu1 %vm1608_vm6, %v4780_v13  ;;  %8459 = vmatprep.subr.mxu1 %v10893_v56 }
 0xa02   : > { %8447 = vmatmul.mubr.msk.f32.vlgmr.msra.gmra.mxu0 %vm1608_vm6, %v4702_v32  ;;  %8461 = vmatprep.mubr.msk.f32.mxu1 %vm9112_vm7, %v10893_v56 }
 0xa03   : > { %8456 = vmatprep.mubr.msk.f32.mxu0 %vm9112_vm7, %v10893_v56 }
 0xaa3   : > { %v10261_v26 = vpop.f32.mrf.mxu1 }
 0xaa5   : > { %v10263_v9 = vpop.f32.mrf.mxu0  ;;  %v8383_v5 = vpop.f32.mrf.mxu1 }
 0xaa7   : > { %v8378_v22 = vpop.f32.mrf.mxu0 }
 0xaa9   : > { %v10265_v58 = vpop.f32.mrf.mxu1 }
 0xaaa   : > { %v10267_v52 = vpop.f32.mrf.mxu0 }
 0xaab   : > { %v8393_v59 = vpop.f32.mrf.mxu1 }
 0xaac   : > { %v8388_v63 = vpop.f32.mrf.mxu0 }
 0xaad   : > { %v10269_v4 = vpop.f32.mrf.mxu1 }
 0xaae   : > { %v10271_v28 = vpop.f32.mrf.mxu0 }
 0xaaf   : > { %v8403_v10 = vpop.f32.mrf.mxu1 }
 0xab0   : > { %v8398_v51 = vpop.f32.mrf.mxu0 }
 0xab1   : > { %v10273_v23 = vpop.f32.mrf.mxu1 }
 0xab2   : > { %v10275_v37 = vpop.f32.mrf.mxu0 }
 0xab3   : > { %v8413_v15 = vpop.f32.mrf.mxu1 }
 0xab4   : > { %v8408_v21 = vpop.f32.mrf.mxu0 }
 0xab5   : > { %v4385_v29 = vpop.f32.mrf.mxu1 }
 0xab6   : > { %v4307_v54 = vpop.f32.mrf.mxu0  ;;  %v4386_v61 = vadd.f32 %v4385_v29, %v9801_v38 }
 0xab7   : > { %v4308_v33 = vadd.f32 %v4307_v54, %v9804_v20  ;;  %v8423_v12 = vpop.f32.mrf.mxu1 }
 0xab8   : > { %v8418_v42 = vpop.f32.mrf.mxu0  ;;  %v4860_v7 = vsel %vm1608_vm6, %v4386_v61, -inf }
 0xab9   : > { %4861 = vmax.xlane.f32.xlu0 %v4860_v7  ;;  %v4541_v14 = vpop.f32.mrf.mxu1  ;;  %v4857_v55 = vsel %vm1608_vm6, %v4308_v33, -inf }
 0xaba   : > { %v4542_v46 = vadd.f32 %v4541_v14, %v9823_v25  ;;  %4858 = vmax.xlane.f32.xlu1 %v4857_v55  ;;  %v4463_v31 = vpop.f32.mrf.mxu0 }
 0xabb   : > { %v4464_v2 = vadd.f32 %v4463_v31, %v9827_v34  ;;  %v8433_v8 = vpop.f32.mrf.mxu1 }
 0xabc   : > { %v8428_v57 = vpop.f32.mrf.mxu0  ;;  %v4866_v13 = vsel %vm1608_vm6, %v4542_v46, -inf }
 0xabd   : > { %v4697_v32 = vpop.f32.mrf.mxu1  ;;  %v4863_v5 = vsel %vm1608_vm6, %v4464_v2, -inf }
 0xabe   : > { %v4698_v22 = vadd.f32 %v4697_v32, %v9836_v35  ;;  %4867 = vmax.xlane.f32.xlu1 %v4866_v13  ;;  %4864 = vmax.xlane.f32.xlu0 %v4863_v5  ;;  %v4619_v59 = vpop.f32.mrf.mxu0 }
 0xabf   : > { %v4620_v63 = vadd.f32 %v4619_v59, %v9845_v36  ;;  %v8443_v10 = vpop.f32.mrf.mxu1 }
 0xac0   : > { %v8438_v51 = vpop.f32.mrf.mxu0  ;;  %v4872_v15 = vsel %vm1608_vm6, %v4698_v22, -inf }
 0xac1   : > { %v4853_v21 = vpop.f32.mrf.mxu1  ;;  %v4869_v29 = vsel %vm1608_vm6, %v4620_v63, -inf }
 0xac2   : > { %v4854_v54 = vadd.f32 %v4853_v21, %v9854_v50  ;;  %4873 = vmax.xlane.f32.xlu1 %v4872_v15  ;;  %4870 = vmax.xlane.f32.xlu0 %v4869_v29  ;;  %v4775_v12 = vpop.f32.mrf.mxu0 }
 0xac3   : > { %v4776_v42 = vadd.f32 %v4775_v12, %v9860_v19  ;;  %v8453_v7 = vpop.f32.mrf.mxu1 }
 0xac4   : > { %v8448_v14 = vpop.f32.mrf.mxu0  ;;  %v4878_v55 = vsel %vm1608_vm6, %v4854_v54, -inf }
 0xac5   : > { %v4875_v31 = vsel %vm1608_vm6, %v4776_v42, -inf }
 0xac6   : > { %4879 = vmax.xlane.f32.xlu1 %v4878_v55  ;;  %4876 = vmax.xlane.f32.xlu0 %v4875_v31 }
 0xad7   : > { %5021 = vrot.lane.b32.xlu1 %v9698_v39, %s9116_s10 }
 0xadb   : > { %5097 = vrot.lane.b32.xlu1 %v9716_v3, %s9116_s10 }
 0xadc   : > { %4945 = vrot.lane.b32.xlu0 %v9700_v45, %s9116_s10 }
 0xadf   : > { %5249 = vrot.lane.b32.xlu1 %v9738_v24, %s9116_s10 }
 0xae0   : > { %5173 = vrot.lane.b32.xlu0 %v9712_v62, %s9116_s10 }
 0xae3   : > { %5401 = vrot.lane.b32.xlu1 %v9759_v60, %s9116_s10 }
 0xae4   : > { %5325 = vrot.lane.b32.xlu0 %v9734_v11, %s9116_s10 }
 0xae7   : > { %5555 = vrot.lane.b32.xlu1 %v9700_v45, %s9117_s29 }
 0xae8   : > { %5477 = vrot.lane.b32.xlu0 %v9748_v41, %s9116_s10  ;;  %s9041_s10 = scalar_lea.vmem %s9040_s26, 2048 }
 0xae9   : > { %p9043_p13 = scmp.lt.s32.totalorder %s9041_s10, %s9035_s17 }
 0xaeb   : > { %5553 = vrot.lane.b32.xlu1 %v9718_v6, %s9117_s29  ;;  %p9044_p0 = por %p9043_p13, %p9042_p12 }
 0xaec   : > { %5633 = vrot.lane.b32.xlu0 %v9698_v39, %s9117_s29 }
 0xaed   : > { %p9045_p5 = pnand %p9044_p0, %p9038_p10 }
 0xaef   : > { %5711 = vrot.lane.b32.xlu1 %v9716_v3, %s9117_s29 }
 0xaf0   : > { %5631 = vrot.lane.b32.xlu0 %v9714_v49, %s9117_s29 }
 0xaf3   : > { %5709 = vrot.lane.b32.xlu1 %v9740_v40, %s9117_s29 }
 0xaf4   : > { %5789 = vrot.lane.b32.xlu0 %v9712_v62, %s9117_s29 }
 0xb42   : > { %v4862_v8 = vpop.xlane.xlu0 %4861 }
 0xb43   : > { %v4882_v57 = vsub.f32 %v4386_v61, %v4862_v8  ;;  %v4859_v13 = vpop.xlane.xlu1 %4858 }
 0xb44   : > { %v4881_v32 = vsub.f32 %v4308_v33, %v4859_v13 }
 0xb45   : > { %v4891_v6 = vmul.f32 1.442695, %v4882_v57 }
 0xb46   : > { %v4889_v5 = vmul.f32 1.442695, %v4881_v32 }
 0xb47   : > { %8885 = vpow2.f32 %v4891_v6  ;;  %v4868_v59 = vpop.xlane.xlu1 %4867  ;;  %v4865_v10 = vpop.xlane.xlu0 %4864 }
 0xb48   : > { %8887 = vpow2.f32 %v4889_v5  ;;  %v4884_v51 = vsub.f32 %v4542_v46, %v4868_v59  ;;  %v4883_v15 = vsub.f32 %v4464_v2, %v4865_v10 }
 0xb4a   : > { %v4895_v21 = vmul.f32 1.442695, %v4884_v51  ;;  %v4893_v49 = vmul.f32 1.442695, %v4883_v15 }
 0xb4b   : > { %v4874_v29 = vpop.xlane.xlu1 %4873  ;;  %v4871_v12 = vpop.xlane.xlu0 %4870 }
 0xb4c   : > { %8889 = vpow2.f32 %v4895_v21  ;;  %v4886_v40 = vsub.f32 %v4698_v22, %v4874_v29  ;;  %v4885_v7 = vsub.f32 %v4620_v63, %v4871_v12 }
 0xb4d   : > { %8891 = vpow2.f32 %v4893_v49 }
 0xb4e   : > { %v4899_v14 = vmul.f32 1.442695, %v4886_v40  ;;  %v4897_v61 = vmul.f32 1.442695, %v4885_v7 }
 0xb4f   : > { %v4880_v55 = vpop.xlane.xlu1 %4879  ;;  %v4877_v33 = vpop.xlane.xlu0 %4876 }
 0xb50   : > { %8893 = vpow2.f32 %v4899_v14  ;;  %v4888_v31 = vsub.f32 %v4854_v54, %v4880_v55  ;;  %v4887_v8 = vsub.f32 %v4776_v42, %v4877_v33 }
 0xb51   : > { %8895 = vpow2.f32 %v4897_v61 }
 0xb52   : > { %v4903_v57 = vmul.f32 1.442695, %v4888_v31  ;;  %v4901_v13 = vmul.f32 1.442695, %v4887_v8 }
 0xb53   : > { %v5022_v46 = vpop.permute.xlu1 %5021  ;;  %v4946_v2 = vpop.permute.xlu0 %4945 }
 0xb54   : > { %v10315_v32 = vpop.eup %8885  ;;  %8897 = vpow2.f32 %v4903_v57  ;;  %8455 = vmatpush3.msra.mxu0 %v4946_v2  ;;  %8460 = vmatpush3.msra.mxu1 %v5022_v46 }
 0xb55   : > { %v10317_v22 = vpop.eup %8887  ;;  %8899 = vpow2.f32 %v4901_v13  ;;  %v4908_v63 = vsel %vm1608_vm6, %v10315_v32, 0.0  ;;  %8469 = vmatprep.subr.mxu1 %v10893_v56  ;;  %8464 = vmatprep.subr.mxu0 %v10893_v56 }
 0xb56   : > { %4909 = vadd.xlane.f32.xlu1 %v4908_v63  ;;  %v4905_v54 = vsel %vm1608_vm6, %v10317_v22, 0.0 }
 0xb57   : > { %4906 = vadd.xlane.f32.xlu0 %v4905_v54  ;;  %v5174_v7 = vpop.permute.xlu0 %5173 }
 0xb59   : > { %v10325_v42 = vpop.eup %8889 }
 0xb5a   : > { %v10327_v6 = vpop.eup %8891  ;;  %v4914_v5 = vsel %vm1608_vm6, %v10325_v42, 0.0 }
 0xb5b   : > { %4915 = vadd.xlane.f32.xlu1 %v4914_v5  ;;  %v4911_v59 = vsel %vm1608_vm6, %v10327_v6, 0.0  ;;  %v5326_v61 = vpop.permute.xlu0 %5325 }
 0xb5c   : > { %4912 = vadd.xlane.f32.xlu0 %v4911_v59 }
 0xb5d   : > { %v10333_v10 = vpop.eup %8893 }
 0xb5e   : > { %v10335_v51 = vpop.eup %8895  ;;  %v4920_v15 = vsel %vm1608_vm6, %v10333_v10, 0.0 }
 0xb5f   : > { %4921 = vadd.xlane.f32.xlu1 %v4920_v15  ;;  %v4917_v21 = vsel %vm1608_vm6, %v10335_v51, 0.0  ;;  %v5478_v33 = vpop.permute.xlu0 %5477 }
 0xb60   : > { %4918 = vadd.xlane.f32.xlu0 %v4917_v21 }
 0xb61   : > { %v10341_v49 = vpop.eup %8897 }
 0xb62   : > { %v10343_v29 = vpop.eup %8899  ;;  %v4926_v12 = vsel %vm1608_vm6, %v10341_v49, 0.0 }
 0xb63   : > { %4927 = vadd.xlane.f32.xlu1 %v4926_v12  ;;  %v4923_v40 = vsel %vm1608_vm6, %v10343_v29, 0.0 }
 0xb64   : > { %4924 = vadd.xlane.f32.xlu0 %v4923_v40 }
 0xb74   : > { %5867 = vrot.lane.b32.xlu1 %v9738_v24, %s9117_s29 }
 0xb78   : > { %5865 = vrot.lane.b32.xlu1 %v9762_v53, %s9117_s29  ;;  %v5098_v53 = vpop.permute.xlu1 %5097 }
 0xb7a   : > { %5787 = vrot.lane.b32.xlu0 %v9736_v18, %s9117_s29 }
 0xb7c   : > { %6023 = vrot.lane.b32.xlu1 %v9759_v60, %s9117_s29  ;;  %v5250_v18 = vpop.permute.xlu1 %5249 }
 0xb7e   : > { %5945 = vrot.lane.b32.xlu0 %v9734_v11, %s9117_s29 }
 0xb80   : > { %6021 = vrot.lane.b32.xlu1 %v9779_v47, %s9117_s29  ;;  %v5402_v14 = vpop.permute.xlu1 %5401  ;;  %v10371_v47 = vpop.permute.xlu0 %5633 }
 0xb82   : > { %5943 = vrot.lane.b32.xlu0 %v9753_v16, %s9117_s29 }
 0xb84   : > { %v10367_v55 = vpop.permute.xlu1 %5555  ;;  %v10375_v16 = vpop.permute.xlu0 %5631 }
 0xb86   : > { %6101 = vrot.lane.b32.xlu0 %v9748_v41, %s9117_s29 }
 0xb88   : > { %v10369_v31 = vpop.permute.xlu1 %5553  ;;  %v10379_v13 = vpop.permute.xlu0 %5789 }
 0xb8a   : > { %6099 = vrot.lane.b32.xlu0 %v9770_v43, %s9117_s29 }
 0xb8c   : > { %v10373_v8 = vpop.permute.xlu1 %5711 }
 0xb90   : > { %v10377_v57 = vpop.permute.xlu1 %5709 }
 0xbdf   : > { %v4910_v43 = vpop.xlane.xlu1 %4909 }
 0xbe0   : > { %8901 = vrcp.f32 %v4910_v43  ;;  %v4907_v46 = vpop.xlane.xlu0 %4906 }
 0xbe1   : > { %8903 = vrcp.f32 %v4907_v46 }
 0xbe4   : > { %v4916_v2 = vpop.xlane.xlu1 %4915 }
 0xbe5   : > { %8905 = vrcp.f32 %v4916_v2  ;;  %v4913_v63 = vpop.xlane.xlu0 %4912 }
 0xbe6   : > { %8907 = vrcp.f32 %v4913_v63 }
 0xbe8   : > { %v4922_v54 = vpop.xlane.xlu1 %4921 }
 0xbe9   : > { %8909 = vrcp.f32 %v4922_v54  ;;  %v4919_v5 = vpop.xlane.xlu0 %4918 }
 0xbea   : > { %8911 = vrcp.f32 %v4919_v5 }
 0xbec   : > { %v4928_v59 = vpop.xlane.xlu1 %4927 }
 0xbed   : > { %v8902_v15 = vpop.eup %8901  ;;  %8913 = vrcp.f32 %v4928_v59  ;;  %v4925_v21 = vpop.xlane.xlu0 %4924 }
 0xbee   : > { %v8904_v12 = vpop.eup %8903  ;;  %8915 = vrcp.f32 %v4925_v21  ;;  %v4938_v40 = vmul.f32 %v8902_v15, %v10315_v32 }
 0xbef   : > { %v4937_v43 = vmul.f32 %v8904_v12, %v10317_v22 }
 0xbf0   : > { %8462 = vmatmul.mubr.msk.f32.vlgmr.msra.gmra.mxu1 %vm1608_vm6, %v4938_v40  ;;  %v5868_v5 = vpop.permute.xlu1 %5867 }
 0xbf1   : > { %8457 = vmatmul.mubr.msk.f32.vlgmr.msra.gmra.mxu0 %vm1608_vm6, %v4937_v43  ;;  %8470 = vmatpush3.msra.mxu1 %v5174_v7  ;;  %v5788_v63 = vpop.permute.xlu0 %5787 }
 0xbf2   : > { %v8906_v46 = vpop.eup %8905  ;;  %8465 = vmatpush3.msra.mxu0 %v5098_v53  ;;  %8471 = vmatprep.mubr.msk.f32.mxu1 %vm9112_vm7, %v10893_v56 }
 0xbf3   : > { %v8908_v2 = vpop.eup %8907  ;;  %8466 = vmatprep.mubr.msk.f32.mxu0 %vm9112_vm7, %v10893_v56  ;;  %8474 = vmatprep.subr.mxu0 %v10893_v56  ;;  %v4940_v32 = vmul.f32 %v8906_v46, %v10325_v42 }
 0xbf4   : > { %8479 = vmatprep.subr.mxu1 %v10893_v56  ;;  %v4939_v22 = vmul.f32 %v8908_v2, %v10327_v6 }
 0xbf5   : > { %8472 = vmatmul.mubr.msk.f32.vlgmr.msra.gmra.mxu1 %vm1608_vm6, %v4940_v32 }
 0xbf6   : > { %v8910_v7 = vpop.eup %8909  ;;  %8467 = vmatmul.mubr.msk.f32.vlgmr.msra.gmra.mxu0 %vm1608_vm6, %v4939_v22  ;;  %8480 = vmatpush3.msra.mxu1 %v5326_v61  ;;  %v5946_v61 = vpop.permute.xlu0 %5945 }
 0xbf7   : > { %v8912_v53 = vpop.eup %8911  ;;  %8475 = vmatpush3.msra.mxu0 %v5250_v18  ;;  %8476 = vmatprep.mubr.msk.f32.mxu0 %vm9112_vm7, %v10893_v56  ;;  %v4942_v54 = vmul.f32 %v8910_v7, %v10333_v10 }
 0xbf8   : > { %8481 = vmatprep.mubr.msk.f32.mxu1 %vm9112_vm7, %v10893_v56  ;;  %8484 = vmatprep.subr.mxu0 %v10893_v56  ;;  %v4941_v42 = vmul.f32 %v8912_v53, %v10335_v51 }
 0xbf9   : > { %8489 = vmatprep.subr.mxu1 %v10893_v56  ;;  %8482 = vmatmul.mubr.msk.f32.vlgmr.msra.gmra.mxu1 %vm1608_vm6, %v4942_v54 }
 0xbfa   : > { %v8914_v6 = vpop.eup %8913  ;;  %8477 = vmatmul.mubr.msk.f32.vlgmr.msra.gmra.mxu0 %vm1608_vm6, %v4941_v42  ;;  %8490 = vmatpush3.msra.mxu1 %v5478_v33 }
 0xbfb   : > { %v8916_v18 = vpop.eup %8915  ;;  %8485 = vmatpush3.msra.mxu0 %v5402_v14  ;;  %8486 = vmatprep.mubr.msk.f32.mxu0 %vm9112_vm7, %v10893_v56  ;;  %v4944_v10 = vmul.f32 %v8914_v6, %v10341_v49  ;;  %v5944_v49 = vpop.permute.xlu0 %5943 }
 0xbfc   : > { %8491 = vmatprep.mubr.msk.f32.mxu1 %vm9112_vm7, %v10893_v56  ;;  %8494 = vmatprep.subr.mxu0 %v10893_v56  ;;  %v4943_v51 = vmul.f32 %v8916_v18, %v10343_v29  ;;  %v5866_v29 = vpop.permute.xlu1 %5865 }
 0xbfd   : > { %8499 = vmatprep.subr.mxu1 %v10893_v56  ;;  %8492 = vmatmul.mubr.msk.f32.vlgmr.msra.gmra.mxu1 %vm1608_vm6, %v4944_v10 }
 0xbfe   : > { %8487 = vmatmul.mubr.msk.f32.vlgmr.msra.gmra.mxu0 %vm1608_vm6, %v4943_v51  ;;  %8500 = vmatpush3.xpose.msk.msra.mxu1 %vm1608_vm6, %v10371_v47 }
 0xbff   : > { %8495 = vmatpush3.xpose.msk.msra.mxu0 %vm1608_vm6, %v10367_v55  ;;  %8496 = vmatprep.mubr.msk.f32.mxu0 %vm9112_vm7, %v10893_v56  ;;  %v6102_v14 = vpop.permute.xlu0 %6101 }
 0xc00   : > { %8501 = vmatprep.mubr.msk.f32.mxu1 %vm9112_vm7, %v10893_v56  ;;  %8504 = vmatprep.subr.mxu0 %v10893_v56  ;;  %v6024_v55 = vpop.permute.xlu1 %6023 }
 0xc01   : > { %8509 = vmatprep.subr.mxu1 %v10893_v56  ;;  %8502 = vmatmul.mubr.msk.f32.vlgmr.msra.gmra.mxu1 %vm1608_vm6, %v10375_v16 }
 0xc02   : > { %8497 = vmatmul.mubr.msk.f32.vlgmr.msra.gmra.mxu0 %vm1608_vm6, %v10369_v31  ;;  %8510 = vmatpush3.xpose.msk.msra.mxu1 %vm1608_vm6, %v10379_v13 }
 0xc03   : > { %8505 = vmatpush3.xpose.msk.msra.mxu0 %vm1608_vm6, %v10373_v8  ;;  %8506 = vmatprep.mubr.msk.f32.mxu0 %vm9112_vm7, %v10893_v56  ;;  %v6100_v33 = vpop.permute.xlu0 %6099 }
 0xc04   : > { %8511 = vmatprep.mubr.msk.f32.mxu1 %vm9112_vm7, %v10893_v56  ;;  %8514 = vmatprep.subr.mxu0 %v10893_v56  ;;  %v6022_v31 = vpop.permute.xlu1 %6021 }
 0xc05   : > { %8519 = vmatprep.subr.mxu1 %v10893_v56  ;;  %8512 = vmatmul.mubr.msk.f32.vlgmr.msra.gmra.mxu1 %vm1608_vm6, %v5788_v63 }
 0xc06   : > { %8507 = vmatmul.mubr.msk.f32.vlgmr.msra.gmra.mxu0 %vm1608_vm6, %v10377_v57  ;;  %8520 = vmatpush3.xpose.msk.msra.mxu1 %vm1608_vm6, %v5946_v61 }
 0xc07   : > { %8515 = vmatpush3.xpose.msk.msra.mxu0 %vm1608_vm6, %v5868_v5  ;;  %8516 = vmatprep.mubr.msk.f32.mxu0 %vm9112_vm7, %v10893_v56 }
 0xc08   : > { %8521 = vmatprep.mubr.msk.f32.mxu1 %vm9112_vm7, %v10893_v56  ;;  %8524 = vmatprep.subr.mxu0 %v10893_v56 }
 0xc09   : > { %8529 = vmatprep.subr.mxu1 %v10893_v56  ;;  %8522 = vmatmul.mubr.msk.f32.vlgmr.msra.gmra.mxu1 %vm1608_vm6, %v5944_v49 }
 0xc0a   : > { %8517 = vmatmul.mubr.msk.f32.vlgmr.msra.gmra.mxu0 %vm1608_vm6, %v5866_v29  ;;  %8530 = vmatpush3.xpose.msk.msra.mxu1 %vm1608_vm6, %v6102_v14 }
 0xc0b   : > { %8525 = vmatpush3.xpose.msk.msra.mxu0 %vm1608_vm6, %v6024_v55  ;;  %8526 = vmatprep.mubr.msk.f32.mxu0 %vm9112_vm7, %v10893_v56 }
 0xc0c   : > { %8531 = vmatprep.mubr.msk.f32.mxu1 %vm9112_vm7, %v10893_v56  ;;  %8534 = vmatprep.subr.mxu0 %v10893_v56 }
 0xc0d   : > { %8532 = vmatmul.mubr.msk.f32.vlgmr.msra.gmra.mxu1 %vm1608_vm6, %v6100_v33  ;;  %8539 = vmatprep.subr.mxu1 %v10893_v56 }
 0xc0e   : > { %8527 = vmatmul.mubr.msk.f32.vlgmr.msra.gmra.mxu0 %vm1608_vm6, %v6022_v31  ;;  %8541 = vmatprep.mubr.msk.f32.mxu1 %vm9112_vm7, %v10893_v56 }
 0xc0f   : > { %8536 = vmatprep.mubr.msk.f32.mxu0 %vm9112_vm7, %v10893_v56 }
 0xcb0   : > { %v10466_v47 = vpop.f32.mrf.mxu1 }
 0xcb1   : > { %v10468_v8 = vpop.f32.mrf.mxu0 }
 0xcb2   : > { %v8463_v16 = vpop.f32.mrf.mxu1 }
 0xcb3   : > { %v8458_v57 = vpop.f32.mrf.mxu0 }
 0xcb5   : > { %v10470_v13 = vpop.f32.mrf.mxu1 }
 0xcb6   : > { %v10472_v59 = vpop.f32.mrf.mxu0 }
 0xcb7   : > { %v8473_v15 = vpop.f32.mrf.mxu1 }
 0xcb8   : > { %v8468_v21 = vpop.f32.mrf.mxu0 }
 0xcb9   : > { %v10474_v12 = vpop.f32.mrf.mxu1 }
 0xcba   : > { %v10476_v40 = vpop.f32.mrf.mxu0 }
 0xcbb   : > { %v8483_v43 = vpop.f32.mrf.mxu1 }
 0xcbc   : > { %v8478_v46 = vpop.f32.mrf.mxu0 }
 0xcbd   : > { %v10478_v2 = vpop.f32.mrf.mxu1 }
 0xcbe   : > { %v10480_v32 = vpop.f32.mrf.mxu0 }
 0xcbf   : > { %v8493_v63 = vpop.f32.mrf.mxu1 }
 0xcc0   : > { %v8488_v22 = vpop.f32.mrf.mxu0 }
 0xcc1   : > { %v5705_v7 = vpop.f32.mrf.mxu1 }
 0xcc2   : > { %v5627_v53 = vpop.f32.mrf.mxu0  ;;  %v5706_v54 = vadd.f32 %v5705_v7, %v9801_v38 }
 0xcc3   : > { %v5628_v42 = vadd.f32 %v5627_v53, %v9804_v20  ;;  %v8503_v6 = vpop.f32.mrf.mxu1 }
 0xcc4   : > { %v8498_v61 = vpop.f32.mrf.mxu0  ;;  %v6180_v18 = vsel %vm1608_vm6, %v5706_v54, -inf }
 0xcc5   : > { %6181 = vmax.xlane.f32.xlu0 %v6180_v18  ;;  %v5861_v5 = vpop.f32.mrf.mxu1  ;;  %v6177_v10 = vsel %vm1608_vm6, %v5628_v42, -inf }
 0xcc6   : > { %v5862_v51 = vadd.f32 %v5861_v5, %v9823_v25  ;;  %6178 = vmax.xlane.f32.xlu1 %v6177_v10  ;;  %v5783_v49 = vpop.f32.mrf.mxu0 }
 0xcc7   : > { %v5784_v29 = vadd.f32 %v5783_v49, %v9827_v34  ;;  %v8513_v14 = vpop.f32.mrf.mxu1 }
 0xcc8   : > { %v8508_v55 = vpop.f32.mrf.mxu0  ;;  %v6186_v38 = vsel %vm1608_vm6, %v5862_v51, -inf }
 0xcc9   : > { %v6017_v33 = vpop.f32.mrf.mxu1  ;;  %v6183_v20 = vsel %vm1608_vm6, %v5784_v29, -inf }
 0xcca   : > { %v6018_v31 = vadd.f32 %v6017_v33, %v9836_v35  ;;  %6187 = vmax.xlane.f32.xlu1 %v6186_v38  ;;  %6184 = vmax.xlane.f32.xlu0 %v6183_v20  ;;  %v5939_v16 = vpop.f32.mrf.mxu0 }
 0xccb   : > { %v5940_v57 = vadd.f32 %v5939_v16, %v9845_v36  ;;  %v8523_v15 = vpop.f32.mrf.mxu1 }
 0xccc   : > { %v8518_v25 = vpop.f32.mrf.mxu0  ;;  %v6192_v21 = vsel %vm1608_vm6, %v6018_v31, -inf }
 0xccd   : > { %v6173_v43 = vpop.f32.mrf.mxu1  ;;  %v6189_v34 = vsel %vm1608_vm6, %v5940_v57, -inf }
 0xcce   : > { %v6174_v46 = vadd.f32 %v6173_v43, %v9854_v50  ;;  %6193 = vmax.xlane.f32.xlu1 %v6192_v21  ;;  %6190 = vmax.xlane.f32.xlu0 %v6189_v34  ;;  %v6095_v63 = vpop.f32.mrf.mxu0 }
 0xccf   : > { %v6096_v22 = vadd.f32 %v6095_v63, %v9860_v19  ;;  %v8533_v35 = vpop.f32.mrf.mxu1 }
 0xcd0   : > { %v8528_v7 = vpop.f32.mrf.mxu0  ;;  %v6198_v53 = vsel %vm1608_vm6, %v6174_v46, -inf }
 0xcd1   : > { %v6195_v36 = vsel %vm1608_vm6, %v6096_v22, -inf }
 0xcd2   : > { %6199 = vmax.xlane.f32.xlu1 %v6198_v53  ;;  %6196 = vmax.xlane.f32.xlu0 %v6195_v36 }
 0xce3   : > { %6341 = vrot.lane.b32.xlu1 %v9698_v39, %s9118_s6 }
 0xce7   : > { %6417 = vrot.lane.b32.xlu1 %v9716_v3, %s9118_s6 }
 0xce8   : > { %6265 = vrot.lane.b32.xlu0 %v9700_v45, %s9118_s6 }
 0xceb   : > { %6569 = vrot.lane.b32.xlu1 %v9738_v24, %s9118_s6 }
 0xcec   : > { %6493 = vrot.lane.b32.xlu0 %v9712_v62, %s9118_s6 }
 0xcf0   : > { %6645 = vrot.lane.b32.xlu0 %v9734_v11, %s9118_s6 }
 0xd4e   : > { %v6182_v50 = vpop.xlane.xlu0 %6181 }
 0xd4f   : > { %v6202_v19 = vsub.f32 %v5706_v54, %v6182_v50  ;;  %v6179_v6 = vpop.xlane.xlu1 %6178 }
 0xd50   : > { %v6201_v61 = vsub.f32 %v5628_v42, %v6179_v6 }
 0xd51   : > { %v6211_v39 = vmul.f32 1.442695, %v6202_v19 }
 0xd52   : > { %v6209_v18 = vmul.f32 1.442695, %v6201_v61 }
 0xd53   : > { %8917 = vpow2.f32 %v6211_v39  ;;  %v6188_v3 = vpop.xlane.xlu1 %6187  ;;  %v6185_v5 = vpop.xlane.xlu0 %6184 }
 0xd54   : > { %8919 = vpow2.f32 %v6209_v18  ;;  %v6204_v45 = vsub.f32 %v5862_v51, %v6188_v3  ;;  %v6203_v10 = vsub.f32 %v5784_v29, %v6185_v5 }
 0xd56   : > { %v6215_v49 = vmul.f32 1.442695, %v6204_v45  ;;  %v6213_v24 = vmul.f32 1.442695, %v6203_v10 }
 0xd57   : > { %v6194_v14 = vpop.xlane.xlu1 %6193  ;;  %v6191_v55 = vpop.xlane.xlu0 %6190 }
 0xd58   : > { %8921 = vpow2.f32 %v6215_v49  ;;  %v6206_v62 = vsub.f32 %v6018_v31, %v6194_v14  ;;  %v6205_v38 = vsub.f32 %v5940_v57, %v6191_v55 }
 0xd59   : > { %8923 = vpow2.f32 %v6213_v24 }
 0xd5a   : > { %v6219_v11 = vmul.f32 1.442695, %v6206_v62  ;;  %v6217_v54 = vmul.f32 1.442695, %v6205_v38 }
 0xd5b   : > { %v6200_v33 = vpop.xlane.xlu1 %6199  ;;  %v6197_v42 = vpop.xlane.xlu0 %6196 }
 0xd5c   : > { %8925 = vpow2.f32 %v6219_v11  ;;  %v6208_v20 = vsub.f32 %v6174_v46, %v6200_v33  ;;  %v6207_v16 = vsub.f32 %v6096_v22, %v6197_v42  ;;  %v6998_v11 = vld [vmem:[#allocation5 + $0xf0] sm:$0xff]  ;;  %v6996_v33 = vld [vmem:[#allocation5 + $0xe0] sm:$0xff]  ;;  %v6995_v42 = vld [vmem:[#allocation5 + $0xd8] sm:$0xff] }
 0xd5d   : > { %8927 = vpow2.f32 %v6217_v54  ;;  %v6997_v54 = vld [vmem:[#allocation5 + $0xe8] sm:$0xff] }
 0xd5e   : > { %v6223_v15 = vmul.f32 1.442695, %v6208_v20  ;;  %v6221_v25 = vmul.f32 1.442695, %v6207_v16 }
 0xd5f   : > { %v6342_v51 = vpop.permute.xlu1 %6341  ;;  %v6266_v29 = vpop.permute.xlu0 %6265 }
 0xd60   : > { %v10510_v21 = vpop.eup %8917  ;;  %8929 = vpow2.f32 %v6223_v15  ;;  %8535 = vmatpush3.msra.mxu0 %v6266_v29  ;;  %8540 = vmatpush3.msra.mxu1 %v6342_v51 }
 0xd61   : > { %v10512_v31 = vpop.eup %8919  ;;  %8931 = vpow2.f32 %v6221_v25  ;;  %v6228_v57 = vsel %vm1608_vm6, %v10510_v21, 0.0  ;;  %8549 = vmatprep.subr.mxu1 %v10893_v56  ;;  %8544 = vmatprep.subr.mxu0 %v10893_v56 }
 0xd62   : > { %6229 = vadd.xlane.f32.xlu1 %v6228_v57  ;;  %v6225_v43 = vsel %vm1608_vm6, %v10512_v31, 0.0 }
 0xd63   : > { %6226 = vadd.xlane.f32.xlu0 %v6225_v43 }
 0xd65   : > { %v10520_v34 = vpop.eup %8921 }
 0xd66   : > { %v10522_v46 = vpop.eup %8923  ;;  %v6234_v63 = vsel %vm1608_vm6, %v10520_v34, 0.0 }
 0xd67   : > { %6235 = vadd.xlane.f32.xlu1 %v6234_v63  ;;  %v6231_v22 = vsel %vm1608_vm6, %v10522_v46, 0.0 }
 0xd68   : > { %6232 = vadd.xlane.f32.xlu0 %v6231_v22 }
 0xd69   : > { %v10528_v35 = vpop.eup %8925 }
 0xd6a   : > { %v10530_v7 = vpop.eup %8927  ;;  %v6240_v53 = vsel %vm1608_vm6, %v10528_v35, 0.0 }
 0xd6b   : > { %6241 = vadd.xlane.f32.xlu1 %v6240_v53  ;;  %v6237_v36 = vsel %vm1608_vm6, %v10530_v7, 0.0 }
 0xd6c   : > { %6238 = vadd.xlane.f32.xlu0 %v6237_v36 }
 0xd6d   : > { %v10536_v50 = vpop.eup %8929 }
 0xd6e   : > { %v10538_v19 = vpop.eup %8931  ;;  %v6246_v6 = vsel %vm1608_vm6, %v10536_v50, 0.0 }
 0xd6f   : > { %6247 = vadd.xlane.f32.xlu1 %v6246_v6  ;;  %v6243_v61 = vsel %vm1608_vm6, %v10538_v19, 0.0 }
 0xd70   : > { %6244 = vadd.xlane.f32.xlu0 %v6243_v61 }
 0xd80   : > { %6721 = vrot.lane.b32.xlu1 %v9759_v60, %s9118_s6  ;;  %v6494_v60 = vpop.permute.xlu0 %6493 }
 0xd84   : > { %6881 = vrot.lane.b32.xlu1 %v10263_v9, %s9119_s24  ;;  %v6646_v9 = vpop.permute.xlu0 %6645 }
 0xd86   : > { %6797 = vrot.lane.b32.xlu0 %v9748_v41, %s9118_s6  ;;  %v6418_v41 = vpop.permute.xlu1 %6417 }
 0xd88   : > { %6913 = vrot.lane.b32.xlu1 %v10468_v8, %s9120_s8 }
 0xd8a   : > { %6883 = vrot.lane.b32.xlu0 %v10261_v26, %s9119_s24  ;;  %v6570_v26 = vpop.permute.xlu1 %6569 }
 0xd8c   : > { %6885 = vrot.lane.b32.xlu1 %v10267_v52, %s9119_s24 }
 0xd8e   : > { %6915 = vrot.lane.b32.xlu0 %v10466_v47, %s9120_s8 }
 0xd90   : > { %6917 = vrot.lane.b32.xlu1 %v10472_v59, %s9120_s8 }
 0xd92   : > { %6887 = vrot.lane.b32.xlu0 %v10265_v58, %s9119_s24 }
 0xd94   : > { %6889 = vrot.lane.b32.xlu1 %v10271_v28, %s9119_s24 }
 0xd96   : > { %6919 = vrot.lane.b32.xlu0 %v10470_v13, %s9120_s8 }
 0xd98   : > { %6921 = vrot.lane.b32.xlu1 %v10476_v40, %s9120_s8 }
 0xd9a   : > { %6891 = vrot.lane.b32.xlu0 %v10269_v4, %s9119_s24 }
 0xd9c   : > { %6893 = vrot.lane.b32.xlu1 %v10275_v37, %s9119_s24 }
 0xd9e   : > { %6923 = vrot.lane.b32.xlu0 %v10474_v12, %s9120_s8 }
 0xda0   : > { %6925 = vrot.lane.b32.xlu1 %v10480_v32, %s9120_s8 }
 0xda2   : > { %6895 = vrot.lane.b32.xlu0 %v10273_v23, %s9119_s24 }
 0xda6   : > { %6927 = vrot.lane.b32.xlu0 %v10478_v2, %s9120_s8 }
 0xdeb   : > { %v6230_v58 = vpop.xlane.xlu1 %6229 }
 0xdec   : > { %8933 = vrcp.f32 %v6230_v58  ;;  %v6227_v52 = vpop.xlane.xlu0 %6226 }
 0xded   : > { %8935 = vrcp.f32 %v6227_v52 }
 0xdf0   : > { %v6236_v4 = vpop.xlane.xlu1 %6235 }
 0xdf1   : > { %8937 = vrcp.f32 %v6236_v4  ;;  %v6233_v28 = vpop.xlane.xlu0 %6232 }
 0xdf2   : > { %8939 = vrcp.f32 %v6233_v28 }
 0xdf4   : > { %v6242_v37 = vpop.xlane.xlu1 %6241 }
 0xdf5   : > { %8941 = vrcp.f32 %v6242_v37  ;;  %v6239_v47 = vpop.xlane.xlu0 %6238 }
 0xdf6   : > { %8943 = vrcp.f32 %v6239_v47 }
 0xdf8   : > { %v6248_v8 = vpop.xlane.xlu1 %6247 }
 0xdf9   : > { %v8934_v23 = vpop.eup %8933  ;;  %8945 = vrcp.f32 %v6248_v8  ;;  %v6245_v13 = vpop.xlane.xlu0 %6244 }
 0xdfa   : > { %v8936_v59 = vpop.eup %8935  ;;  %8947 = vrcp.f32 %v6245_v13  ;;  %v6258_v12 = vmul.f32 %v8934_v23, %v10510_v21 }
 0xdfb   : > { %v6257_v40 = vmul.f32 %v8936_v59, %v10512_v31 }
 0xdfc   : > { %8542 = vmatmul.mubr.msk.f32.vlgmr.msra.gmra.mxu1 %vm1608_vm6, %v6258_v12  ;;  %v6722_v14 = vpop.permute.xlu1 %6721 }
 0xdfd   : > { %8537 = vmatmul.mubr.msk.f32.vlgmr.msra.gmra.mxu0 %vm1608_vm6, %v6257_v40  ;;  %8550 = vmatpush3.msra.mxu1 %v6494_v60  ;;  %v6798_v49 = vpop.permute.xlu0 %6797 }
 0xdfe   : > { %v8938_v2 = vpop.eup %8937  ;;  %8545 = vmatpush3.msra.mxu0 %v6418_v41  ;;  %8551 = vmatprep.mubr.msk.f32.mxu1 %vm9112_vm7, %v10893_v56 }
 0xdff   : > { %v8940_v32 = vpop.eup %8939  ;;  %8546 = vmatprep.mubr.msk.f32.mxu0 %vm9112_vm7, %v10893_v56  ;;  %8554 = vmatprep.subr.mxu0 %v10893_v56  ;;  %v6260_v39 = vmul.f32 %v8938_v2, %v10520_v34 }
 0xe00   : > { %8559 = vmatprep.subr.mxu1 %v10893_v56  ;;  %v6259_v18 = vmul.f32 %v8940_v32, %v10522_v46  ;;  %v6882_v53 = vpop.permute.xlu1 %6881 }
 0xe01   : > { %8552 = vmatmul.mubr.msk.f32.vlgmr.msra.gmra.mxu1 %vm1608_vm6, %v6260_v39  ;;  %v6969_v8 = vsel %vm1608_vm6, %v10058_v48, %v6882_v53 }
 0xe02   : > { %v8942_v3 = vpop.eup %8941  ;;  %8547 = vmatmul.mubr.msk.f32.vlgmr.msra.gmra.mxu0 %vm1608_vm6, %v6259_v18  ;;  %8560 = vmatpush3.msra.mxu1 %v6646_v9 }
 0xe03   : > { %v8944_v5 = vpop.eup %8943  ;;  %8555 = vmatpush3.msra.mxu0 %v6570_v26  ;;  %8556 = vmatprep.mubr.msk.f32.mxu0 %vm9112_vm7, %v10893_v56  ;;  %v6262_v45 = vmul.f32 %v8942_v3, %v10528_v35 }
 0xe04   : > { %8561 = vmatprep.mubr.msk.f32.mxu1 %vm9112_vm7, %v10893_v56  ;;  %8564 = vmatprep.subr.mxu0 %v10893_v56  ;;  %v6261_v10 = vmul.f32 %v8944_v5, %v10530_v7  ;;  %v6884_v7 = vpop.permute.xlu0 %6883 }
 0xe05   : > { %8569 = vmatprep.subr.mxu1 %v10893_v56  ;;  %8562 = vmatmul.mubr.msk.f32.vlgmr.msra.gmra.mxu1 %vm1608_vm6, %v6262_v45  ;;  %v6970_v47 = vsel %vm1608_vm6, %v10056_v17, %v6884_v7 }
 0xe06   : > { %v8946_v24 = vpop.eup %8945  ;;  %8557 = vmatmul.mubr.msk.f32.vlgmr.msra.gmra.mxu0 %vm1608_vm6, %v6261_v10  ;;  %8570 = vmatpush3.msra.mxu1 %v6798_v49 }
 0xe07   : > { %v8948_v55 = vpop.eup %8947  ;;  %8565 = vmatpush3.msra.mxu0 %v6722_v14  ;;  %8566 = vmatprep.mubr.msk.f32.mxu0 %vm9112_vm7, %v10893_v56  ;;  %v6264_v62 = vmul.f32 %v8946_v24, %v10536_v50  ;;  %v6914_v50 = vpop.permute.xlu1 %6913 }
 0xe08   : > { %8571 = vmatprep.mubr.msk.f32.mxu1 %vm9112_vm7, %v10893_v56  ;;  %v6263_v38 = vmul.f32 %v8948_v55, %v10538_v19  ;;  %8574 = vmatprep.subr.mxu0 %v6998_v11  ;;  %v6916_v36 = vpop.permute.xlu0 %6915  ;;  %v6978_v59 = vsel %vm6977_vm1, %v6969_v8, %v6914_v50  ;;  %v10898_v50 = vld [vmem:[#allocation14_spill] sm:$0xff] }
 0xe09   : > { %8572 = vmatmul.mubr.msk.f32.vlgmr.msra.gmra.mxu1 %vm1608_vm6, %v6264_v62  ;;  %v6979_v23 = vsel %vm6977_vm1, %v6970_v47, %v6916_v36 }
 0xe0a   : > { %8567 = vmatmul.mubr.msk.f32.vlgmr.msra.gmra.mxu0 %vm1608_vm6, %v6263_v38  ;;  %v10894_v38 = vld [vmem:[#allocation19_spill] sm:$0xff] }
 0xe0b   : > { %8575 = vmatpush3.msra.mxu0 %v6998_v11  ;;  %v6886_v6 = vpop.permute.xlu1 %6885 }
 0xe0c   : > { %8576 = vmatprep.subr.mxu0 %v6997_v54  ;;  %v6888_v19 = vpop.permute.xlu0 %6887  ;;  %v6971_v17 = vsel %vm1608_vm6, %v10062_v30, %v6886_v6 }
 0xe0d   : > { %8577 = vmatpush3.msra.mxu0 %v6997_v54  ;;  %v6972_v32 = vsel %vm1608_vm6, %v10060_v44, %v6888_v19 }
 0xe0e   : > { %8578 = vmatprep.subr.mxu0 %v6996_v33 }
 0xe0f   : > { %8579 = vmatpush3.msra.mxu0 %v6996_v33  ;;  %v6918_v41 = vpop.permute.xlu1 %6917 }
 0xe10   : > { %8580 = vmatprep.subr.mxu0 %v6995_v42  ;;  %v6920_v61 = vpop.permute.xlu0 %6919  ;;  %v6980_v18 = vsel %vm6977_vm1, %v6971_v17, %v6918_v41 }
 0xe11   : > { %8581 = vmatpush3.msra.mxu0 %v6995_v42  ;;  %v6981_v48 = vsel %vm6977_vm1, %v6972_v32, %v6920_v61 }
 0xe13   : > { %v6890_v26 = vpop.permute.xlu1 %6889 }
 0xe14   : > { %v6892_v60 = vpop.permute.xlu0 %6891  ;;  %v6973_v44 = vsel %vm1608_vm6, %v10066_v0, %v6890_v26 }
 0xe15   : > { %v6974_v10 = vsel %vm1608_vm6, %v10064_v1, %v6892_v60  ;;  %v10899_v60 = vld [vmem:[#allocation15_spill] sm:$0xff] }
 0xe17   : > { %v6922_v58 = vpop.permute.xlu1 %6921 }
 0xe18   : > { %v6924_v9 = vpop.permute.xlu0 %6923  ;;  %v6982_v24 = vsel %vm6977_vm1, %v6973_v44, %v6922_v58 }
 0xe19   : > { %v6983_v30 = vsel %vm6977_vm1, %v6974_v10, %v6924_v9 }
 0xe1b   : > { %v6894_v4 = vpop.permute.xlu1 %6893 }
 0xe1c   : > { %v6896_v52 = vpop.permute.xlu0 %6895  ;;  %v6975_v0 = vsel %vm1608_vm6, %v10894_v38, %v6894_v4  ;;  %v10900_v4 = vld [vmem:[#allocation16_spill] sm:$0xff] }
 0xe1d   : > { %v6976_v1 = vsel %vm1608_vm6, %v10068_v27, %v6896_v52  ;;  %v7922_v27 = vld [vmem:[#allocation5 + $0xf8] ss:$0 sm:$0xff] }
 0xe1f   : > { %v6926_v37 = vpop.permute.xlu1 %6925 }
 0xe20   : > { %v6928_v28 = vpop.permute.xlu0 %6927  ;;  %v6984_v33 = vsel %vm6977_vm1, %v6975_v0, %v6926_v37 }
 0xe21   : > { %v6985_v11 = vsel %vm6977_vm1, %v6976_v1, %v6928_v28 }
 0xebc   : > { %v6413_v20 = vpop.f32.mrf.mxu1 }
 0xebd   : > { %v6337_v56 = vpop.f32.mrf.mxu0  ;;  %6947 = vrot.lane.b32.xlu0 %v6413_v20, %s9121_s23 }
 0xebe   : > { %6945 = vrot.lane.b32.xlu1 %v6337_v56, %s9121_s23  ;;  %v8543_v16 = vpop.f32.mrf.mxu1 }
 0xebf   : > { %v8538_v15 = vpop.f32.mrf.mxu0 }
 0xec1   : > { %v6565_v25 = vpop.f32.mrf.mxu1 }
 0xec2   : > { %v6489_v51 = vpop.f32.mrf.mxu0  ;;  %6951 = vrot.lane.b32.xlu0 %v6565_v25, %s9121_s23 }
 0xec3   : > { %6949 = vrot.lane.b32.xlu1 %v6489_v51, %s9121_s23  ;;  %v8553_v29 = vpop.f32.mrf.mxu1  ;;  %v10895_v51 = vld [vmem:[#allocation11_spill] sm:$0xff] }
 0xec4   : > { %v8548_v21 = vpop.f32.mrf.mxu0 }
 0xec5   : > { %v6717_v31 = vpop.f32.mrf.mxu1 }
 0xec6   : > { %v6641_v57 = vpop.f32.mrf.mxu0  ;;  %6955 = vrot.lane.b32.xlu0 %v6717_v31, %s9121_s23  ;;  %v10896_v31 = vld [vmem:[#allocation12_spill] sm:$0xff] }
 0xec7   : > { %6953 = vrot.lane.b32.xlu1 %v6641_v57, %s9121_s23  ;;  %v8563_v43 = vpop.f32.mrf.mxu1 }
 0xec8   : > { %v8558_v34 = vpop.f32.mrf.mxu0 }
 0xec9   : > { %v6869_v46 = vpop.f32.mrf.mxu1 }
 0xeca   : > { %v6793_v63 = vpop.f32.mrf.mxu0  ;;  %6959 = vrot.lane.b32.xlu0 %v6869_v46, %s9121_s23 }
 0xecb   : > { %6957 = vrot.lane.b32.xlu1 %v6793_v63, %s9121_s23  ;;  %v8573_v22 = vpop.f32.mrf.mxu1 }
 0xecc   : > { %v8568_v35 = vpop.f32.mrf.mxu0 }
 0xecd   : > { %v10897_v35 = vld [vmem:[#allocation13_spill] sm:$0xff] }
 0xf2f   : > { %v6948_v13 = vpop.permute.xlu0 %6947 }
 0xf30   : > { %v6988_v12 = vsel %vm6986_vm2, %v6979_v23, %v6948_v13  ;;  %v6946_v40 = vpop.permute.xlu1 %6945  ;;  %v10901_v23 = vld [vmem:[#allocation17_spill] sm:$0xff] }
 0xf31   : > { %v6987_v2 = vsel %vm6986_vm2, %v6978_v59, %v6946_v40  ;;  %v10902_v40 = vld [vmem:[#allocation18_spill] sm:$0xff] }
 0xf32   : > { %8582 = vmatprep.mubr.msk.f32.mxu0 %vm373_vm0, %v6987_v2 }
 0xf33   : > { %8583 = vmatmul.mubr.msk.f32.vlgmr.msra.gmra.mxu0 %vm373_vm0, %v6988_v12 }
 0xf34   : > { %v6952_v39 = vpop.permute.xlu0 %6951 }
 0xf35   : > { %v6990_v3 = vsel %vm6986_vm2, %v6981_v48, %v6952_v39  ;;  %v6950_v5 = vpop.permute.xlu1 %6949 }
 0xf36   : > { %v6989_v45 = vsel %vm6986_vm2, %v6980_v18, %v6950_v5 }
 0xf37   : > { %8585 = vmatprep.mubr.msk.f32.mxu0 %vm373_vm0, %v6989_v45 }
 0xf38   : > { %8586 = vmatmul.mubr.msk.f32.gmra.mxu0 %vm373_vm0, %v6990_v3  ;;  %v6956_v49 = vpop.permute.xlu0 %6955 }
 0xf39   : > { %v6992_v14 = vsel %vm6986_vm2, %v6983_v30, %v6956_v49  ;;  %v6954_v55 = vpop.permute.xlu1 %6953 }
 0xf3a   : > { %v6991_v62 = vsel %vm6986_vm2, %v6982_v24, %v6954_v55 }
 0xf3b   : > { %8588 = vmatprep.mubr.msk.f32.mxu0 %vm373_vm0, %v6991_v62 }
 0xf3c   : > { %8589 = vmatmul.mubr.msk.f32.gmra.mxu0 %vm373_vm0, %v6992_v14  ;;  %v6960_v54 = vpop.permute.xlu0 %6959 }
 0xf3d   : > { %v6994_v42 = vsel %vm6986_vm2, %v6985_v11, %v6960_v54  ;;  %v6958_v20 = vpop.permute.xlu1 %6957 }
 0xf3e   : > { %v6993_v56 = vsel %vm6986_vm2, %v6984_v33, %v6958_v20 }
 0xf3f   : > { %8591 = vmatprep.mubr.msk.f32.mxu0 %vm373_vm0, %v6993_v56 }
 0xf40   : > { %8592 = vmatmul.mubr.msk.f32.gmra.mxu0 %vm373_vm0, %v6994_v42 }
 0xff3   : > { %v8584_v16 = vpop.f32.mrf.mxu0 }
 0xff4   : > { %v7100_v15 = vadd.f32 %v8584_v16, %v7922_v27 }
 0xff5   : > { %v7094_v25 = vpop.f32.mrf.mxu0 }
 0xff6   : > { %v10645_v29 = vadd.f32 %v7100_v15, %v10895_v51  ;;  %v7095_v21 = vadd.f32 %v7922_v27, %v7094_v25 }
 0xff8   : > { %v10648_v57 = vadd.f32 %v7095_v21, %v10896_v31  ;;  %v8587_v43 = vpop.f32.mrf.mxu0  ;;  %v7146_v34 = vsel %vm373_vm0, %v10645_v29, 0.0 }
 0xff9   : > { %v7110_v46 = vadd.f32 %v8587_v43, %v7922_v27  ;;  %7147 = vadd.xlane.f32.xlu0 %v7146_v34 }
 0xffa   : > { %v7104_v63 = vpop.f32.mrf.mxu0  ;;  %v7143_v22 = vsel %vm373_vm0, %v10648_v57, 0.0 }
 0xffb   : > { %v10655_v7 = vadd.f32 %v7110_v46, %v10897_v35  ;;  %v7105_v53 = vadd.f32 %v7922_v27, %v7104_v63  ;;  %7144 = vadd.xlane.f32.xlu1 %v7143_v22 }
 0xffc   : > { %v8590_v36 = vpop.f32.mrf.mxu0 }
 0xffd   : > { %v10658_v19 = vadd.f32 %v7105_v53, %v10898_v50  ;;  %v7120_v6 = vadd.f32 %v8590_v36, %v7922_v27  ;;  %v7152_v41 = vsel %vm373_vm0, %v10655_v7, 0.0 }
 0xffe   : > { %v7114_v61 = vpop.f32.mrf.mxu0 }
 0xfff   : > { %v10663_v26 = vadd.f32 %v7120_v6, %v10899_v60  ;;  %v7115_v9 = vadd.f32 %v7922_v27, %v7114_v61  ;;  %v7149_v58 = vsel %vm373_vm0, %v10658_v19, 0.0  ;;  %7153 = vadd.xlane.f32.xlu1 %v7152_v41  ;;  %v7330_v61 = vld [vmem:[#allocation5 + $0x118] sm:$0xff]  ;;  %v7329_v41 = vld [vmem:[#allocation5 + $0x110] sm:$0xff]  ;;  %v7328_v60 = vld [vmem:[#allocation5 + $0x108] sm:$0xff] }
0x1000   : > { %v8593_v52 = vpop.f32.mrf.mxu0  ;;  %7150 = vadd.xlane.f32.xlu0 %v7149_v58  ;;  %8594 = vmatprep.subr.mxu1 %v7330_v61  ;;  %v7480_v58 = vld [vmem:[#allocation5 + $0x160] sm:$0xff] }
0x1001   : > { %v10668_v28 = vadd.f32 %v7115_v9, %v10900_v4  ;;  %v7130_v37 = vadd.f32 %v8593_v52, %v7922_v27  ;;  %v7158_v8 = vsel %vm373_vm0, %v10663_v26, 0.0  ;;  %8595 = vmatpush3.msra.mxu1 %v7330_v61  ;;  %v7327_v9 = vld [vmem:[#allocation5 + $0x100] sm:$0xff]  ;;  %v7479_v52 = vld [vmem:[#allocation5 + $0x158] sm:$0xff]  ;;  %8614 = vmatprep.subr.mxu0 %v7480_v58  ;;  %v7478_v4 = vld [vmem:[#allocation5 + $0x150] sm:$0xff] }
0x1002   : > { %v7124_v47 = vpop.f32.mrf.mxu0  ;;  %8596 = vmatprep.subr.mxu1 %v7329_v41  ;;  %8615 = vmatpush3.msra.mxu0 %v7480_v58 }
0x1003   : > { %v10673_v13 = vadd.f32 %v7130_v37, %v10901_v23  ;;  %v7125_v59 = vadd.f32 %v7922_v27, %v7124_v47  ;;  %v7155_v12 = vsel %vm373_vm0, %v10668_v28, 0.0  ;;  %7159 = vadd.xlane.f32.xlu1 %v7158_v8  ;;  %8597 = vmatpush3.msra.mxu1 %v7329_v41  ;;  %v7477_v37 = vld [vmem:[#allocation5 + $0x148] sm:$0xff]  ;;  %v7476_v47 = vld [vmem:[#allocation5 + $0x140] sm:$0xff] }
0x1004   : > { %7156 = vadd.xlane.f32.xlu0 %v7155_v12  ;;  %8598 = vmatprep.subr.mxu1 %v7328_v60 }
0x1005   : > { %v10678_v2 = vadd.f32 %v7125_v59, %v10902_v40  ;;  %v7164_v32 = vsel %vm373_vm0, %v10673_v13, 0.0  ;;  %8599 = vmatpush3.msra.mxu1 %v7328_v60  ;;  %8616 = vmatprep.subr.mxu0 %v7479_v52 }
0x1006   : > { %8600 = vmatprep.subr.mxu1 %v7327_v9  ;;  %8617 = vmatpush3.msra.mxu0 %v7479_v52 }
0x1007   : > { %v7161_v17 = vsel %vm373_vm0, %v10678_v2, 0.0  ;;  %7165 = vadd.xlane.f32.xlu1 %v7164_v32  ;;  %8601 = vmatpush3.msra.mxu1 %v7327_v9 }
0x1008   : > { %7162 = vadd.xlane.f32.xlu0 %v7161_v17  ;;  %8618 = vmatprep.subr.mxu0 %v7478_v4 }
0x1009   : > { %8619 = vmatpush3.msra.mxu0 %v7478_v4 }
0x100a   : > { %8620 = vmatprep.subr.mxu0 %v7477_v37 }
0x100b   : > { %8621 = vmatpush3.msra.mxu0 %v7477_v37 }
0x100c   : > { %8622 = vmatprep.subr.mxu0 %v7476_v47 }
0x100d   : > { %8623 = vmatpush3.msra.mxu0 %v7476_v47 }
0x1082   : > { %v7148_v48 = vpop.xlane.xlu0 %7147 }
0x1083   : > { %v7168_v39 = vmul.f32 0.03125, %v7148_v48 }
0x1084   : > { %v7145_v18 = vpop.xlane.xlu1 %7144 }
0x1085   : > { %v10685_v3 = vsub.f32 %v10645_v29, %v7168_v39  ;;  %v7167_v5 = vmul.f32 0.03125, %v7145_v18 }
0x1087   : > { %v10688_v45 = vsub.f32 %v10648_v57, %v7167_v5  ;;  %v7184_v10 = vmul.f32 %v10685_v3, %v10685_v3 }
0x1088   : > { %v7154_v44 = vpop.xlane.xlu1 %7153 }
0x1089   : > { %v7151_v30 = vpop.xlane.xlu0 %7150  ;;  %v7170_v49 = vmul.f32 0.03125, %v7154_v44  ;;  %v7194_v24 = vsel %vm373_vm0, %v7184_v10, 0.0  ;;  %v7183_v14 = vmul.f32 %v10688_v45, %v10688_v45 }
0x108a   : > { %v7169_v55 = vmul.f32 0.03125, %v7151_v30  ;;  %7195 = vadd.xlane.f32.xlu1 %v7194_v24 }
0x108b   : > { %v10696_v62 = vsub.f32 %v10655_v7, %v7170_v49  ;;  %v7191_v1 = vsel %vm373_vm0, %v7183_v14, 0.0 }
0x108c   : > { %v10700_v38 = vsub.f32 %v10658_v19, %v7169_v55  ;;  %7192 = vadd.xlane.f32.xlu0 %v7191_v1  ;;  %v7160_v0 = vpop.xlane.xlu1 %7159 }
0x108d   : > { %v7157_v11 = vpop.xlane.xlu0 %7156  ;;  %v7172_v54 = vmul.f32 0.03125, %v7160_v0  ;;  %v7186_v33 = vmul.f32 %v10696_v62, %v10696_v62 }
0x108e   : > { %v7171_v42 = vmul.f32 0.03125, %v7157_v11  ;;  %v7185_v20 = vmul.f32 %v10700_v38, %v10700_v38 }
0x108f   : > { %v10707_v56 = vsub.f32 %v10663_v26, %v7172_v54  ;;  %v7200_v27 = vsel %vm373_vm0, %v7186_v33, 0.0 }
0x1090   : > { %v10711_v16 = vsub.f32 %v10668_v28, %v7171_v42  ;;  %v7197_v15 = vsel %vm373_vm0, %v7185_v20, 0.0  ;;  %7201 = vadd.xlane.f32.xlu1 %v7200_v27  ;;  %v7166_v25 = vpop.xlane.xlu1 %7165 }
0x1091   : > { %v7163_v51 = vpop.xlane.xlu0 %7162  ;;  %7198 = vadd.xlane.f32.xlu0 %v7197_v15  ;;  %v7174_v21 = vmul.f32 0.03125, %v7166_v25  ;;  %v7188_v31 = vmul.f32 %v10707_v56, %v10707_v56 }
0x1092   : > { %v7173_v43 = vmul.f32 0.03125, %v7163_v51  ;;  %v7187_v34 = vmul.f32 %v10711_v16, %v10711_v16 }
0x1093   : > { %v10719_v46 = vsub.f32 %v10673_v13, %v7174_v21  ;;  %v7206_v63 = vsel %vm373_vm0, %v7188_v31, 0.0 }
0x1094   : > { %v10723_v22 = vsub.f32 %v10678_v2, %v7173_v43  ;;  %v7203_v35 = vsel %vm373_vm0, %v7187_v34, 0.0  ;;  %7207 = vadd.xlane.f32.xlu1 %v7206_v63 }
0x1095   : > { %7204 = vadd.xlane.f32.xlu0 %v7203_v35  ;;  %v7190_v53 = vmul.f32 %v10719_v46, %v10719_v46 }
0x1096   : > { %v7189_v36 = vmul.f32 %v10723_v22, %v10723_v22 }
0x1097   : > { %v7212_v50 = vsel %vm373_vm0, %v7190_v53, 0.0 }
0x1098   : > { %v7209_v6 = vsel %vm373_vm0, %v7189_v36, 0.0  ;;  %7213 = vadd.xlane.f32.xlu1 %v7212_v50 }
0x1099   : > { %7210 = vadd.xlane.f32.xlu0 %v7209_v6 }
0x1113   : > { %v7196_v8 = vpop.xlane.xlu1 %7195 }
0x1114   : > { %v7216_v23 = vmul.f32 0.032258064, %v7196_v8 }
0x1115   : > { %v7193_v59 = vpop.xlane.xlu0 %7192 }
0x1116   : > { %8949 = vrsqrt.f32 %v7216_v23  ;;  %v7215_v12 = vmul.f32 0.032258064, %v7193_v59  ;;  %vm7232_vm3 = vcmp.eq.f32.partialorder %v7216_v23, inf  ;;  %v7235_v1 = vand.u32 2147483648, %v7216_v23 }
0x1117   : > { %vm7234_vm4 = vcmp.eq.f32.partialorder %v7216_v23, 0.0 }
0x1118   : > { %8951 = vrsqrt.f32 %v7215_v12  ;;  %vm7225_vm5 = vcmp.eq.f32.partialorder %v7215_v12, inf  ;;  %v7228_v20 = vand.u32 2147483648, %v7215_v12  ;;  %vm7227_vm6 = vcmp.eq.f32.partialorder %v7215_v12, 0.0 }
0x1119   : > { %v7202_v40 = vpop.xlane.xlu1 %7201 }
0x111a   : > { %v7199_v32 = vpop.xlane.xlu0 %7198  ;;  %v7218_v17 = vmul.f32 0.032258064, %v7202_v40 }
0x111b   : > { %v7217_v48 = vmul.f32 0.032258064, %v7199_v32 }
0x111c   : > { %8953 = vrsqrt.f32 %v7218_v17  ;;  %vm7246_vm7 = vcmp.eq.f32.partialorder %v7218_v17, inf  ;;  %v7249_v34 = vand.u32 2147483648, %v7218_v17  ;;  %vm7248_vm9 = vcmp.eq.f32.partialorder %v7218_v17, 0.0 }
0x111d   : > { %8955 = vrsqrt.f32 %v7217_v48  ;;  %v7208_v39 = vpop.xlane.xlu1 %7207  ;;  %vm7239_vm8 = vcmp.eq.f32.partialorder %v7217_v48, inf  ;;  %v7242_v63 = vand.u32 2147483648, %v7217_v48  ;;  %vm7241_vm10 = vcmp.eq.f32.partialorder %v7217_v48, 0.0 }
0x111e   : > { %v7205_v18 = vpop.xlane.xlu0 %7204  ;;  %v7220_v5 = vmul.f32 0.032258064, %v7208_v39 }
0x111f   : > { %v7219_v10 = vmul.f32 0.032258064, %v7205_v18 }
0x1120   : > { %8957 = vrsqrt.f32 %v7220_v5  ;;  %vm7260_vm11 = vcmp.eq.f32.partialorder %v7220_v5, inf  ;;  %vm7262_vm12 = vcmp.eq.f32.partialorder %v7220_v5, 0.0  ;;  %v7263_v52 = vand.u32 2147483648, %v7220_v5 }
0x1121   : > { %8959 = vrsqrt.f32 %v7219_v10  ;;  %v7214_v44 = vpop.xlane.xlu1 %7213  ;;  %vm7253_vm13 = vcmp.eq.f32.partialorder %v7219_v10, inf  ;;  %v7256_v4 = vand.u32 2147483648, %v7219_v10  ;;  %vm7255_vm14 = vcmp.eq.f32.partialorder %v7219_v10, 0.0 }
0x1122   : > { %v7211_v30 = vpop.xlane.xlu0 %7210  ;;  %v10732_v49 = vmul.f32 0.032258064, %v7214_v44 }
0x1123   : > { %v8950_v24 = vpop.eup %8949  ;;  %v10734_v14 = vmul.f32 0.032258064, %v7211_v30 }
0x1124   : > { %v7231_v55 = vmul.f32 %v8950_v24, %v7216_v23  ;;  %8961 = vrsqrt.f32 %v10732_v49  ;;  %vm7274_vm15 = vcmp.eq.f32.partialorder %v10732_v49, inf  ;;  %vm7276_vm1 = vcmp.eq.f32.partialorder %v10732_v49, 0.0 }
0x1125   : > { %8963 = vrsqrt.f32 %v10734_v14  ;;  %v8952_v0 = vpop.eup %8951  ;;  %v7277_v39 = vand.u32 2147483648, %v10732_v49  ;;  %vm7267_vm2 = vcmp.eq.f32.partialorder %v10734_v14, inf  ;;  %v7270_v18 = vand.u32 2147483648, %v10734_v14 }
0x1126   : > { %v7233_v11 = vsel %vm7232_vm3, %v7216_v23, %v7231_v55  ;;  %v7224_v33 = vmul.f32 %v8952_v0, %v7215_v12  ;;  %vm7269_vm3 = vcmp.eq.f32.partialorder %v10734_v14, 0.0 }
0x1127   : > { %v7236_v54 = vsel %vm7234_vm4, %v7235_v1, %v7233_v11  ;;  %vm7486_vm4 = vcmask 523264  }
0x1128   : > { %v7292_v42 = vadd.f32 1e-06, %v7236_v54  ;;  %v7226_v15 = vsel %vm7225_vm5, %v7215_v12, %v7224_v33 }
0x1129   : > { %v8954_v27 = vpop.eup %8953  ;;  %v7229_v51 = vsel %vm7227_vm6, %v7228_v20, %v7226_v15 }
0x112a   : > { %v8956_v25 = vpop.eup %8955  ;;  %8965 = vrcp.f32 %v7292_v42  ;;  %v7245_v21 = vmul.f32 %v8954_v27, %v7218_v17  ;;  %v7291_v31 = vadd.f32 1e-06, %v7229_v51 }
0x112b   : > { %v7238_v43 = vmul.f32 %v8956_v25, %v7217_v48 }
0x112c   : > { %v7247_v35 = vsel %vm7246_vm7, %v7218_v17, %v7245_v21  ;;  %8967 = vrcp.f32 %v7291_v31 }
0x112d   : > { %v8958_v53 = vpop.eup %8957  ;;  %v7240_v36 = vsel %vm7239_vm8, %v7217_v48, %v7238_v43  ;;  %v7250_v50 = vsel %vm7248_vm9, %v7249_v34, %v7247_v35 }
0x112e   : > { %v8960_v6 = vpop.eup %8959  ;;  %v7243_v61 = vsel %vm7241_vm10, %v7242_v63, %v7240_v36  ;;  %v7294_v41 = vadd.f32 1e-06, %v7250_v50  ;;  %v7259_v60 = vmul.f32 %v8958_v53, %v7220_v5 }
0x112f   : > { %v7293_v9 = vadd.f32 1e-06, %v7243_v61  ;;  %v7252_v58 = vmul.f32 %v8960_v6, %v7219_v10 }
0x1130   : > { %8969 = vrcp.f32 %v7294_v41  ;;  %v7261_v37 = vsel %vm7260_vm11, %v7220_v5, %v7259_v60 }
0x1131   : > { %v8962_v47 = vpop.eup %8961  ;;  %8971 = vrcp.f32 %v7293_v9  ;;  %v7254_v8 = vsel %vm7253_vm13, %v7219_v10, %v7252_v58  ;;  %v7264_v23 = vsel %vm7262_vm12, %v7263_v52, %v7261_v37  ;;  %v7931_v10 = vld [vmem:[#allocation5 + $0x20] ss:$0 sm:$0xff]  ;;  %v7474_v52 = vld [vmem:[#allocation5 + $0x130] sm:$0xff] }
0x1132   : > { %v8964_v59 = vpop.eup %8963  ;;  %v7257_v12 = vsel %vm7255_vm14, %v7256_v4, %v7254_v8  ;;  %v7296_v40 = vadd.f32 1e-06, %v7264_v23  ;;  %v7273_v32 = vmul.f32 %v8962_v47, %v10732_v49  ;;  %v7284_v11 = vmul.f32 %v7931_v10, %v10685_v3  ;;  %v7933_v4 = vld [vmem:[#allocation5 + $0x120] ss:$0 sm:$0xff] }
0x1133   : > { %v7295_v17 = vadd.f32 1e-06, %v7257_v12  ;;  %v7266_v48 = vmul.f32 %v8964_v59, %v10734_v14  ;;  %v7283_v54 = vmul.f32 %v7931_v10, %v10688_v45  ;;  %v7286_v27 = vmul.f32 %v7931_v10, %v10696_v62 }
0x1134   : > { %8973 = vrcp.f32 %v7296_v40  ;;  %v7275_v5 = vsel %vm7274_vm15, %v10732_v49, %v7273_v32  ;;  %v7932_v49 = vld [vmem:[#allocation5 + $0x28] ss:$0 sm:$0xff]  ;;  %v7288_v43 = vmul.f32 %v7931_v10, %v10707_v56  ;;  %v7287_v63 = vmul.f32 %v7931_v10, %v10711_v16 }
0x1135   : > { %8975 = vrcp.f32 %v7295_v17  ;;  %v7268_v44 = vsel %vm7267_vm2, %v10734_v14, %v7266_v48  ;;  %v7278_v30 = vsel %vm7276_vm1, %v7277_v39, %v7275_v5  ;;  %v7285_v14 = vmul.f32 %v7931_v10, %v10700_v38 }
0x1136   : > { %v7271_v24 = vsel %vm7269_vm3, %v7270_v18, %v7268_v44  ;;  %v7298_v55 = vadd.f32 1e-06, %v7278_v30  ;;  %v7290_v36 = vmul.f32 %v7931_v10, %v10719_v46  ;;  %v7289_v56 = vmul.f32 %v7931_v10, %v10723_v22  ;;  %v7475_v46 = vld [vmem:[#allocation5 + $0x138] sm:$0xff]  ;;  %v7473_v22 = vld [vmem:[#allocation5 + $0x128] sm:$0xff] }
0x1137   : > { %v8966_v1 = vpop.eup %8965  ;;  %v7297_v0 = vadd.f32 1e-06, %v7271_v24  ;;  %8624 = vmatprep.subr.mxu0 %v7475_v46 }
0x1138   : > { %8977 = vrcp.f32 %v7298_v55  ;;  %v7308_v42 = vmul.f32 %v8966_v1, %v7284_v11  ;;  %8625 = vmatpush3.msra.mxu0 %v7475_v46 }
0x1139   : > { %8979 = vrcp.f32 %v7297_v0  ;;  %v8968_v33 = vpop.eup %8967  ;;  %8626 = vmatprep.subr.mxu0 %v7474_v52 }
0x113a   : > { %v7307_v20 = vmul.f32 %v8968_v33, %v7283_v54  ;;  %v7320_v21 = vadd.f32 %v7932_v49, %v7308_v42  ;;  %8627 = vmatpush3.msra.mxu0 %v7474_v52 }
0x113b   : > { %8628 = vmatprep.subr.mxu0 %v7473_v22 }
0x113c   : > { %v7319_v25 = vadd.f32 %v7932_v49, %v7307_v20  ;;  %8629 = vmatpush3.msra.mxu0 %v7473_v22 }
0x113d   : > { %v8970_v15 = vpop.eup %8969 }
0x113e   : > { %v8972_v51 = vpop.eup %8971  ;;  %v7310_v31 = vmul.f32 %v8970_v15, %v7286_v27  ;;  %8602 = vmatprep.mubr.msk.f32.mxu1 %vm373_vm0, %v7319_v25 }
0x113f   : > { %v7309_v3 = vmul.f32 %v8972_v51, %v7285_v14  ;;  %8603 = vmatmul.mubr.msk.f32.vlgmr.msra.gmra.mxu1 %vm373_vm0, %v7320_v21 }
0x1140   : > { %v7322_v45 = vadd.f32 %v7932_v49, %v7310_v31 }
0x1141   : > { %v8974_v34 = vpop.eup %8973  ;;  %v7321_v35 = vadd.f32 %v7932_v49, %v7309_v3 }
0x1142   : > { %v8976_v62 = vpop.eup %8975  ;;  %v7312_v53 = vmul.f32 %v8974_v34, %v7288_v43 }
0x1143   : > { %8605 = vmatprep.mubr.msk.f32.mxu1 %vm373_vm0, %v7321_v35  ;;  %v7311_v38 = vmul.f32 %v8976_v62, %v7287_v63 }
0x1144   : > { %8606 = vmatmul.mubr.msk.f32.gmra.mxu1 %vm373_vm0, %v7322_v45  ;;  %v7324_v50 = vadd.f32 %v7932_v49, %v7312_v53 }
0x1145   : > { %v8978_v6 = vpop.eup %8977  ;;  %v7323_v61 = vadd.f32 %v7932_v49, %v7311_v38 }
0x1146   : > { %v8980_v41 = vpop.eup %8979  ;;  %v7314_v60 = vmul.f32 %v8978_v6, %v7290_v36 }
0x1147   : > { %8608 = vmatprep.mubr.msk.f32.mxu1 %vm373_vm0, %v7323_v61  ;;  %v7313_v16 = vmul.f32 %v8980_v41, %v7289_v56 }
0x1148   : > { %8609 = vmatmul.mubr.msk.f32.gmra.mxu1 %vm373_vm0, %v7324_v50  ;;  %v7326_v9 = vadd.f32 %v7932_v49, %v7314_v60 }
0x1149   : > { %v7325_v58 = vadd.f32 %v7932_v49, %v7313_v16  ;;  %v7942_v49 = vld [vmem:[#allocation5 + $0x168] ss:$0 sm:$0xff] }
0x114b   : > { %8611 = vmatprep.mubr.msk.f32.mxu1 %vm373_vm0, %v7325_v58 }
0x114c   : > { %8612 = vmatmul.mubr.msk.f32.gmra.mxu1 %vm373_vm0, %v7326_v9 }
0x11ff   : > { %v8604_v37 = vpop.f32.mrf.mxu1 }
0x1200   : > { %v7432_v47 = vadd.f32 %v8604_v37, %v7933_v4 }
0x1201   : > { %v7426_v8 = vpop.f32.mrf.mxu1 }
0x1202   : > { %v7427_v23 = vadd.f32 %v7933_v4, %v7426_v8  ;;  %v7466_v40 = vmax.f32 %v7432_v47, 0.0 }
0x1204   : > { %v8607_v59 = vpop.f32.mrf.mxu1  ;;  %v7465_v12 = vmax.f32 %v7427_v23, 0.0 }
0x1205   : > { %v7442_v32 = vadd.f32 %v8607_v59, %v7933_v4 }
0x1206   : > { %v7436_v17 = vpop.f32.mrf.mxu1  ;;  %8630 = vmatprep.mubr.msk.f32.mxu0 %vm7486_vm4, %v7465_v12 }
0x1207   : > { %v7437_v48 = vadd.f32 %v7933_v4, %v7436_v17  ;;  %8631 = vmatmul.mubr.msk.f32.vlgmr.msra.gmra.mxu0 %vm7486_vm4, %v7466_v40  ;;  %v7468_v5 = vmax.f32 %v7442_v32, 0.0 }
0x1208   : > { %v8610_v39 = vpop.f32.mrf.mxu1 }
0x1209   : > { %v7467_v18 = vmax.f32 %v7437_v48, 0.0  ;;  %v7452_v10 = vadd.f32 %v8610_v39, %v7933_v4 }
0x120a   : > { %v7446_v44 = vpop.f32.mrf.mxu1 }
0x120b   : > { %v7447_v30 = vadd.f32 %v7933_v4, %v7446_v44  ;;  %8633 = vmatprep.mubr.msk.f32.mxu0 %vm7486_vm4, %v7467_v18  ;;  %v7470_v1 = vmax.f32 %v7452_v10, 0.0 }
0x120c   : > { %v8613_v24 = vpop.f32.mrf.mxu1  ;;  %8634 = vmatmul.mubr.msk.f32.gmra.mxu0 %vm7486_vm4, %v7468_v5 }
0x120d   : > { %v7469_v55 = vmax.f32 %v7447_v30, 0.0  ;;  %v7462_v0 = vadd.f32 %v8613_v24, %v7933_v4 }
0x120e   : > { %v7456_v11 = vpop.f32.mrf.mxu1 }
0x120f   : > { %v7457_v54 = vadd.f32 %v7933_v4, %v7456_v11  ;;  %8636 = vmatprep.mubr.msk.f32.mxu0 %vm7486_vm4, %v7469_v55  ;;  %v7472_v42 = vmax.f32 %v7462_v0, 0.0 }
0x1210   : > { %8637 = vmatmul.mubr.msk.f32.gmra.mxu0 %vm7486_vm4, %v7470_v1 }
0x1211   : > { %v7471_v33 = vmax.f32 %v7457_v54, 0.0 }
0x1213   : > { %8639 = vmatprep.mubr.msk.f32.mxu0 %vm7486_vm4, %v7471_v33 }
0x1214   : > { %8640 = vmatmul.mubr.msk.f32.gmra.mxu0 %vm7486_vm4, %v7472_v42 }
0x12c7   : > { %v8632_v20 = vpop.f32.mrf.mxu0 }
0x12c8   : > { %v7583_v27 = vadd.f32 %v8632_v20, %v7942_v49 }
0x12c9   : > { %v7577_v15 = vpop.f32.mrf.mxu0 }
0x12ca   : > { %v7617_v14 = vadd.f32 %v7583_v27, %v10645_v29  ;;  %v7578_v25 = vadd.f32 %v7942_v49, %v7577_v15 }
0x12cc   : > { %v8635_v51 = vpop.f32.mrf.mxu0  ;;  %7625 = vst.msk [vmem:[%s10775_s27 + $0x8] sm:$0xff] %vm373_vm0, %v7617_v14  ;;  %v7616_v21 = vadd.f32 %v7578_v25, %v10648_v57 }
0x12cd   : > { %v7593_v31 = vadd.f32 %v8635_v51, %v7942_v49 }
0x12ce   : > { %v7587_v3 = vpop.f32.mrf.mxu0  ;;  %7624 = vst.msk [vmem:[%s10775_s27] sm:$0xff] %vm373_vm0, %v7616_v21 }
0x12cf   : > { %v7619_v29 = vadd.f32 %v7593_v31, %v10655_v7  ;;  %v7588_v43 = vadd.f32 %v7942_v49, %v7587_v3 }
0x12d0   : > { %v8638_v45 = vpop.f32.mrf.mxu0 }
0x12d1   : > { %7627 = vst.msk [vmem:[%s10775_s27 + $0x18] sm:$0xff] %vm373_vm0, %v7619_v29  ;;  %v7618_v34 = vadd.f32 %v7588_v43, %v10658_v19  ;;  %v7603_v63 = vadd.f32 %v8638_v45, %v7942_v49 }
0x12d2   : > { %v7597_v35 = vpop.f32.mrf.mxu0 }
0x12d3   : > { %7626 = vst.msk [vmem:[%s10775_s27 + $0x10] sm:$0xff] %vm373_vm0, %v7618_v34  ;;  %v7621_v57 = vadd.f32 %v7603_v63, %v10663_v26  ;;  %v7598_v62 = vadd.f32 %v7942_v49, %v7597_v35 }
0x12d4   : > { %v8641_v53 = vpop.f32.mrf.mxu0 }
0x12d5   : > { %7629 = vst.msk [vmem:[%s10775_s27 + $0x28] sm:$0xff] %vm373_vm0, %v7621_v57  ;;  %v7620_v7 = vadd.f32 %v7598_v62, %v10668_v28  ;;  %v7613_v38 = vadd.f32 %v8641_v53, %v7942_v49 }
0x12d6   : > { %v7607_v36 = vpop.f32.mrf.mxu0 }
0x12d7   : > { %7628 = vst.msk [vmem:[%s10775_s27 + $0x20] sm:$0xff] %vm373_vm0, %v7620_v7  ;;  %v7623_v19 = vadd.f32 %v7613_v38, %v10673_v13  ;;  %v7608_v50 = vadd.f32 %v7942_v49, %v7607_v36 }
0x12d9   : > { %7631 = vst.msk [vmem:[%s10775_s27 + $0x38] sm:$0xff] %vm373_vm0, %v7623_v19  ;;  %v7622_v26 = vadd.f32 %v7608_v50, %v10678_v2 }
0x12db   : > { %7630 = vst.msk [vmem:[%s10775_s27 + $0x30] sm:$0xff] %vm373_vm0, %v7622_v26 }
0x12dc   : > { %9048 = shalt.err (!%p9045_p5)
}
0x12dd   : > { %s9049_s29 = scalar_lea.hbm %s10800_s11, 1024  ;;  %s9053_s23 = scalar_lea.hbm %s10856_s5, 2048 }
0x12de   : > { %p9050_p2 = scmp.ne.s32.totalorder %s10800_s11, %s9049_s29  ;;  %p9054_p6 = scmp.lt.s32.totalorder %s10800_s11, %s10856_s5 }
0x12df   : > { %p9055_p8 = scmp.lt.s32.totalorder %s9053_s23, %s9049_s29 }
0x12e0   : > { %p9051_p1 = pnand %p9050_p2, %p10903_p7 }
0x12e1   : > { %p9056_p3 = por %p9055_p8, %p9054_p6 }
0x12e2   : > { %p9052_p4 = pneg %p9051_p1 }
0x12e4   : > { %p9057_p11 = pnand %p9056_p3, %p9052_p4 }
0x12e6   : > { %9060 = shalt.err (!%p9057_p11)
}
0x12e7   : > { %s9123_s28 = smov 128  }
0x12e8   : > { %8656 = dma.vmem_to_hbm [thread:$0]  (%p10903_p7), %s10805_s15, 1024, %s10800_s11, %s7633_s22, %s9123_s28, %s9123_s28, %s9119_s24  }
0x12e9 PF: > { %s7661_s12 = sand.u32 1, %s9091_s18   ;;  %p10904_p9 = scmp.ne.s32.totalorder %s10873_s25, 0 }
0x12ea   : > { %p10905_p10 = scmp.ge.s32.totalorder %s9103_s21, 2  ;;  %s7662_s17 = scalar_lea.sflag [#allocation4], %s7661_s12 }
0x12ec   : > { %p8667_p12 = pnand %p10905_p10, %p10904_p9 }
0x12ee   : > { %p8668_p13 = pneg %p8667_p12 }
0x12f0   : > { %9086 = dma.done.wait (%p8668_p13), %s7662_s17, 1024  }
0x12f1   : > { %9088 = vsyncadd (%p8668_p13), %s7662_s17, 4294966272  ;;  %p19_p0 = scmp.ge.s32.totalorder %s9208_s30, 4   ;;  %s10906_s18 = smov %s9095_s19 }
0x12f2   : > { %s10907_s19 = smov %s9099_s20  ;;  %s10908_s20 = smov %s9228_s13 }
0x12f3   : > { %s10909_s21 = smov %s9208_s30  ;;  %21 = sbr.rel (!%p19_p0) target bundleno = 6 (0x6), region = 98 }
0x12f8   :  { %7667 = vsyncpa [#allocation3], 1 }
0x12f9   :  { %7669 = vsyncpa [#allocation3 + $0x1], 1 }
0x12fa   :  { %7670 = vsyncpa [#allocation6], 1 }
0x12fb   :  { %7671 = vsyncpa [#allocation4], 1 }
0x12fc   :  { %7673 = vsyncpa [#allocation4 + $0x1], 1 }

</bundles_post_ra>
